<compile_context>
chip_gen: v7x
topology: tpu7x:2x2x1
jax: 0.10.0
libtpu: 0.0.40
codegen_flags: <defaults>
</compile_context>

<pallas_src>
import functools
import math

import jax
import jax.numpy as jnp
from jax import lax
from jax.experimental import pallas as pl
from jax.experimental.pallas import tpu as pltpu

LANE = 128          # padded lane width for d_emb / d_hid / num_class
_TARGET_ROWS = 128  # pack sequences until ~this many matmul rows per grid step


def _pad2(a, rows, cols, dtype=jnp.float32):
    out = jnp.zeros((rows, cols), jnp.float32)
    out = out.at[: a.shape[0], : a.shape[1]].set(a.astype(jnp.float32))
    return out.astype(dtype)


def _pad1(v):
    out = jnp.zeros((LANE,), jnp.float32)
    return out.at[: v.shape[0]].set(v.astype(jnp.float32))


# ---------------------------------------------------------------------------
# Fused kernel: PE add + nlayers encoder layers + max-pool + classifier
# ---------------------------------------------------------------------------
def fused_transformer_kernel(x_ref, pe_ref, wmat_ref, vec_ref, wc_ref, bc_ref,
                             o_ref, *, nlayers, nhead, head_dim, d_real):
    Bt, S, Dp = x_ref.shape          # sequences per block, seq len, padded lanes
    M = Bt * S                       # matmul rows per grid step
    f32, bf16 = jnp.float32, jnp.bfloat16

    lane2 = lax.broadcasted_iota(jnp.int32, (1, Dp), 1)
    lane3 = lax.broadcasted_iota(jnp.int32, (1, 1, Dp), 2)
    valid = lane2 < d_real
    inv_d = 1.0 / d_real

    def layer_norm(y, gamma, beta):
        # LayerNorm over the d_real (=d_emb) real lanes only; padded lanes stay 0.
        mu = jnp.sum(y, axis=-1, keepdims=True) * inv_d
        diff = jnp.where(valid, y - mu, 0.0)
        var = jnp.sum(diff * diff, axis=-1, keepdims=True) * inv_d
        return diff * lax.rsqrt(var + 1e-5) * gamma + beta

    # Embedding (bf16) -> f32, add positional encoding, flatten to [M, Dp].
    x = (x_ref[...].astype(f32) + pe_ref[...]).reshape(M, Dp)

    # TODO(synk): switch to lax.fori_loop with dynamic ref indexing if nlayers
    # grows large enough that static unrolling inflates code size / spills.
    for l in range(nlayers):
        vecs = vec_ref[l]                              # [10, Dp] f32
        bq, bk, bv, bo = vecs[0:1], vecs[1:2], vecs[2:3], vecs[3:4]
        g1, be1 = vecs[4:5], vecs[5:6]
        bf1, bf2 = vecs[6:7], vecs[7:8]
        g2, be2 = vecs[8:9], vecs[9:10]

        wq, wk, wv = wmat_ref[l, 0], wmat_ref[l, 1], wmat_ref[l, 2]
        wo, w1, w2 = wmat_ref[l, 3], wmat_ref[l, 4], wmat_ref[l, 5]

        # ---- multi-head self attention: 3 lane-dense in-proj GEMMs (M rows) ----
        xb = x.astype(bf16)
        q = jnp.dot(xb, wq, preferred_element_type=f32) + bq   # [M, Dp]
        k = jnp.dot(xb, wk, preferred_element_type=f32) + bk
        v = jnp.dot(xb, wv, preferred_element_type=f32) + bv

        q3 = q.reshape(Bt, S, Dp).astype(bf16)                 # batch = sequence
        k3 = k.reshape(Bt, S, Dp)
        v3 = v.reshape(Bt, S, Dp)

        # Per-head attention without lane slicing / concat: mask K/V to the
        # head's lanes, batched einsums over the packed sequences; each head's
        # context already lands in its own lanes, so summing reconstructs the
        # lane-concatenated multi-head context. 1/sqrt(head_dim) is pre-folded
        # into wq/bq.
        ctx3 = jnp.zeros((Bt, S, Dp), f32)
        for h in range(nhead):
            lo = h * head_dim
            hm = (lane3 >= lo) & (lane3 < lo + head_dim)
            km = jnp.where(hm, k3, 0.0).astype(bf16)
            vm = jnp.where(hm, v3, 0.0).astype(bf16)
            s = jnp.einsum('bqd,bkd->bqk', q3, km,
                           preferred_element_type=f32)         # [Bt, S, S]
            s = s - jnp.max(s, axis=-1, keepdims=True)
            p = jnp.exp(s)
            p = p * pl.reciprocal(jnp.sum(p, axis=-1, keepdims=True), approx=True)
            ctx3 = ctx3 + jnp.einsum('bqk,bkd->bqd', p.astype(bf16), vm,
                                     preferred_element_type=f32)

        ctx = ctx3.reshape(M, Dp).astype(bf16)
        attn = jnp.dot(ctx, wo, preferred_element_type=f32) + bo
        x = layer_norm(x + attn, g1, be1)

        # ---- feed forward: linear1 -> relu -> linear2 ----
        h1 = jnp.maximum(
            jnp.dot(x.astype(bf16), w1, preferred_element_type=f32) + bf1, 0.0)
        ff = jnp.dot(h1.astype(bf16), w2, preferred_element_type=f32) + bf2
        x = layer_norm(x + ff, g2, be2)

    # ---- torch.max over the sequence + Linear(d_emb -> num_class) ----
    pooled = jnp.max(x.reshape(Bt, S, Dp), axis=1)              # [Bt, Dp]
    logits = (jnp.dot(pooled.astype(bf16), wc_ref[...],
                      preferred_element_type=f32) + bc_ref[...])
    o_ref[...] = logits.reshape(Bt, 1, Dp)


# ---------------------------------------------------------------------------
# Parameter init (PyTorch layout, deterministic) + one-time layout prep
# ---------------------------------------------------------------------------
def init_params(key, *, vocab_size, ntoken, d_emb, d_hid, nlayers, num_class):
    def nrm(k, shape, scale=0.05):
        return (scale * jax.random.normal(k, shape)).astype(jnp.float32)

    keys = jax.random.split(key, 3 + nlayers)
    params = {"embed": nrm(keys[0], (vocab_size, d_emb), 0.1)}

    # PositionalEncoding buffer (same formula as the PyTorch module).
    position = jnp.arange(ntoken, dtype=jnp.float32)[:, None]
    div_term = jnp.exp(jnp.arange(0, d_emb, 2, dtype=jnp.float32)
                       * (-math.log(10000.0) / d_emb))
    pe = jnp.zeros((ntoken, d_emb), jnp.float32)
    pe = pe.at[:, 0::2].set(jnp.sin(position * div_term))
    pe = pe.at[:, 1::2].set(jnp.cos(position * div_term))
    params["pe"] = pe

    layers = []
    for l in range(nlayers):
        lk = jax.random.split(keys[3 + l], 8)
        layers.append(dict(
            in_proj_weight=nrm(lk[0], (3 * d_emb, d_emb)),
            in_proj_bias=nrm(lk[1], (3 * d_emb,)),
            out_proj_weight=nrm(lk[2], (d_emb, d_emb)),
            out_proj_bias=nrm(lk[3], (d_emb,)),
            norm1_gamma=jnp.ones((d_emb,), jnp.float32),
            norm1_beta=jnp.zeros((d_emb,), jnp.float32),
            linear1_weight=nrm(lk[4], (d_hid, d_emb)),
            linear1_bias=nrm(lk[5], (d_hid,)),
            linear2_weight=nrm(lk[6], (d_emb, d_hid)),
            linear2_bias=nrm(lk[7], (d_emb,)),
            norm2_gamma=jnp.ones((d_emb,), jnp.float32),
            norm2_beta=jnp.zeros((d_emb,), jnp.float32),
        ))
    params["layers"] = layers
    params["cls_weight"] = nrm(keys[1], (num_class, d_emb))
    params["cls_bias"] = nrm(keys[2], (num_class,))
    return params


def prepare_params(raw, *, d_emb, d_hid, nhead, num_class):
    """Transpose to [in,out], fold 1/sqrt(head_dim) into Wq/bq, zero-pad lane
    dims to LANE, stack per-layer matrices into [L,6,128,128] (bf16) and
    per-layer vectors into [L,10,128] (f32). Pure one-time glue."""
    head_dim = d_emb // nhead
    scale = 1.0 / math.sqrt(head_dim)

    prep = {
        "embed": _pad2(raw["embed"], raw["embed"].shape[0], LANE, jnp.bfloat16),
        "pe": _pad2(raw["pe"], raw["pe"].shape[0], LANE),
        "wc": _pad2(raw["cls_weight"].T, LANE, LANE, jnp.bfloat16),
        "bc": _pad2(raw["cls_bias"][None, :], 1, LANE),
    }

    wmats, vecs = [], []
    for lp in raw["layers"]:
        W, b = lp["in_proj_weight"], lp["in_proj_bias"]
        Wq, Wk, Wv = W[:d_emb], W[d_emb:2 * d_emb], W[2 * d_emb:]
        bq, bk, bv = b[:d_emb], b[d_emb:2 * d_emb], b[2 * d_emb:]
        wmats.append(jnp.stack([
            _pad2((Wq * scale).T, LANE, LANE),
            _pad2(Wk.T, LANE, LANE),
            _pad2(Wv.T, LANE, LANE),
            _pad2(lp["out_proj_weight"].T, LANE, LANE),
            _pad2(lp["linear1_weight"].T, LANE, LANE),
            _pad2(lp["linear2_weight"].T, LANE, LANE),
        ], axis=0))
        vecs.append(jnp.stack([
            _pad1(bq * scale), _pad1(bk), _pad1(bv),
            _pad1(lp["out_proj_bias"]),
            _pad1(lp["norm1_gamma"]), _pad1(lp["norm1_beta"]),
            _pad1(lp["linear1_bias"]), _pad1(lp["linear2_bias"]),
            _pad1(lp["norm2_gamma"]), _pad1(lp["norm2_beta"]),
        ], axis=0))
    prep["wmat"] = jnp.stack(wmats, axis=0).astype(jnp.bfloat16)  # [L,6,128,128]
    prep["vec"] = jnp.stack(vecs, axis=0)                         # [L,10,128]
    return prep


# ---------------------------------------------------------------------------
# Forward (single fused pallas_call)
# ---------------------------------------------------------------------------
def transformer_model_forward(tokens, prep, *, nlayers, nhead, head_dim, d_emb,
                              num_class):
    B, S = tokens.shape
    # Pack multiple sequences per grid step so dense GEMMs have M = seqs*S rows.
    seqs = min(B, max(1, _TARGET_ROWS // S))
    n_blocks = pl.cdiv(B, seqs)
    Bp = n_blocks * seqs
    if Bp != B:
        tokens = jnp.concatenate(
            [tokens, jnp.zeros((Bp - B, S), tokens.dtype)], axis=0)

    # nn.Embedding lookup (gather) stays in plain JAX glue; the table is bf16 so
    # the only batch-proportional HBM stream into the kernel is halved.
    x = jnp.take(prep["embed"], tokens, axis=0)          # [Bp, S, LANE] bf16
    pe = prep["pe"][:S]                                  # [S, LANE] f32

    def rep(a):
        z = (0,) * a.ndim
        return pl.BlockSpec(a.shape, lambda g: z)        # replicated operand

    kernel = functools.partial(
        fused_transformer_kernel, nlayers=nlayers, nhead=nhead,
        head_dim=head_dim, d_real=d_emb)

    logits_padded = pl.pallas_call(
        kernel,
        out_shape=jax.ShapeDtypeStruct((Bp, 1, LANE), jnp.float32),
        grid=(n_blocks,),
        in_specs=[pl.BlockSpec((seqs, S, LANE), lambda g: (g, 0, 0)),
                  rep(pe), rep(prep["wmat"]), rep(prep["vec"]),
                  rep(prep["wc"]), rep(prep["bc"])],
        out_specs=pl.BlockSpec((seqs, 1, LANE), lambda g: (g, 0, 0)),
        compiler_params=pltpu.CompilerParams(dimension_semantics=("parallel",)),
    )(x, pe, prep["wmat"], prep["vec"], prep["wc"], prep["bc"])

    return logits_padded[:B, 0, :num_class]


# ---------------------------------------------------------------------------
if __name__ == "__main__":
    # Small shapes consistent with the module (d_emb divisible by nhead=6).
    vocab_size, ntoken = 50, 16
    d_emb, d_hid, nhead, nlayers = 48, 32, 6, 2
    num_class = 15
    head_dim = d_emb // nhead
    B, S = 2, 8

    key = jax.random.PRNGKey(0)
    pkey, tkey = jax.random.split(key)
    raw = init_params(pkey, vocab_size=vocab_size, ntoken=ntoken, d_emb=d_emb,
                      d_hid=d_hid, nlayers=nlayers, num_class=num_class)
    prep = prepare_params(raw, d_emb=d_emb, d_hid=d_hid, nhead=nhead,
                          num_class=num_class)
    tokens = jax.random.randint(tkey, (B, S), 0, vocab_size, dtype=jnp.int32)

    logits = transformer_model_forward(tokens, prep, nlayers=nlayers, nhead=nhead,
                                       head_dim=head_dim, d_emb=d_emb,
                                       num_class=num_class)
    logits = jax.block_until_ready(logits)

    assert logits.shape == (B, num_class), logits.shape
    assert bool(jnp.all(jnp.isfinite(logits)))
    print("KERNEL_OK")
</pallas_src>

<mosaic_0001>
module attributes {stable_mosaic.version = 11 : i64} {
  func.func @fused_transformer_kernel(%arg0: i32, %arg1: memref<2x8x128xbf16, #tpu.memory_space<vmem>>, %arg2: memref<8x128xf32, #tpu.memory_space<vmem>>, %arg3: memref<2x6x128x128xbf16, #tpu.memory_space<vmem>>, %arg4: memref<2x10x128xf32, #tpu.memory_space<vmem>>, %arg5: memref<128x128xbf16, #tpu.memory_space<vmem>>, %arg6: memref<1x128xf32, #tpu.memory_space<vmem>>, %arg7: memref<2x1x128xf32, #tpu.memory_space<vmem>>) attributes {dimension_semantics = [#tpu.dimension_semantics<parallel>], iteration_bounds = array<i64: 1>, scalar_prefetch = 0 : i64, scratch_operands = 0 : i64, tpu.core_type = #tpu.core_type<tc>, window_params = [{transform_indices = @transform_0, window_bounds = array<i64: 2, 8, 128>}, {pipeline_mode = #tpu.pipeline_mode<synchronous>, transform_indices = @transform_1, window_bounds = array<i64: 8, 128>}, {pipeline_mode = #tpu.pipeline_mode<synchronous>, transform_indices = @transform_2, window_bounds = array<i64: 2, 6, 128, 128>}, {pipeline_mode = #tpu.pipeline_mode<synchronous>, transform_indices = @transform_3, window_bounds = array<i64: 2, 10, 128>}, {pipeline_mode = #tpu.pipeline_mode<synchronous>, transform_indices = @transform_4, window_bounds = array<i64: 128, 128>}, {pipeline_mode = #tpu.pipeline_mode<synchronous>, transform_indices = @transform_5, window_bounds = array<i64: 1, 128>}, {transform_indices = @transform_6, window_bounds = array<i64: 2, 1, 128>}]} {
    %0 = tpu.iota {dimensions = array<i32: 1>} : vector<1x128xi32>
    %1 = tpu.iota {dimensions = array<i32: 2>} : vector<1x1x128xi32>
    %c48_i32 = arith.constant 48 : i32
    %2 = vector.broadcast %c48_i32 : i32 to vector<1x128xi32>
    %3 = arith.cmpi slt, %0, %2 : vector<1x128xi32>
    %c0 = arith.constant 0 : index
    %c0_0 = arith.constant 0 : index
    %c0_1 = arith.constant 0 : index
    %4 = vector.load %arg1[%c0, %c0_0, %c0_1] : memref<2x8x128xbf16, #tpu.memory_space<vmem>>, vector<2x8x128xbf16>
    %5 = arith.extf %4 : vector<2x8x128xbf16> to vector<2x8x128xf32>
    %c0_2 = arith.constant 0 : index
    %c0_3 = arith.constant 0 : index
    %6 = vector.load %arg2[%c0_2, %c0_3] : memref<8x128xf32, #tpu.memory_space<vmem>>, vector<8x128xf32>
    %7 = vector.shape_cast %6 : vector<8x128xf32> to vector<1x8x128xf32>
    %8 = vector.broadcast %7 : vector<1x8x128xf32> to vector<2x8x128xf32>
    %9 = arith.addf %5, %8 : vector<2x8x128xf32>
    %10 = vector.shape_cast %9 : vector<2x8x128xf32> to vector<16x128xf32>
    %c0_4 = arith.constant 0 : index
    %c0_5 = arith.constant 0 : index
    %c0_6 = arith.constant 0 : index
    %11 = vector.load %arg4[%c0_4, %c0_5, %c0_6] : memref<2x10x128xf32, #tpu.memory_space<vmem>>, vector<1x10x128xf32>
    %12 = vector.shape_cast %11 : vector<1x10x128xf32> to vector<10x128xf32>
    %13 = vector.extract_strided_slice %12 {offsets = [0, 0], sizes = [1, 128], strides = [1, 1]} : vector<10x128xf32> to vector<1x128xf32>
    %14 = vector.extract_strided_slice %12 {offsets = [1, 0], sizes = [1, 128], strides = [1, 1]} : vector<10x128xf32> to vector<1x128xf32>
    %15 = vector.extract_strided_slice %12 {offsets = [2, 0], sizes = [1, 128], strides = [1, 1]} : vector<10x128xf32> to vector<1x128xf32>
    %16 = vector.extract_strided_slice %12 {offsets = [3, 0], sizes = [1, 128], strides = [1, 1]} : vector<10x128xf32> to vector<1x128xf32>
    %17 = vector.extract_strided_slice %12 {offsets = [4, 0], sizes = [1, 128], strides = [1, 1]} : vector<10x128xf32> to vector<1x128xf32>
    %18 = vector.extract_strided_slice %12 {offsets = [5, 0], sizes = [1, 128], strides = [1, 1]} : vector<10x128xf32> to vector<1x128xf32>
    %19 = vector.extract_strided_slice %12 {offsets = [6, 0], sizes = [1, 128], strides = [1, 1]} : vector<10x128xf32> to vector<1x128xf32>
    %20 = vector.extract_strided_slice %12 {offsets = [7, 0], sizes = [1, 128], strides = [1, 1]} : vector<10x128xf32> to vector<1x128xf32>
    %21 = vector.extract_strided_slice %12 {offsets = [8, 0], sizes = [1, 128], strides = [1, 1]} : vector<10x128xf32> to vector<1x128xf32>
    %22 = vector.extract_strided_slice %12 {offsets = [9, 0], sizes = [1, 128], strides = [1, 1]} : vector<10x128xf32> to vector<1x128xf32>
    %c0_7 = arith.constant 0 : index
    %c0_8 = arith.constant 0 : index
    %c0_9 = arith.constant 0 : index
    %c0_10 = arith.constant 0 : index
    %23 = vector.load %arg3[%c0_7, %c0_8, %c0_9, %c0_10] : memref<2x6x128x128xbf16, #tpu.memory_space<vmem>>, vector<1x1x128x128xbf16>
    %24 = vector.shape_cast %23 : vector<1x1x128x128xbf16> to vector<128x128xbf16>
    %c0_11 = arith.constant 0 : index
    %c1 = arith.constant 1 : index
    %c0_12 = arith.constant 0 : index
    %c0_13 = arith.constant 0 : index
    %25 = vector.load %arg3[%c0_11, %c1, %c0_12, %c0_13] : memref<2x6x128x128xbf16, #tpu.memory_space<vmem>>, vector<1x1x128x128xbf16>
    %26 = vector.shape_cast %25 : vector<1x1x128x128xbf16> to vector<128x128xbf16>
    %c0_14 = arith.constant 0 : index
    %c2 = arith.constant 2 : index
    %c0_15 = arith.constant 0 : index
    %c0_16 = arith.constant 0 : index
    %27 = vector.load %arg3[%c0_14, %c2, %c0_15, %c0_16] : memref<2x6x128x128xbf16, #tpu.memory_space<vmem>>, vector<1x1x128x128xbf16>
    %28 = vector.shape_cast %27 : vector<1x1x128x128xbf16> to vector<128x128xbf16>
    %c0_17 = arith.constant 0 : index
    %c3 = arith.constant 3 : index
    %c0_18 = arith.constant 0 : index
    %c0_19 = arith.constant 0 : index
    %29 = vector.load %arg3[%c0_17, %c3, %c0_18, %c0_19] : memref<2x6x128x128xbf16, #tpu.memory_space<vmem>>, vector<1x1x128x128xbf16>
    %30 = vector.shape_cast %29 : vector<1x1x128x128xbf16> to vector<128x128xbf16>
    %c0_20 = arith.constant 0 : index
    %c4 = arith.constant 4 : index
    %c0_21 = arith.constant 0 : index
    %c0_22 = arith.constant 0 : index
    %31 = vector.load %arg3[%c0_20, %c4, %c0_21, %c0_22] : memref<2x6x128x128xbf16, #tpu.memory_space<vmem>>, vector<1x1x128x128xbf16>
    %32 = vector.shape_cast %31 : vector<1x1x128x128xbf16> to vector<128x128xbf16>
    %c0_23 = arith.constant 0 : index
    %c5 = arith.constant 5 : index
    %c0_24 = arith.constant 0 : index
    %c0_25 = arith.constant 0 : index
    %33 = vector.load %arg3[%c0_23, %c5, %c0_24, %c0_25] : memref<2x6x128x128xbf16, #tpu.memory_space<vmem>>, vector<1x1x128x128xbf16>
    %34 = vector.shape_cast %33 : vector<1x1x128x128xbf16> to vector<128x128xbf16>
    %35 = arith.truncf %10 : vector<16x128xf32> to vector<16x128xbf16>
    %cst = arith.constant dense<0.000000e+00> : vector<16x128xf32>
    %36 = tpu.matmul %35, %24, %cst {dimension_numbers = #tpu.dot_dimension_numbers<[1], [0], [0], [1], [0, 0, 1, 1], [], []>} : vector<16x128xbf16>, vector<128x128xbf16>, vector<16x128xf32> -> vector<16x128xf32>
    %37 = vector.broadcast %13 : vector<1x128xf32> to vector<16x128xf32>
    %38 = arith.addf %36, %37 : vector<16x128xf32>
    %cst_26 = arith.constant dense<0.000000e+00> : vector<16x128xf32>
    %39 = tpu.matmul %35, %26, %cst_26 {dimension_numbers = #tpu.dot_dimension_numbers<[1], [0], [0], [1], [0, 0, 1, 1], [], []>} : vector<16x128xbf16>, vector<128x128xbf16>, vector<16x128xf32> -> vector<16x128xf32>
    %40 = vector.broadcast %14 : vector<1x128xf32> to vector<16x128xf32>
    %41 = arith.addf %39, %40 : vector<16x128xf32>
    %cst_27 = arith.constant dense<0.000000e+00> : vector<16x128xf32>
    %42 = tpu.matmul %35, %28, %cst_27 {dimension_numbers = #tpu.dot_dimension_numbers<[1], [0], [0], [1], [0, 0, 1, 1], [], []>} : vector<16x128xbf16>, vector<128x128xbf16>, vector<16x128xf32> -> vector<16x128xf32>
    %43 = vector.broadcast %15 : vector<1x128xf32> to vector<16x128xf32>
    %44 = arith.addf %42, %43 : vector<16x128xf32>
    %45 = vector.shape_cast %38 : vector<16x128xf32> to vector<2x8x128xf32>
    %46 = arith.truncf %45 : vector<2x8x128xf32> to vector<2x8x128xbf16>
    %47 = vector.shape_cast %41 : vector<16x128xf32> to vector<2x8x128xf32>
    %48 = vector.shape_cast %44 : vector<16x128xf32> to vector<2x8x128xf32>
    %cst_28 = arith.constant 0.000000e+00 : f32
    %49 = vector.broadcast %cst_28 : f32 to vector<2x8x128xf32>
    %c0_i32 = arith.constant 0 : i32
    %50 = vector.broadcast %c0_i32 : i32 to vector<1x1x128xi32>
    %51 = arith.cmpi sge, %1, %50 : vector<1x1x128xi32>
    %c8_i32 = arith.constant 8 : i32
    %52 = vector.broadcast %c8_i32 : i32 to vector<1x1x128xi32>
    %53 = arith.cmpi slt, %1, %52 : vector<1x1x128xi32>
    %54 = arith.andi %51, %53 : vector<1x1x128xi1>
    %cst_29 = arith.constant 0.000000e+00 : f32
    %55 = vector.shape_cast %54 : vector<1x1x128xi1> to vector<1x1x128xi1>
    %56 = vector.broadcast %55 : vector<1x1x128xi1> to vector<2x8x128xi1>
    %57 = vector.broadcast %cst_29 : f32 to vector<2x8x128xf32>
    %58 = arith.select %56, %47, %57 : vector<2x8x128xi1>, vector<2x8x128xf32>
    %59 = arith.truncf %58 : vector<2x8x128xf32> to vector<2x8x128xbf16>
    %cst_30 = arith.constant 0.000000e+00 : f32
    %60 = vector.shape_cast %54 : vector<1x1x128xi1> to vector<1x1x128xi1>
    %61 = vector.broadcast %60 : vector<1x1x128xi1> to vector<2x8x128xi1>
    %62 = vector.broadcast %cst_30 : f32 to vector<2x8x128xf32>
    %63 = arith.select %61, %48, %62 : vector<2x8x128xi1>, vector<2x8x128xf32>
    %64 = arith.truncf %63 : vector<2x8x128xf32> to vector<2x8x128xbf16>
    "tpu.trace_start"() <{level = 10 : i32, message = "bqd,bkd->bqk"}> : () -> ()
    %cst_31 = arith.constant dense<0.000000e+00> : vector<2x8x8xf32>
    %65 = tpu.matmul %46, %59, %cst_31 {dimension_numbers = #tpu.dot_dimension_numbers<[2], [2], [1], [1], [0, 0, 0, 1, 1, 1], [0], [0]>} : vector<2x8x128xbf16>, vector<2x8x128xbf16>, vector<2x8x8xf32> -> vector<2x8x8xf32>
    "tpu.trace_stop"() : () -> ()
    %cst_32 = arith.constant dense<0xFF800000> : vector<2x8xf32>
    %66 = vector.multi_reduction <maximumf>, %65, %cst_32 [2] : vector<2x8x8xf32> to vector<2x8xf32>
    %67 = vector.shape_cast %66 : vector<2x8xf32> to vector<2x8x1xf32>
    %68 = vector.broadcast %67 : vector<2x8x1xf32> to vector<2x8x8xf32>
    %69 = arith.subf %65, %68 : vector<2x8x8xf32>
    %70 = math.exp %69 : vector<2x8x8xf32>
    %cst_33 = arith.constant dense<0.000000e+00> : vector<2x8xf32>
    %71 = vector.multi_reduction <add>, %70, %cst_33 [2] : vector<2x8x8xf32> to vector<2x8xf32>
    %72 = vector.shape_cast %71 : vector<2x8xf32> to vector<2x8x1xf32>
    %73 = tpu.reciprocal %72 {approx = true} : vector<2x8x1xf32> -> vector<2x8x1xf32>
    %74 = vector.broadcast %73 : vector<2x8x1xf32> to vector<2x8x8xf32>
    %75 = arith.mulf %70, %74 : vector<2x8x8xf32>
    %76 = arith.truncf %75 : vector<2x8x8xf32> to vector<2x8x8xbf16>
    "tpu.trace_start"() <{level = 10 : i32, message = "bqk,bkd->bqd"}> : () -> ()
    %cst_34 = arith.constant dense<0.000000e+00> : vector<2x8x128xf32>
    %77 = tpu.matmul %76, %64, %cst_34 {dimension_numbers = #tpu.dot_dimension_numbers<[2], [1], [1], [2], [0, 0, 0, 1, 1, 2], [0], [0]>} : vector<2x8x8xbf16>, vector<2x8x128xbf16>, vector<2x8x128xf32> -> vector<2x8x128xf32>
    "tpu.trace_stop"() : () -> ()
    %78 = arith.addf %49, %77 : vector<2x8x128xf32>
    %c8_i32_35 = arith.constant 8 : i32
    %79 = vector.broadcast %c8_i32_35 : i32 to vector<1x1x128xi32>
    %80 = arith.cmpi sge, %1, %79 : vector<1x1x128xi32>
    %c16_i32 = arith.constant 16 : i32
    %81 = vector.broadcast %c16_i32 : i32 to vector<1x1x128xi32>
    %82 = arith.cmpi slt, %1, %81 : vector<1x1x128xi32>
    %83 = arith.andi %80, %82 : vector<1x1x128xi1>
    %cst_36 = arith.constant 0.000000e+00 : f32
    %84 = vector.shape_cast %83 : vector<1x1x128xi1> to vector<1x1x128xi1>
    %85 = vector.broadcast %84 : vector<1x1x128xi1> to vector<2x8x128xi1>
    %86 = vector.broadcast %cst_36 : f32 to vector<2x8x128xf32>
    %87 = arith.select %85, %47, %86 : vector<2x8x128xi1>, vector<2x8x128xf32>
    %88 = arith.truncf %87 : vector<2x8x128xf32> to vector<2x8x128xbf16>
    %cst_37 = arith.constant 0.000000e+00 : f32
    %89 = vector.shape_cast %83 : vector<1x1x128xi1> to vector<1x1x128xi1>
    %90 = vector.broadcast %89 : vector<1x1x128xi1> to vector<2x8x128xi1>
    %91 = vector.broadcast %cst_37 : f32 to vector<2x8x128xf32>
    %92 = arith.select %90, %48, %91 : vector<2x8x128xi1>, vector<2x8x128xf32>
    %93 = arith.truncf %92 : vector<2x8x128xf32> to vector<2x8x128xbf16>
    "tpu.trace_start"() <{level = 10 : i32, message = "bqd,bkd->bqk"}> : () -> ()
    %cst_38 = arith.constant dense<0.000000e+00> : vector<2x8x8xf32>
    %94 = tpu.matmul %46, %88, %cst_38 {dimension_numbers = #tpu.dot_dimension_numbers<[2], [2], [1], [1], [0, 0, 0, 1, 1, 1], [0], [0]>} : vector<2x8x128xbf16>, vector<2x8x128xbf16>, vector<2x8x8xf32> -> vector<2x8x8xf32>
    "tpu.trace_stop"() : () -> ()
    %cst_39 = arith.constant dense<0xFF800000> : vector<2x8xf32>
    %95 = vector.multi_reduction <maximumf>, %94, %cst_39 [2] : vector<2x8x8xf32> to vector<2x8xf32>
    %96 = vector.shape_cast %95 : vector<2x8xf32> to vector<2x8x1xf32>
    %97 = vector.broadcast %96 : vector<2x8x1xf32> to vector<2x8x8xf32>
    %98 = arith.subf %94, %97 : vector<2x8x8xf32>
    %99 = math.exp %98 : vector<2x8x8xf32>
    %cst_40 = arith.constant dense<0.000000e+00> : vector<2x8xf32>
    %100 = vector.multi_reduction <add>, %99, %cst_40 [2] : vector<2x8x8xf32> to vector<2x8xf32>
    %101 = vector.shape_cast %100 : vector<2x8xf32> to vector<2x8x1xf32>
    %102 = tpu.reciprocal %101 {approx = true} : vector<2x8x1xf32> -> vector<2x8x1xf32>
    %103 = vector.broadcast %102 : vector<2x8x1xf32> to vector<2x8x8xf32>
    %104 = arith.mulf %99, %103 : vector<2x8x8xf32>
    %105 = arith.truncf %104 : vector<2x8x8xf32> to vector<2x8x8xbf16>
    "tpu.trace_start"() <{level = 10 : i32, message = "bqk,bkd->bqd"}> : () -> ()
    %cst_41 = arith.constant dense<0.000000e+00> : vector<2x8x128xf32>
    %106 = tpu.matmul %105, %93, %cst_41 {dimension_numbers = #tpu.dot_dimension_numbers<[2], [1], [1], [2], [0, 0, 0, 1, 1, 2], [0], [0]>} : vector<2x8x8xbf16>, vector<2x8x128xbf16>, vector<2x8x128xf32> -> vector<2x8x128xf32>
    "tpu.trace_stop"() : () -> ()
    %107 = arith.addf %78, %106 : vector<2x8x128xf32>
    %c16_i32_42 = arith.constant 16 : i32
    %108 = vector.broadcast %c16_i32_42 : i32 to vector<1x1x128xi32>
    %109 = arith.cmpi sge, %1, %108 : vector<1x1x128xi32>
    %c24_i32 = arith.constant 24 : i32
    %110 = vector.broadcast %c24_i32 : i32 to vector<1x1x128xi32>
    %111 = arith.cmpi slt, %1, %110 : vector<1x1x128xi32>
    %112 = arith.andi %109, %111 : vector<1x1x128xi1>
    %cst_43 = arith.constant 0.000000e+00 : f32
    %113 = vector.shape_cast %112 : vector<1x1x128xi1> to vector<1x1x128xi1>
    %114 = vector.broadcast %113 : vector<1x1x128xi1> to vector<2x8x128xi1>
    %115 = vector.broadcast %cst_43 : f32 to vector<2x8x128xf32>
    %116 = arith.select %114, %47, %115 : vector<2x8x128xi1>, vector<2x8x128xf32>
    %117 = arith.truncf %116 : vector<2x8x128xf32> to vector<2x8x128xbf16>
    %cst_44 = arith.constant 0.000000e+00 : f32
    %118 = vector.shape_cast %112 : vector<1x1x128xi1> to vector<1x1x128xi1>
    %119 = vector.broadcast %118 : vector<1x1x128xi1> to vector<2x8x128xi1>
    %120 = vector.broadcast %cst_44 : f32 to vector<2x8x128xf32>
    %121 = arith.select %119, %48, %120 : vector<2x8x128xi1>, vector<2x8x128xf32>
    %122 = arith.truncf %121 : vector<2x8x128xf32> to vector<2x8x128xbf16>
    "tpu.trace_start"() <{level = 10 : i32, message = "bqd,bkd->bqk"}> : () -> ()
    %cst_45 = arith.constant dense<0.000000e+00> : vector<2x8x8xf32>
    %123 = tpu.matmul %46, %117, %cst_45 {dimension_numbers = #tpu.dot_dimension_numbers<[2], [2], [1], [1], [0, 0, 0, 1, 1, 1], [0], [0]>} : vector<2x8x128xbf16>, vector<2x8x128xbf16>, vector<2x8x8xf32> -> vector<2x8x8xf32>
    "tpu.trace_stop"() : () -> ()
    %cst_46 = arith.constant dense<0xFF800000> : vector<2x8xf32>
    %124 = vector.multi_reduction <maximumf>, %123, %cst_46 [2] : vector<2x8x8xf32> to vector<2x8xf32>
    %125 = vector.shape_cast %124 : vector<2x8xf32> to vector<2x8x1xf32>
    %126 = vector.broadcast %125 : vector<2x8x1xf32> to vector<2x8x8xf32>
    %127 = arith.subf %123, %126 : vector<2x8x8xf32>
    %128 = math.exp %127 : vector<2x8x8xf32>
    %cst_47 = arith.constant dense<0.000000e+00> : vector<2x8xf32>
    %129 = vector.multi_reduction <add>, %128, %cst_47 [2] : vector<2x8x8xf32> to vector<2x8xf32>
    %130 = vector.shape_cast %129 : vector<2x8xf32> to vector<2x8x1xf32>
    %131 = tpu.reciprocal %130 {approx = true} : vector<2x8x1xf32> -> vector<2x8x1xf32>
    %132 = vector.broadcast %131 : vector<2x8x1xf32> to vector<2x8x8xf32>
    %133 = arith.mulf %128, %132 : vector<2x8x8xf32>
    %134 = arith.truncf %133 : vector<2x8x8xf32> to vector<2x8x8xbf16>
    "tpu.trace_start"() <{level = 10 : i32, message = "bqk,bkd->bqd"}> : () -> ()
    %cst_48 = arith.constant dense<0.000000e+00> : vector<2x8x128xf32>
    %135 = tpu.matmul %134, %122, %cst_48 {dimension_numbers = #tpu.dot_dimension_numbers<[2], [1], [1], [2], [0, 0, 0, 1, 1, 2], [0], [0]>} : vector<2x8x8xbf16>, vector<2x8x128xbf16>, vector<2x8x128xf32> -> vector<2x8x128xf32>
    "tpu.trace_stop"() : () -> ()
    %136 = arith.addf %107, %135 : vector<2x8x128xf32>
    %c24_i32_49 = arith.constant 24 : i32
    %137 = vector.broadcast %c24_i32_49 : i32 to vector<1x1x128xi32>
    %138 = arith.cmpi sge, %1, %137 : vector<1x1x128xi32>
    %c32_i32 = arith.constant 32 : i32
    %139 = vector.broadcast %c32_i32 : i32 to vector<1x1x128xi32>
    %140 = arith.cmpi slt, %1, %139 : vector<1x1x128xi32>
    %141 = arith.andi %138, %140 : vector<1x1x128xi1>
    %cst_50 = arith.constant 0.000000e+00 : f32
    %142 = vector.shape_cast %141 : vector<1x1x128xi1> to vector<1x1x128xi1>
    %143 = vector.broadcast %142 : vector<1x1x128xi1> to vector<2x8x128xi1>
    %144 = vector.broadcast %cst_50 : f32 to vector<2x8x128xf32>
    %145 = arith.select %143, %47, %144 : vector<2x8x128xi1>, vector<2x8x128xf32>
    %146 = arith.truncf %145 : vector<2x8x128xf32> to vector<2x8x128xbf16>
    %cst_51 = arith.constant 0.000000e+00 : f32
    %147 = vector.shape_cast %141 : vector<1x1x128xi1> to vector<1x1x128xi1>
    %148 = vector.broadcast %147 : vector<1x1x128xi1> to vector<2x8x128xi1>
    %149 = vector.broadcast %cst_51 : f32 to vector<2x8x128xf32>
    %150 = arith.select %148, %48, %149 : vector<2x8x128xi1>, vector<2x8x128xf32>
    %151 = arith.truncf %150 : vector<2x8x128xf32> to vector<2x8x128xbf16>
    "tpu.trace_start"() <{level = 10 : i32, message = "bqd,bkd->bqk"}> : () -> ()
    %cst_52 = arith.constant dense<0.000000e+00> : vector<2x8x8xf32>
    %152 = tpu.matmul %46, %146, %cst_52 {dimension_numbers = #tpu.dot_dimension_numbers<[2], [2], [1], [1], [0, 0, 0, 1, 1, 1], [0], [0]>} : vector<2x8x128xbf16>, vector<2x8x128xbf16>, vector<2x8x8xf32> -> vector<2x8x8xf32>
    "tpu.trace_stop"() : () -> ()
    %cst_53 = arith.constant dense<0xFF800000> : vector<2x8xf32>
    %153 = vector.multi_reduction <maximumf>, %152, %cst_53 [2] : vector<2x8x8xf32> to vector<2x8xf32>
    %154 = vector.shape_cast %153 : vector<2x8xf32> to vector<2x8x1xf32>
    %155 = vector.broadcast %154 : vector<2x8x1xf32> to vector<2x8x8xf32>
    %156 = arith.subf %152, %155 : vector<2x8x8xf32>
    %157 = math.exp %156 : vector<2x8x8xf32>
    %cst_54 = arith.constant dense<0.000000e+00> : vector<2x8xf32>
    %158 = vector.multi_reduction <add>, %157, %cst_54 [2] : vector<2x8x8xf32> to vector<2x8xf32>
    %159 = vector.shape_cast %158 : vector<2x8xf32> to vector<2x8x1xf32>
    %160 = tpu.reciprocal %159 {approx = true} : vector<2x8x1xf32> -> vector<2x8x1xf32>
    %161 = vector.broadcast %160 : vector<2x8x1xf32> to vector<2x8x8xf32>
    %162 = arith.mulf %157, %161 : vector<2x8x8xf32>
    %163 = arith.truncf %162 : vector<2x8x8xf32> to vector<2x8x8xbf16>
    "tpu.trace_start"() <{level = 10 : i32, message = "bqk,bkd->bqd"}> : () -> ()
    %cst_55 = arith.constant dense<0.000000e+00> : vector<2x8x128xf32>
    %164 = tpu.matmul %163, %151, %cst_55 {dimension_numbers = #tpu.dot_dimension_numbers<[2], [1], [1], [2], [0, 0, 0, 1, 1, 2], [0], [0]>} : vector<2x8x8xbf16>, vector<2x8x128xbf16>, vector<2x8x128xf32> -> vector<2x8x128xf32>
    "tpu.trace_stop"() : () -> ()
    %165 = arith.addf %136, %164 : vector<2x8x128xf32>
    %c32_i32_56 = arith.constant 32 : i32
    %166 = vector.broadcast %c32_i32_56 : i32 to vector<1x1x128xi32>
    %167 = arith.cmpi sge, %1, %166 : vector<1x1x128xi32>
    %c40_i32 = arith.constant 40 : i32
    %168 = vector.broadcast %c40_i32 : i32 to vector<1x1x128xi32>
    %169 = arith.cmpi slt, %1, %168 : vector<1x1x128xi32>
    %170 = arith.andi %167, %169 : vector<1x1x128xi1>
    %cst_57 = arith.constant 0.000000e+00 : f32
    %171 = vector.shape_cast %170 : vector<1x1x128xi1> to vector<1x1x128xi1>
    %172 = vector.broadcast %171 : vector<1x1x128xi1> to vector<2x8x128xi1>
    %173 = vector.broadcast %cst_57 : f32 to vector<2x8x128xf32>
    %174 = arith.select %172, %47, %173 : vector<2x8x128xi1>, vector<2x8x128xf32>
    %175 = arith.truncf %174 : vector<2x8x128xf32> to vector<2x8x128xbf16>
    %cst_58 = arith.constant 0.000000e+00 : f32
    %176 = vector.shape_cast %170 : vector<1x1x128xi1> to vector<1x1x128xi1>
    %177 = vector.broadcast %176 : vector<1x1x128xi1> to vector<2x8x128xi1>
    %178 = vector.broadcast %cst_58 : f32 to vector<2x8x128xf32>
    %179 = arith.select %177, %48, %178 : vector<2x8x128xi1>, vector<2x8x128xf32>
    %180 = arith.truncf %179 : vector<2x8x128xf32> to vector<2x8x128xbf16>
    "tpu.trace_start"() <{level = 10 : i32, message = "bqd,bkd->bqk"}> : () -> ()
    %cst_59 = arith.constant dense<0.000000e+00> : vector<2x8x8xf32>
    %181 = tpu.matmul %46, %175, %cst_59 {dimension_numbers = #tpu.dot_dimension_numbers<[2], [2], [1], [1], [0, 0, 0, 1, 1, 1], [0], [0]>} : vector<2x8x128xbf16>, vector<2x8x128xbf16>, vector<2x8x8xf32> -> vector<2x8x8xf32>
    "tpu.trace_stop"() : () -> ()
    %cst_60 = arith.constant dense<0xFF800000> : vector<2x8xf32>
    %182 = vector.multi_reduction <maximumf>, %181, %cst_60 [2] : vector<2x8x8xf32> to vector<2x8xf32>
    %183 = vector.shape_cast %182 : vector<2x8xf32> to vector<2x8x1xf32>
    %184 = vector.broadcast %183 : vector<2x8x1xf32> to vector<2x8x8xf32>
    %185 = arith.subf %181, %184 : vector<2x8x8xf32>
    %186 = math.exp %185 : vector<2x8x8xf32>
    %cst_61 = arith.constant dense<0.000000e+00> : vector<2x8xf32>
    %187 = vector.multi_reduction <add>, %186, %cst_61 [2] : vector<2x8x8xf32> to vector<2x8xf32>
    %188 = vector.shape_cast %187 : vector<2x8xf32> to vector<2x8x1xf32>
    %189 = tpu.reciprocal %188 {approx = true} : vector<2x8x1xf32> -> vector<2x8x1xf32>
    %190 = vector.broadcast %189 : vector<2x8x1xf32> to vector<2x8x8xf32>
    %191 = arith.mulf %186, %190 : vector<2x8x8xf32>
    %192 = arith.truncf %191 : vector<2x8x8xf32> to vector<2x8x8xbf16>
    "tpu.trace_start"() <{level = 10 : i32, message = "bqk,bkd->bqd"}> : () -> ()
    %cst_62 = arith.constant dense<0.000000e+00> : vector<2x8x128xf32>
    %193 = tpu.matmul %192, %180, %cst_62 {dimension_numbers = #tpu.dot_dimension_numbers<[2], [1], [1], [2], [0, 0, 0, 1, 1, 2], [0], [0]>} : vector<2x8x8xbf16>, vector<2x8x128xbf16>, vector<2x8x128xf32> -> vector<2x8x128xf32>
    "tpu.trace_stop"() : () -> ()
    %194 = arith.addf %165, %193 : vector<2x8x128xf32>
    %c40_i32_63 = arith.constant 40 : i32
    %195 = vector.broadcast %c40_i32_63 : i32 to vector<1x1x128xi32>
    %196 = arith.cmpi sge, %1, %195 : vector<1x1x128xi32>
    %c48_i32_64 = arith.constant 48 : i32
    %197 = vector.broadcast %c48_i32_64 : i32 to vector<1x1x128xi32>
    %198 = arith.cmpi slt, %1, %197 : vector<1x1x128xi32>
    %199 = arith.andi %196, %198 : vector<1x1x128xi1>
    %cst_65 = arith.constant 0.000000e+00 : f32
    %200 = vector.shape_cast %199 : vector<1x1x128xi1> to vector<1x1x128xi1>
    %201 = vector.broadcast %200 : vector<1x1x128xi1> to vector<2x8x128xi1>
    %202 = vector.broadcast %cst_65 : f32 to vector<2x8x128xf32>
    %203 = arith.select %201, %47, %202 : vector<2x8x128xi1>, vector<2x8x128xf32>
    %204 = arith.truncf %203 : vector<2x8x128xf32> to vector<2x8x128xbf16>
    %cst_66 = arith.constant 0.000000e+00 : f32
    %205 = vector.shape_cast %199 : vector<1x1x128xi1> to vector<1x1x128xi1>
    %206 = vector.broadcast %205 : vector<1x1x128xi1> to vector<2x8x128xi1>
    %207 = vector.broadcast %cst_66 : f32 to vector<2x8x128xf32>
    %208 = arith.select %206, %48, %207 : vector<2x8x128xi1>, vector<2x8x128xf32>
    %209 = arith.truncf %208 : vector<2x8x128xf32> to vector<2x8x128xbf16>
    "tpu.trace_start"() <{level = 10 : i32, message = "bqd,bkd->bqk"}> : () -> ()
    %cst_67 = arith.constant dense<0.000000e+00> : vector<2x8x8xf32>
    %210 = tpu.matmul %46, %204, %cst_67 {dimension_numbers = #tpu.dot_dimension_numbers<[2], [2], [1], [1], [0, 0, 0, 1, 1, 1], [0], [0]>} : vector<2x8x128xbf16>, vector<2x8x128xbf16>, vector<2x8x8xf32> -> vector<2x8x8xf32>
    "tpu.trace_stop"() : () -> ()
    %cst_68 = arith.constant dense<0xFF800000> : vector<2x8xf32>
    %211 = vector.multi_reduction <maximumf>, %210, %cst_68 [2] : vector<2x8x8xf32> to vector<2x8xf32>
    %212 = vector.shape_cast %211 : vector<2x8xf32> to vector<2x8x1xf32>
    %213 = vector.broadcast %212 : vector<2x8x1xf32> to vector<2x8x8xf32>
    %214 = arith.subf %210, %213 : vector<2x8x8xf32>
    %215 = math.exp %214 : vector<2x8x8xf32>
    %cst_69 = arith.constant dense<0.000000e+00> : vector<2x8xf32>
    %216 = vector.multi_reduction <add>, %215, %cst_69 [2] : vector<2x8x8xf32> to vector<2x8xf32>
    %217 = vector.shape_cast %216 : vector<2x8xf32> to vector<2x8x1xf32>
    %218 = tpu.reciprocal %217 {approx = true} : vector<2x8x1xf32> -> vector<2x8x1xf32>
    %219 = vector.broadcast %218 : vector<2x8x1xf32> to vector<2x8x8xf32>
    %220 = arith.mulf %215, %219 : vector<2x8x8xf32>
    %221 = arith.truncf %220 : vector<2x8x8xf32> to vector<2x8x8xbf16>
    "tpu.trace_start"() <{level = 10 : i32, message = "bqk,bkd->bqd"}> : () -> ()
    %cst_70 = arith.constant dense<0.000000e+00> : vector<2x8x128xf32>
    %222 = tpu.matmul %221, %209, %cst_70 {dimension_numbers = #tpu.dot_dimension_numbers<[2], [1], [1], [2], [0, 0, 0, 1, 1, 2], [0], [0]>} : vector<2x8x8xbf16>, vector<2x8x128xbf16>, vector<2x8x128xf32> -> vector<2x8x128xf32>
    "tpu.trace_stop"() : () -> ()
    %223 = arith.addf %194, %222 : vector<2x8x128xf32>
    %224 = vector.shape_cast %223 : vector<2x8x128xf32> to vector<16x128xf32>
    %225 = arith.truncf %224 : vector<16x128xf32> to vector<16x128xbf16>
    %cst_71 = arith.constant dense<0.000000e+00> : vector<16x128xf32>
    %226 = tpu.matmul %225, %30, %cst_71 {dimension_numbers = #tpu.dot_dimension_numbers<[1], [0], [0], [1], [0, 0, 1, 1], [], []>} : vector<16x128xbf16>, vector<128x128xbf16>, vector<16x128xf32> -> vector<16x128xf32>
    %227 = vector.broadcast %16 : vector<1x128xf32> to vector<16x128xf32>
    %228 = arith.addf %226, %227 : vector<16x128xf32>
    %229 = arith.addf %10, %228 : vector<16x128xf32>
    %cst_72 = arith.constant dense<0.000000e+00> : vector<16xf32>
    %230 = vector.multi_reduction <add>, %229, %cst_72 [1] : vector<16x128xf32> to vector<16xf32>
    %231 = vector.shape_cast %230 : vector<16xf32> to vector<16x1xf32>
    %cst_73 = arith.constant 0.020833334 : f32
    %232 = vector.broadcast %cst_73 : f32 to vector<16x1xf32>
    %233 = arith.mulf %231, %232 : vector<16x1xf32>
    %234 = vector.broadcast %233 : vector<16x1xf32> to vector<16x128xf32>
    %235 = arith.subf %229, %234 : vector<16x128xf32>
    %cst_74 = arith.constant 0.000000e+00 : f32
    %236 = vector.shape_cast %3 : vector<1x128xi1> to vector<1x128xi1>
    %237 = vector.broadcast %236 : vector<1x128xi1> to vector<16x128xi1>
    %238 = vector.broadcast %cst_74 : f32 to vector<16x128xf32>
    %239 = arith.select %237, %235, %238 : vector<16x128xi1>, vector<16x128xf32>
    %240 = arith.mulf %239, %239 : vector<16x128xf32>
    %cst_75 = arith.constant dense<0.000000e+00> : vector<16xf32>
    %241 = vector.multi_reduction <add>, %240, %cst_75 [1] : vector<16x128xf32> to vector<16xf32>
    %242 = vector.shape_cast %241 : vector<16xf32> to vector<16x1xf32>
    %cst_76 = arith.constant 0.020833334 : f32
    %243 = vector.broadcast %cst_76 : f32 to vector<16x1xf32>
    %244 = arith.mulf %242, %243 : vector<16x1xf32>
    %cst_77 = arith.constant 9.99999974E-6 : f32
    %245 = vector.broadcast %cst_77 : f32 to vector<16x1xf32>
    %246 = arith.addf %244, %245 : vector<16x1xf32>
    %247 = math.rsqrt %246 : vector<16x1xf32>
    %248 = vector.broadcast %247 : vector<16x1xf32> to vector<16x128xf32>
    %249 = arith.mulf %239, %248 : vector<16x128xf32>
    %250 = vector.broadcast %17 : vector<1x128xf32> to vector<16x128xf32>
    %251 = arith.mulf %249, %250 : vector<16x128xf32>
    %252 = vector.broadcast %18 : vector<1x128xf32> to vector<16x128xf32>
    %253 = arith.addf %251, %252 : vector<16x128xf32>
    %254 = arith.truncf %253 : vector<16x128xf32> to vector<16x128xbf16>
    %cst_78 = arith.constant dense<0.000000e+00> : vector<16x128xf32>
    %255 = tpu.matmul %254, %32, %cst_78 {dimension_numbers = #tpu.dot_dimension_numbers<[1], [0], [0], [1], [0, 0, 1, 1], [], []>} : vector<16x128xbf16>, vector<128x128xbf16>, vector<16x128xf32> -> vector<16x128xf32>
    %256 = vector.broadcast %19 : vector<1x128xf32> to vector<16x128xf32>
    %257 = arith.addf %255, %256 : vector<16x128xf32>
    %cst_79 = arith.constant 0.000000e+00 : f32
    %258 = vector.broadcast %cst_79 : f32 to vector<16x128xf32>
    %259 = arith.maximumf %257, %258 : vector<16x128xf32>
    %260 = arith.truncf %259 : vector<16x128xf32> to vector<16x128xbf16>
    %cst_80 = arith.constant dense<0.000000e+00> : vector<16x128xf32>
    %261 = tpu.matmul %260, %34, %cst_80 {dimension_numbers = #tpu.dot_dimension_numbers<[1], [0], [0], [1], [0, 0, 1, 1], [], []>} : vector<16x128xbf16>, vector<128x128xbf16>, vector<16x128xf32> -> vector<16x128xf32>
    %262 = vector.broadcast %20 : vector<1x128xf32> to vector<16x128xf32>
    %263 = arith.addf %261, %262 : vector<16x128xf32>
    %264 = arith.addf %253, %263 : vector<16x128xf32>
    %cst_81 = arith.constant dense<0.000000e+00> : vector<16xf32>
    %265 = vector.multi_reduction <add>, %264, %cst_81 [1] : vector<16x128xf32> to vector<16xf32>
    %266 = vector.shape_cast %265 : vector<16xf32> to vector<16x1xf32>
    %cst_82 = arith.constant 0.020833334 : f32
    %267 = vector.broadcast %cst_82 : f32 to vector<16x1xf32>
    %268 = arith.mulf %266, %267 : vector<16x1xf32>
    %269 = vector.broadcast %268 : vector<16x1xf32> to vector<16x128xf32>
    %270 = arith.subf %264, %269 : vector<16x128xf32>
    %cst_83 = arith.constant 0.000000e+00 : f32
    %271 = vector.shape_cast %3 : vector<1x128xi1> to vector<1x128xi1>
    %272 = vector.broadcast %271 : vector<1x128xi1> to vector<16x128xi1>
    %273 = vector.broadcast %cst_83 : f32 to vector<16x128xf32>
    %274 = arith.select %272, %270, %273 : vector<16x128xi1>, vector<16x128xf32>
    %275 = arith.mulf %274, %274 : vector<16x128xf32>
    %cst_84 = arith.constant dense<0.000000e+00> : vector<16xf32>
    %276 = vector.multi_reduction <add>, %275, %cst_84 [1] : vector<16x128xf32> to vector<16xf32>
    %277 = vector.shape_cast %276 : vector<16xf32> to vector<16x1xf32>
    %cst_85 = arith.constant 0.020833334 : f32
    %278 = vector.broadcast %cst_85 : f32 to vector<16x1xf32>
    %279 = arith.mulf %277, %278 : vector<16x1xf32>
    %cst_86 = arith.constant 9.99999974E-6 : f32
    %280 = vector.broadcast %cst_86 : f32 to vector<16x1xf32>
    %281 = arith.addf %279, %280 : vector<16x1xf32>
    %282 = math.rsqrt %281 : vector<16x1xf32>
    %283 = vector.broadcast %282 : vector<16x1xf32> to vector<16x128xf32>
    %284 = arith.mulf %274, %283 : vector<16x128xf32>
    %285 = vector.broadcast %21 : vector<1x128xf32> to vector<16x128xf32>
    %286 = arith.mulf %284, %285 : vector<16x128xf32>
    %287 = vector.broadcast %22 : vector<1x128xf32> to vector<16x128xf32>
    %288 = arith.addf %286, %287 : vector<16x128xf32>
    %c1_87 = arith.constant 1 : index
    %c0_88 = arith.constant 0 : index
    %c0_89 = arith.constant 0 : index
    %289 = vector.load %arg4[%c1_87, %c0_88, %c0_89] : memref<2x10x128xf32, #tpu.memory_space<vmem>>, vector<1x10x128xf32>
    %290 = vector.shape_cast %289 : vector<1x10x128xf32> to vector<10x128xf32>
    %291 = vector.extract_strided_slice %290 {offsets = [0, 0], sizes = [1, 128], strides = [1, 1]} : vector<10x128xf32> to vector<1x128xf32>
    %292 = vector.extract_strided_slice %290 {offsets = [1, 0], sizes = [1, 128], strides = [1, 1]} : vector<10x128xf32> to vector<1x128xf32>
    %293 = vector.extract_strided_slice %290 {offsets = [2, 0], sizes = [1, 128], strides = [1, 1]} : vector<10x128xf32> to vector<1x128xf32>
    %294 = vector.extract_strided_slice %290 {offsets = [3, 0], sizes = [1, 128], strides = [1, 1]} : vector<10x128xf32> to vector<1x128xf32>
    %295 = vector.extract_strided_slice %290 {offsets = [4, 0], sizes = [1, 128], strides = [1, 1]} : vector<10x128xf32> to vector<1x128xf32>
    %296 = vector.extract_strided_slice %290 {offsets = [5, 0], sizes = [1, 128], strides = [1, 1]} : vector<10x128xf32> to vector<1x128xf32>
    %297 = vector.extract_strided_slice %290 {offsets = [6, 0], sizes = [1, 128], strides = [1, 1]} : vector<10x128xf32> to vector<1x128xf32>
    %298 = vector.extract_strided_slice %290 {offsets = [7, 0], sizes = [1, 128], strides = [1, 1]} : vector<10x128xf32> to vector<1x128xf32>
    %299 = vector.extract_strided_slice %290 {offsets = [8, 0], sizes = [1, 128], strides = [1, 1]} : vector<10x128xf32> to vector<1x128xf32>
    %300 = vector.extract_strided_slice %290 {offsets = [9, 0], sizes = [1, 128], strides = [1, 1]} : vector<10x128xf32> to vector<1x128xf32>
    %c1_90 = arith.constant 1 : index
    %c0_91 = arith.constant 0 : index
    %c0_92 = arith.constant 0 : index
    %c0_93 = arith.constant 0 : index
    %301 = vector.load %arg3[%c1_90, %c0_91, %c0_92, %c0_93] : memref<2x6x128x128xbf16, #tpu.memory_space<vmem>>, vector<1x1x128x128xbf16>
    %302 = vector.shape_cast %301 : vector<1x1x128x128xbf16> to vector<128x128xbf16>
    %c1_94 = arith.constant 1 : index
    %c1_95 = arith.constant 1 : index
    %c0_96 = arith.constant 0 : index
    %c0_97 = arith.constant 0 : index
    %303 = vector.load %arg3[%c1_94, %c1_95, %c0_96, %c0_97] : memref<2x6x128x128xbf16, #tpu.memory_space<vmem>>, vector<1x1x128x128xbf16>
    %304 = vector.shape_cast %303 : vector<1x1x128x128xbf16> to vector<128x128xbf16>
    %c1_98 = arith.constant 1 : index
    %c2_99 = arith.constant 2 : index
    %c0_100 = arith.constant 0 : index
    %c0_101 = arith.constant 0 : index
    %305 = vector.load %arg3[%c1_98, %c2_99, %c0_100, %c0_101] : memref<2x6x128x128xbf16, #tpu.memory_space<vmem>>, vector<1x1x128x128xbf16>
    %306 = vector.shape_cast %305 : vector<1x1x128x128xbf16> to vector<128x128xbf16>
    %c1_102 = arith.constant 1 : index
    %c3_103 = arith.constant 3 : index
    %c0_104 = arith.constant 0 : index
    %c0_105 = arith.constant 0 : index
    %307 = vector.load %arg3[%c1_102, %c3_103, %c0_104, %c0_105] : memref<2x6x128x128xbf16, #tpu.memory_space<vmem>>, vector<1x1x128x128xbf16>
    %308 = vector.shape_cast %307 : vector<1x1x128x128xbf16> to vector<128x128xbf16>
    %c1_106 = arith.constant 1 : index
    %c4_107 = arith.constant 4 : index
    %c0_108 = arith.constant 0 : index
    %c0_109 = arith.constant 0 : index
    %309 = vector.load %arg3[%c1_106, %c4_107, %c0_108, %c0_109] : memref<2x6x128x128xbf16, #tpu.memory_space<vmem>>, vector<1x1x128x128xbf16>
    %310 = vector.shape_cast %309 : vector<1x1x128x128xbf16> to vector<128x128xbf16>
    %c1_110 = arith.constant 1 : index
    %c5_111 = arith.constant 5 : index
    %c0_112 = arith.constant 0 : index
    %c0_113 = arith.constant 0 : index
    %311 = vector.load %arg3[%c1_110, %c5_111, %c0_112, %c0_113] : memref<2x6x128x128xbf16, #tpu.memory_space<vmem>>, vector<1x1x128x128xbf16>
    %312 = vector.shape_cast %311 : vector<1x1x128x128xbf16> to vector<128x128xbf16>
    %313 = arith.truncf %288 : vector<16x128xf32> to vector<16x128xbf16>
    %cst_114 = arith.constant dense<0.000000e+00> : vector<16x128xf32>
    %314 = tpu.matmul %313, %302, %cst_114 {dimension_numbers = #tpu.dot_dimension_numbers<[1], [0], [0], [1], [0, 0, 1, 1], [], []>} : vector<16x128xbf16>, vector<128x128xbf16>, vector<16x128xf32> -> vector<16x128xf32>
    %315 = vector.broadcast %291 : vector<1x128xf32> to vector<16x128xf32>
    %316 = arith.addf %314, %315 : vector<16x128xf32>
    %cst_115 = arith.constant dense<0.000000e+00> : vector<16x128xf32>
    %317 = tpu.matmul %313, %304, %cst_115 {dimension_numbers = #tpu.dot_dimension_numbers<[1], [0], [0], [1], [0, 0, 1, 1], [], []>} : vector<16x128xbf16>, vector<128x128xbf16>, vector<16x128xf32> -> vector<16x128xf32>
    %318 = vector.broadcast %292 : vector<1x128xf32> to vector<16x128xf32>
    %319 = arith.addf %317, %318 : vector<16x128xf32>
    %cst_116 = arith.constant dense<0.000000e+00> : vector<16x128xf32>
    %320 = tpu.matmul %313, %306, %cst_116 {dimension_numbers = #tpu.dot_dimension_numbers<[1], [0], [0], [1], [0, 0, 1, 1], [], []>} : vector<16x128xbf16>, vector<128x128xbf16>, vector<16x128xf32> -> vector<16x128xf32>
    %321 = vector.broadcast %293 : vector<1x128xf32> to vector<16x128xf32>
    %322 = arith.addf %320, %321 : vector<16x128xf32>
    %323 = vector.shape_cast %316 : vector<16x128xf32> to vector<2x8x128xf32>
    %324 = arith.truncf %323 : vector<2x8x128xf32> to vector<2x8x128xbf16>
    %325 = vector.shape_cast %319 : vector<16x128xf32> to vector<2x8x128xf32>
    %326 = vector.shape_cast %322 : vector<16x128xf32> to vector<2x8x128xf32>
    %cst_117 = arith.constant 0.000000e+00 : f32
    %327 = vector.broadcast %cst_117 : f32 to vector<2x8x128xf32>
    %c0_i32_118 = arith.constant 0 : i32
    %328 = vector.broadcast %c0_i32_118 : i32 to vector<1x1x128xi32>
    %329 = arith.cmpi sge, %1, %328 : vector<1x1x128xi32>
    %c8_i32_119 = arith.constant 8 : i32
    %330 = vector.broadcast %c8_i32_119 : i32 to vector<1x1x128xi32>
    %331 = arith.cmpi slt, %1, %330 : vector<1x1x128xi32>
    %332 = arith.andi %329, %331 : vector<1x1x128xi1>
    %cst_120 = arith.constant 0.000000e+00 : f32
    %333 = vector.shape_cast %332 : vector<1x1x128xi1> to vector<1x1x128xi1>
    %334 = vector.broadcast %333 : vector<1x1x128xi1> to vector<2x8x128xi1>
    %335 = vector.broadcast %cst_120 : f32 to vector<2x8x128xf32>
    %336 = arith.select %334, %325, %335 : vector<2x8x128xi1>, vector<2x8x128xf32>
    %337 = arith.truncf %336 : vector<2x8x128xf32> to vector<2x8x128xbf16>
    %cst_121 = arith.constant 0.000000e+00 : f32
    %338 = vector.shape_cast %332 : vector<1x1x128xi1> to vector<1x1x128xi1>
    %339 = vector.broadcast %338 : vector<1x1x128xi1> to vector<2x8x128xi1>
    %340 = vector.broadcast %cst_121 : f32 to vector<2x8x128xf32>
    %341 = arith.select %339, %326, %340 : vector<2x8x128xi1>, vector<2x8x128xf32>
    %342 = arith.truncf %341 : vector<2x8x128xf32> to vector<2x8x128xbf16>
    "tpu.trace_start"() <{level = 10 : i32, message = "bqd,bkd->bqk"}> : () -> ()
    %cst_122 = arith.constant dense<0.000000e+00> : vector<2x8x8xf32>
    %343 = tpu.matmul %324, %337, %cst_122 {dimension_numbers = #tpu.dot_dimension_numbers<[2], [2], [1], [1], [0, 0, 0, 1, 1, 1], [0], [0]>} : vector<2x8x128xbf16>, vector<2x8x128xbf16>, vector<2x8x8xf32> -> vector<2x8x8xf32>
    "tpu.trace_stop"() : () -> ()
    %cst_123 = arith.constant dense<0xFF800000> : vector<2x8xf32>
    %344 = vector.multi_reduction <maximumf>, %343, %cst_123 [2] : vector<2x8x8xf32> to vector<2x8xf32>
    %345 = vector.shape_cast %344 : vector<2x8xf32> to vector<2x8x1xf32>
    %346 = vector.broadcast %345 : vector<2x8x1xf32> to vector<2x8x8xf32>
    %347 = arith.subf %343, %346 : vector<2x8x8xf32>
    %348 = math.exp %347 : vector<2x8x8xf32>
    %cst_124 = arith.constant dense<0.000000e+00> : vector<2x8xf32>
    %349 = vector.multi_reduction <add>, %348, %cst_124 [2] : vector<2x8x8xf32> to vector<2x8xf32>
    %350 = vector.shape_cast %349 : vector<2x8xf32> to vector<2x8x1xf32>
    %351 = tpu.reciprocal %350 {approx = true} : vector<2x8x1xf32> -> vector<2x8x1xf32>
    %352 = vector.broadcast %351 : vector<2x8x1xf32> to vector<2x8x8xf32>
    %353 = arith.mulf %348, %352 : vector<2x8x8xf32>
    %354 = arith.truncf %353 : vector<2x8x8xf32> to vector<2x8x8xbf16>
    "tpu.trace_start"() <{level = 10 : i32, message = "bqk,bkd->bqd"}> : () -> ()
    %cst_125 = arith.constant dense<0.000000e+00> : vector<2x8x128xf32>
    %355 = tpu.matmul %354, %342, %cst_125 {dimension_numbers = #tpu.dot_dimension_numbers<[2], [1], [1], [2], [0, 0, 0, 1, 1, 2], [0], [0]>} : vector<2x8x8xbf16>, vector<2x8x128xbf16>, vector<2x8x128xf32> -> vector<2x8x128xf32>
    "tpu.trace_stop"() : () -> ()
    %356 = arith.addf %327, %355 : vector<2x8x128xf32>
    %c8_i32_126 = arith.constant 8 : i32
    %357 = vector.broadcast %c8_i32_126 : i32 to vector<1x1x128xi32>
    %358 = arith.cmpi sge, %1, %357 : vector<1x1x128xi32>
    %c16_i32_127 = arith.constant 16 : i32
    %359 = vector.broadcast %c16_i32_127 : i32 to vector<1x1x128xi32>
    %360 = arith.cmpi slt, %1, %359 : vector<1x1x128xi32>
    %361 = arith.andi %358, %360 : vector<1x1x128xi1>
    %cst_128 = arith.constant 0.000000e+00 : f32
    %362 = vector.shape_cast %361 : vector<1x1x128xi1> to vector<1x1x128xi1>
    %363 = vector.broadcast %362 : vector<1x1x128xi1> to vector<2x8x128xi1>
    %364 = vector.broadcast %cst_128 : f32 to vector<2x8x128xf32>
    %365 = arith.select %363, %325, %364 : vector<2x8x128xi1>, vector<2x8x128xf32>
    %366 = arith.truncf %365 : vector<2x8x128xf32> to vector<2x8x128xbf16>
    %cst_129 = arith.constant 0.000000e+00 : f32
    %367 = vector.shape_cast %361 : vector<1x1x128xi1> to vector<1x1x128xi1>
    %368 = vector.broadcast %367 : vector<1x1x128xi1> to vector<2x8x128xi1>
    %369 = vector.broadcast %cst_129 : f32 to vector<2x8x128xf32>
    %370 = arith.select %368, %326, %369 : vector<2x8x128xi1>, vector<2x8x128xf32>
    %371 = arith.truncf %370 : vector<2x8x128xf32> to vector<2x8x128xbf16>
    "tpu.trace_start"() <{level = 10 : i32, message = "bqd,bkd->bqk"}> : () -> ()
    %cst_130 = arith.constant dense<0.000000e+00> : vector<2x8x8xf32>
    %372 = tpu.matmul %324, %366, %cst_130 {dimension_numbers = #tpu.dot_dimension_numbers<[2], [2], [1], [1], [0, 0, 0, 1, 1, 1], [0], [0]>} : vector<2x8x128xbf16>, vector<2x8x128xbf16>, vector<2x8x8xf32> -> vector<2x8x8xf32>
    "tpu.trace_stop"() : () -> ()
    %cst_131 = arith.constant dense<0xFF800000> : vector<2x8xf32>
    %373 = vector.multi_reduction <maximumf>, %372, %cst_131 [2] : vector<2x8x8xf32> to vector<2x8xf32>
    %374 = vector.shape_cast %373 : vector<2x8xf32> to vector<2x8x1xf32>
    %375 = vector.broadcast %374 : vector<2x8x1xf32> to vector<2x8x8xf32>
    %376 = arith.subf %372, %375 : vector<2x8x8xf32>
    %377 = math.exp %376 : vector<2x8x8xf32>
    %cst_132 = arith.constant dense<0.000000e+00> : vector<2x8xf32>
    %378 = vector.multi_reduction <add>, %377, %cst_132 [2] : vector<2x8x8xf32> to vector<2x8xf32>
    %379 = vector.shape_cast %378 : vector<2x8xf32> to vector<2x8x1xf32>
    %380 = tpu.reciprocal %379 {approx = true} : vector<2x8x1xf32> -> vector<2x8x1xf32>
    %381 = vector.broadcast %380 : vector<2x8x1xf32> to vector<2x8x8xf32>
    %382 = arith.mulf %377, %381 : vector<2x8x8xf32>
    %383 = arith.truncf %382 : vector<2x8x8xf32> to vector<2x8x8xbf16>
    "tpu.trace_start"() <{level = 10 : i32, message = "bqk,bkd->bqd"}> : () -> ()
    %cst_133 = arith.constant dense<0.000000e+00> : vector<2x8x128xf32>
    %384 = tpu.matmul %383, %371, %cst_133 {dimension_numbers = #tpu.dot_dimension_numbers<[2], [1], [1], [2], [0, 0, 0, 1, 1, 2], [0], [0]>} : vector<2x8x8xbf16>, vector<2x8x128xbf16>, vector<2x8x128xf32> -> vector<2x8x128xf32>
    "tpu.trace_stop"() : () -> ()
    %385 = arith.addf %356, %384 : vector<2x8x128xf32>
    %c16_i32_134 = arith.constant 16 : i32
    %386 = vector.broadcast %c16_i32_134 : i32 to vector<1x1x128xi32>
    %387 = arith.cmpi sge, %1, %386 : vector<1x1x128xi32>
    %c24_i32_135 = arith.constant 24 : i32
    %388 = vector.broadcast %c24_i32_135 : i32 to vector<1x1x128xi32>
    %389 = arith.cmpi slt, %1, %388 : vector<1x1x128xi32>
    %390 = arith.andi %387, %389 : vector<1x1x128xi1>
    %cst_136 = arith.constant 0.000000e+00 : f32
    %391 = vector.shape_cast %390 : vector<1x1x128xi1> to vector<1x1x128xi1>
    %392 = vector.broadcast %391 : vector<1x1x128xi1> to vector<2x8x128xi1>
    %393 = vector.broadcast %cst_136 : f32 to vector<2x8x128xf32>
    %394 = arith.select %392, %325, %393 : vector<2x8x128xi1>, vector<2x8x128xf32>
    %395 = arith.truncf %394 : vector<2x8x128xf32> to vector<2x8x128xbf16>
    %cst_137 = arith.constant 0.000000e+00 : f32
    %396 = vector.shape_cast %390 : vector<1x1x128xi1> to vector<1x1x128xi1>
    %397 = vector.broadcast %396 : vector<1x1x128xi1> to vector<2x8x128xi1>
    %398 = vector.broadcast %cst_137 : f32 to vector<2x8x128xf32>
    %399 = arith.select %397, %326, %398 : vector<2x8x128xi1>, vector<2x8x128xf32>
    %400 = arith.truncf %399 : vector<2x8x128xf32> to vector<2x8x128xbf16>
    "tpu.trace_start"() <{level = 10 : i32, message = "bqd,bkd->bqk"}> : () -> ()
    %cst_138 = arith.constant dense<0.000000e+00> : vector<2x8x8xf32>
    %401 = tpu.matmul %324, %395, %cst_138 {dimension_numbers = #tpu.dot_dimension_numbers<[2], [2], [1], [1], [0, 0, 0, 1, 1, 1], [0], [0]>} : vector<2x8x128xbf16>, vector<2x8x128xbf16>, vector<2x8x8xf32> -> vector<2x8x8xf32>
    "tpu.trace_stop"() : () -> ()
    %cst_139 = arith.constant dense<0xFF800000> : vector<2x8xf32>
    %402 = vector.multi_reduction <maximumf>, %401, %cst_139 [2] : vector<2x8x8xf32> to vector<2x8xf32>
    %403 = vector.shape_cast %402 : vector<2x8xf32> to vector<2x8x1xf32>
    %404 = vector.broadcast %403 : vector<2x8x1xf32> to vector<2x8x8xf32>
    %405 = arith.subf %401, %404 : vector<2x8x8xf32>
    %406 = math.exp %405 : vector<2x8x8xf32>
    %cst_140 = arith.constant dense<0.000000e+00> : vector<2x8xf32>
    %407 = vector.multi_reduction <add>, %406, %cst_140 [2] : vector<2x8x8xf32> to vector<2x8xf32>
    %408 = vector.shape_cast %407 : vector<2x8xf32> to vector<2x8x1xf32>
    %409 = tpu.reciprocal %408 {approx = true} : vector<2x8x1xf32> -> vector<2x8x1xf32>
    %410 = vector.broadcast %409 : vector<2x8x1xf32> to vector<2x8x8xf32>
    %411 = arith.mulf %406, %410 : vector<2x8x8xf32>
    %412 = arith.truncf %411 : vector<2x8x8xf32> to vector<2x8x8xbf16>
    "tpu.trace_start"() <{level = 10 : i32, message = "bqk,bkd->bqd"}> : () -> ()
    %cst_141 = arith.constant dense<0.000000e+00> : vector<2x8x128xf32>
    %413 = tpu.matmul %412, %400, %cst_141 {dimension_numbers = #tpu.dot_dimension_numbers<[2], [1], [1], [2], [0, 0, 0, 1, 1, 2], [0], [0]>} : vector<2x8x8xbf16>, vector<2x8x128xbf16>, vector<2x8x128xf32> -> vector<2x8x128xf32>
    "tpu.trace_stop"() : () -> ()
    %414 = arith.addf %385, %413 : vector<2x8x128xf32>
    %c24_i32_142 = arith.constant 24 : i32
    %415 = vector.broadcast %c24_i32_142 : i32 to vector<1x1x128xi32>
    %416 = arith.cmpi sge, %1, %415 : vector<1x1x128xi32>
    %c32_i32_143 = arith.constant 32 : i32
    %417 = vector.broadcast %c32_i32_143 : i32 to vector<1x1x128xi32>
    %418 = arith.cmpi slt, %1, %417 : vector<1x1x128xi32>
    %419 = arith.andi %416, %418 : vector<1x1x128xi1>
    %cst_144 = arith.constant 0.000000e+00 : f32
    %420 = vector.shape_cast %419 : vector<1x1x128xi1> to vector<1x1x128xi1>
    %421 = vector.broadcast %420 : vector<1x1x128xi1> to vector<2x8x128xi1>
    %422 = vector.broadcast %cst_144 : f32 to vector<2x8x128xf32>
    %423 = arith.select %421, %325, %422 : vector<2x8x128xi1>, vector<2x8x128xf32>
    %424 = arith.truncf %423 : vector<2x8x128xf32> to vector<2x8x128xbf16>
    %cst_145 = arith.constant 0.000000e+00 : f32
    %425 = vector.shape_cast %419 : vector<1x1x128xi1> to vector<1x1x128xi1>
    %426 = vector.broadcast %425 : vector<1x1x128xi1> to vector<2x8x128xi1>
    %427 = vector.broadcast %cst_145 : f32 to vector<2x8x128xf32>
    %428 = arith.select %426, %326, %427 : vector<2x8x128xi1>, vector<2x8x128xf32>
    %429 = arith.truncf %428 : vector<2x8x128xf32> to vector<2x8x128xbf16>
    "tpu.trace_start"() <{level = 10 : i32, message = "bqd,bkd->bqk"}> : () -> ()
    %cst_146 = arith.constant dense<0.000000e+00> : vector<2x8x8xf32>
    %430 = tpu.matmul %324, %424, %cst_146 {dimension_numbers = #tpu.dot_dimension_numbers<[2], [2], [1], [1], [0, 0, 0, 1, 1, 1], [0], [0]>} : vector<2x8x128xbf16>, vector<2x8x128xbf16>, vector<2x8x8xf32> -> vector<2x8x8xf32>
    "tpu.trace_stop"() : () -> ()
    %cst_147 = arith.constant dense<0xFF800000> : vector<2x8xf32>
    %431 = vector.multi_reduction <maximumf>, %430, %cst_147 [2] : vector<2x8x8xf32> to vector<2x8xf32>
    %432 = vector.shape_cast %431 : vector<2x8xf32> to vector<2x8x1xf32>
    %433 = vector.broadcast %432 : vector<2x8x1xf32> to vector<2x8x8xf32>
    %434 = arith.subf %430, %433 : vector<2x8x8xf32>
    %435 = math.exp %434 : vector<2x8x8xf32>
    %cst_148 = arith.constant dense<0.000000e+00> : vector<2x8xf32>
    %436 = vector.multi_reduction <add>, %435, %cst_148 [2] : vector<2x8x8xf32> to vector<2x8xf32>
    %437 = vector.shape_cast %436 : vector<2x8xf32> to vector<2x8x1xf32>
    %438 = tpu.reciprocal %437 {approx = true} : vector<2x8x1xf32> -> vector<2x8x1xf32>
    %439 = vector.broadcast %438 : vector<2x8x1xf32> to vector<2x8x8xf32>
    %440 = arith.mulf %435, %439 : vector<2x8x8xf32>
    %441 = arith.truncf %440 : vector<2x8x8xf32> to vector<2x8x8xbf16>
    "tpu.trace_start"() <{level = 10 : i32, message = "bqk,bkd->bqd"}> : () -> ()
    %cst_149 = arith.constant dense<0.000000e+00> : vector<2x8x128xf32>
    %442 = tpu.matmul %441, %429, %cst_149 {dimension_numbers = #tpu.dot_dimension_numbers<[2], [1], [1], [2], [0, 0, 0, 1, 1, 2], [0], [0]>} : vector<2x8x8xbf16>, vector<2x8x128xbf16>, vector<2x8x128xf32> -> vector<2x8x128xf32>
    "tpu.trace_stop"() : () -> ()
    %443 = arith.addf %414, %442 : vector<2x8x128xf32>
    %c32_i32_150 = arith.constant 32 : i32
    %444 = vector.broadcast %c32_i32_150 : i32 to vector<1x1x128xi32>
    %445 = arith.cmpi sge, %1, %444 : vector<1x1x128xi32>
    %c40_i32_151 = arith.constant 40 : i32
    %446 = vector.broadcast %c40_i32_151 : i32 to vector<1x1x128xi32>
    %447 = arith.cmpi slt, %1, %446 : vector<1x1x128xi32>
    %448 = arith.andi %445, %447 : vector<1x1x128xi1>
    %cst_152 = arith.constant 0.000000e+00 : f32
    %449 = vector.shape_cast %448 : vector<1x1x128xi1> to vector<1x1x128xi1>
    %450 = vector.broadcast %449 : vector<1x1x128xi1> to vector<2x8x128xi1>
    %451 = vector.broadcast %cst_152 : f32 to vector<2x8x128xf32>
    %452 = arith.select %450, %325, %451 : vector<2x8x128xi1>, vector<2x8x128xf32>
    %453 = arith.truncf %452 : vector<2x8x128xf32> to vector<2x8x128xbf16>
    %cst_153 = arith.constant 0.000000e+00 : f32
    %454 = vector.shape_cast %448 : vector<1x1x128xi1> to vector<1x1x128xi1>
    %455 = vector.broadcast %454 : vector<1x1x128xi1> to vector<2x8x128xi1>
    %456 = vector.broadcast %cst_153 : f32 to vector<2x8x128xf32>
    %457 = arith.select %455, %326, %456 : vector<2x8x128xi1>, vector<2x8x128xf32>
    %458 = arith.truncf %457 : vector<2x8x128xf32> to vector<2x8x128xbf16>
    "tpu.trace_start"() <{level = 10 : i32, message = "bqd,bkd->bqk"}> : () -> ()
    %cst_154 = arith.constant dense<0.000000e+00> : vector<2x8x8xf32>
    %459 = tpu.matmul %324, %453, %cst_154 {dimension_numbers = #tpu.dot_dimension_numbers<[2], [2], [1], [1], [0, 0, 0, 1, 1, 1], [0], [0]>} : vector<2x8x128xbf16>, vector<2x8x128xbf16>, vector<2x8x8xf32> -> vector<2x8x8xf32>
    "tpu.trace_stop"() : () -> ()
    %cst_155 = arith.constant dense<0xFF800000> : vector<2x8xf32>
    %460 = vector.multi_reduction <maximumf>, %459, %cst_155 [2] : vector<2x8x8xf32> to vector<2x8xf32>
    %461 = vector.shape_cast %460 : vector<2x8xf32> to vector<2x8x1xf32>
    %462 = vector.broadcast %461 : vector<2x8x1xf32> to vector<2x8x8xf32>
    %463 = arith.subf %459, %462 : vector<2x8x8xf32>
    %464 = math.exp %463 : vector<2x8x8xf32>
    %cst_156 = arith.constant dense<0.000000e+00> : vector<2x8xf32>
    %465 = vector.multi_reduction <add>, %464, %cst_156 [2] : vector<2x8x8xf32> to vector<2x8xf32>
    %466 = vector.shape_cast %465 : vector<2x8xf32> to vector<2x8x1xf32>
    %467 = tpu.reciprocal %466 {approx = true} : vector<2x8x1xf32> -> vector<2x8x1xf32>
    %468 = vector.broadcast %467 : vector<2x8x1xf32> to vector<2x8x8xf32>
    %469 = arith.mulf %464, %468 : vector<2x8x8xf32>
    %470 = arith.truncf %469 : vector<2x8x8xf32> to vector<2x8x8xbf16>
    "tpu.trace_start"() <{level = 10 : i32, message = "bqk,bkd->bqd"}> : () -> ()
    %cst_157 = arith.constant dense<0.000000e+00> : vector<2x8x128xf32>
    %471 = tpu.matmul %470, %458, %cst_157 {dimension_numbers = #tpu.dot_dimension_numbers<[2], [1], [1], [2], [0, 0, 0, 1, 1, 2], [0], [0]>} : vector<2x8x8xbf16>, vector<2x8x128xbf16>, vector<2x8x128xf32> -> vector<2x8x128xf32>
    "tpu.trace_stop"() : () -> ()
    %472 = arith.addf %443, %471 : vector<2x8x128xf32>
    %c40_i32_158 = arith.constant 40 : i32
    %473 = vector.broadcast %c40_i32_158 : i32 to vector<1x1x128xi32>
    %474 = arith.cmpi sge, %1, %473 : vector<1x1x128xi32>
    %c48_i32_159 = arith.constant 48 : i32
    %475 = vector.broadcast %c48_i32_159 : i32 to vector<1x1x128xi32>
    %476 = arith.cmpi slt, %1, %475 : vector<1x1x128xi32>
    %477 = arith.andi %474, %476 : vector<1x1x128xi1>
    %cst_160 = arith.constant 0.000000e+00 : f32
    %478 = vector.shape_cast %477 : vector<1x1x128xi1> to vector<1x1x128xi1>
    %479 = vector.broadcast %478 : vector<1x1x128xi1> to vector<2x8x128xi1>
    %480 = vector.broadcast %cst_160 : f32 to vector<2x8x128xf32>
    %481 = arith.select %479, %325, %480 : vector<2x8x128xi1>, vector<2x8x128xf32>
    %482 = arith.truncf %481 : vector<2x8x128xf32> to vector<2x8x128xbf16>
    %cst_161 = arith.constant 0.000000e+00 : f32
    %483 = vector.shape_cast %477 : vector<1x1x128xi1> to vector<1x1x128xi1>
    %484 = vector.broadcast %483 : vector<1x1x128xi1> to vector<2x8x128xi1>
    %485 = vector.broadcast %cst_161 : f32 to vector<2x8x128xf32>
    %486 = arith.select %484, %326, %485 : vector<2x8x128xi1>, vector<2x8x128xf32>
    %487 = arith.truncf %486 : vector<2x8x128xf32> to vector<2x8x128xbf16>
    "tpu.trace_start"() <{level = 10 : i32, message = "bqd,bkd->bqk"}> : () -> ()
    %cst_162 = arith.constant dense<0.000000e+00> : vector<2x8x8xf32>
    %488 = tpu.matmul %324, %482, %cst_162 {dimension_numbers = #tpu.dot_dimension_numbers<[2], [2], [1], [1], [0, 0, 0, 1, 1, 1], [0], [0]>} : vector<2x8x128xbf16>, vector<2x8x128xbf16>, vector<2x8x8xf32> -> vector<2x8x8xf32>
    "tpu.trace_stop"() : () -> ()
    %cst_163 = arith.constant dense<0xFF800000> : vector<2x8xf32>
    %489 = vector.multi_reduction <maximumf>, %488, %cst_163 [2] : vector<2x8x8xf32> to vector<2x8xf32>
    %490 = vector.shape_cast %489 : vector<2x8xf32> to vector<2x8x1xf32>
    %491 = vector.broadcast %490 : vector<2x8x1xf32> to vector<2x8x8xf32>
    %492 = arith.subf %488, %491 : vector<2x8x8xf32>
    %493 = math.exp %492 : vector<2x8x8xf32>
    %cst_164 = arith.constant dense<0.000000e+00> : vector<2x8xf32>
    %494 = vector.multi_reduction <add>, %493, %cst_164 [2] : vector<2x8x8xf32> to vector<2x8xf32>
    %495 = vector.shape_cast %494 : vector<2x8xf32> to vector<2x8x1xf32>
    %496 = tpu.reciprocal %495 {approx = true} : vector<2x8x1xf32> -> vector<2x8x1xf32>
    %497 = vector.broadcast %496 : vector<2x8x1xf32> to vector<2x8x8xf32>
    %498 = arith.mulf %493, %497 : vector<2x8x8xf32>
    %499 = arith.truncf %498 : vector<2x8x8xf32> to vector<2x8x8xbf16>
    "tpu.trace_start"() <{level = 10 : i32, message = "bqk,bkd->bqd"}> : () -> ()
    %cst_165 = arith.constant dense<0.000000e+00> : vector<2x8x128xf32>
    %500 = tpu.matmul %499, %487, %cst_165 {dimension_numbers = #tpu.dot_dimension_numbers<[2], [1], [1], [2], [0, 0, 0, 1, 1, 2], [0], [0]>} : vector<2x8x8xbf16>, vector<2x8x128xbf16>, vector<2x8x128xf32> -> vector<2x8x128xf32>
    "tpu.trace_stop"() : () -> ()
    %501 = arith.addf %472, %500 : vector<2x8x128xf32>
    %502 = vector.shape_cast %501 : vector<2x8x128xf32> to vector<16x128xf32>
    %503 = arith.truncf %502 : vector<16x128xf32> to vector<16x128xbf16>
    %cst_166 = arith.constant dense<0.000000e+00> : vector<16x128xf32>
    %504 = tpu.matmul %503, %308, %cst_166 {dimension_numbers = #tpu.dot_dimension_numbers<[1], [0], [0], [1], [0, 0, 1, 1], [], []>} : vector<16x128xbf16>, vector<128x128xbf16>, vector<16x128xf32> -> vector<16x128xf32>
    %505 = vector.broadcast %294 : vector<1x128xf32> to vector<16x128xf32>
    %506 = arith.addf %504, %505 : vector<16x128xf32>
    %507 = arith.addf %288, %506 : vector<16x128xf32>
    %cst_167 = arith.constant dense<0.000000e+00> : vector<16xf32>
    %508 = vector.multi_reduction <add>, %507, %cst_167 [1] : vector<16x128xf32> to vector<16xf32>
    %509 = vector.shape_cast %508 : vector<16xf32> to vector<16x1xf32>
    %cst_168 = arith.constant 0.020833334 : f32
    %510 = vector.broadcast %cst_168 : f32 to vector<16x1xf32>
    %511 = arith.mulf %509, %510 : vector<16x1xf32>
    %512 = vector.broadcast %511 : vector<16x1xf32> to vector<16x128xf32>
    %513 = arith.subf %507, %512 : vector<16x128xf32>
    %cst_169 = arith.constant 0.000000e+00 : f32
    %514 = vector.shape_cast %3 : vector<1x128xi1> to vector<1x128xi1>
    %515 = vector.broadcast %514 : vector<1x128xi1> to vector<16x128xi1>
    %516 = vector.broadcast %cst_169 : f32 to vector<16x128xf32>
    %517 = arith.select %515, %513, %516 : vector<16x128xi1>, vector<16x128xf32>
    %518 = arith.mulf %517, %517 : vector<16x128xf32>
    %cst_170 = arith.constant dense<0.000000e+00> : vector<16xf32>
    %519 = vector.multi_reduction <add>, %518, %cst_170 [1] : vector<16x128xf32> to vector<16xf32>
    %520 = vector.shape_cast %519 : vector<16xf32> to vector<16x1xf32>
    %cst_171 = arith.constant 0.020833334 : f32
    %521 = vector.broadcast %cst_171 : f32 to vector<16x1xf32>
    %522 = arith.mulf %520, %521 : vector<16x1xf32>
    %cst_172 = arith.constant 9.99999974E-6 : f32
    %523 = vector.broadcast %cst_172 : f32 to vector<16x1xf32>
    %524 = arith.addf %522, %523 : vector<16x1xf32>
    %525 = math.rsqrt %524 : vector<16x1xf32>
    %526 = vector.broadcast %525 : vector<16x1xf32> to vector<16x128xf32>
    %527 = arith.mulf %517, %526 : vector<16x128xf32>
    %528 = vector.broadcast %295 : vector<1x128xf32> to vector<16x128xf32>
    %529 = arith.mulf %527, %528 : vector<16x128xf32>
    %530 = vector.broadcast %296 : vector<1x128xf32> to vector<16x128xf32>
    %531 = arith.addf %529, %530 : vector<16x128xf32>
    %532 = arith.truncf %531 : vector<16x128xf32> to vector<16x128xbf16>
    %cst_173 = arith.constant dense<0.000000e+00> : vector<16x128xf32>
    %533 = tpu.matmul %532, %310, %cst_173 {dimension_numbers = #tpu.dot_dimension_numbers<[1], [0], [0], [1], [0, 0, 1, 1], [], []>} : vector<16x128xbf16>, vector<128x128xbf16>, vector<16x128xf32> -> vector<16x128xf32>
    %534 = vector.broadcast %297 : vector<1x128xf32> to vector<16x128xf32>
    %535 = arith.addf %533, %534 : vector<16x128xf32>
    %cst_174 = arith.constant 0.000000e+00 : f32
    %536 = vector.broadcast %cst_174 : f32 to vector<16x128xf32>
    %537 = arith.maximumf %535, %536 : vector<16x128xf32>
    %538 = arith.truncf %537 : vector<16x128xf32> to vector<16x128xbf16>
    %cst_175 = arith.constant dense<0.000000e+00> : vector<16x128xf32>
    %539 = tpu.matmul %538, %312, %cst_175 {dimension_numbers = #tpu.dot_dimension_numbers<[1], [0], [0], [1], [0, 0, 1, 1], [], []>} : vector<16x128xbf16>, vector<128x128xbf16>, vector<16x128xf32> -> vector<16x128xf32>
    %540 = vector.broadcast %298 : vector<1x128xf32> to vector<16x128xf32>
    %541 = arith.addf %539, %540 : vector<16x128xf32>
    %542 = arith.addf %531, %541 : vector<16x128xf32>
    %cst_176 = arith.constant dense<0.000000e+00> : vector<16xf32>
    %543 = vector.multi_reduction <add>, %542, %cst_176 [1] : vector<16x128xf32> to vector<16xf32>
    %544 = vector.shape_cast %543 : vector<16xf32> to vector<16x1xf32>
    %cst_177 = arith.constant 0.020833334 : f32
    %545 = vector.broadcast %cst_177 : f32 to vector<16x1xf32>
    %546 = arith.mulf %544, %545 : vector<16x1xf32>
    %547 = vector.broadcast %546 : vector<16x1xf32> to vector<16x128xf32>
    %548 = arith.subf %542, %547 : vector<16x128xf32>
    %cst_178 = arith.constant 0.000000e+00 : f32
    %549 = vector.shape_cast %3 : vector<1x128xi1> to vector<1x128xi1>
    %550 = vector.broadcast %549 : vector<1x128xi1> to vector<16x128xi1>
    %551 = vector.broadcast %cst_178 : f32 to vector<16x128xf32>
    %552 = arith.select %550, %548, %551 : vector<16x128xi1>, vector<16x128xf32>
    %553 = arith.mulf %552, %552 : vector<16x128xf32>
    %cst_179 = arith.constant dense<0.000000e+00> : vector<16xf32>
    %554 = vector.multi_reduction <add>, %553, %cst_179 [1] : vector<16x128xf32> to vector<16xf32>
    %555 = vector.shape_cast %554 : vector<16xf32> to vector<16x1xf32>
    %cst_180 = arith.constant 0.020833334 : f32
    %556 = vector.broadcast %cst_180 : f32 to vector<16x1xf32>
    %557 = arith.mulf %555, %556 : vector<16x1xf32>
    %cst_181 = arith.constant 9.99999974E-6 : f32
    %558 = vector.broadcast %cst_181 : f32 to vector<16x1xf32>
    %559 = arith.addf %557, %558 : vector<16x1xf32>
    %560 = math.rsqrt %559 : vector<16x1xf32>
    %561 = vector.broadcast %560 : vector<16x1xf32> to vector<16x128xf32>
    %562 = arith.mulf %552, %561 : vector<16x128xf32>
    %563 = vector.broadcast %299 : vector<1x128xf32> to vector<16x128xf32>
    %564 = arith.mulf %562, %563 : vector<16x128xf32>
    %565 = vector.broadcast %300 : vector<1x128xf32> to vector<16x128xf32>
    %566 = arith.addf %564, %565 : vector<16x128xf32>
    %567 = vector.shape_cast %566 : vector<16x128xf32> to vector<2x8x128xf32>
    %cst_182 = arith.constant dense<0xFF800000> : vector<2x128xf32>
    %568 = vector.multi_reduction <maximumf>, %567, %cst_182 [1] : vector<2x8x128xf32> to vector<2x128xf32>
    %569 = arith.truncf %568 : vector<2x128xf32> to vector<2x128xbf16>
    %c0_183 = arith.constant 0 : index
    %c0_184 = arith.constant 0 : index
    %570 = vector.load %arg5[%c0_183, %c0_184] : memref<128x128xbf16, #tpu.memory_space<vmem>>, vector<128x128xbf16>
    %cst_185 = arith.constant dense<0.000000e+00> : vector<2x128xf32>
    %571 = tpu.matmul %569, %570, %cst_185 {dimension_numbers = #tpu.dot_dimension_numbers<[1], [0], [0], [1], [0, 0, 1, 1], [], []>} : vector<2x128xbf16>, vector<128x128xbf16>, vector<2x128xf32> -> vector<2x128xf32>
    %c0_186 = arith.constant 0 : index
    %c0_187 = arith.constant 0 : index
    %572 = vector.load %arg6[%c0_186, %c0_187] : memref<1x128xf32, #tpu.memory_space<vmem>>, vector<1x128xf32>
    %573 = vector.broadcast %572 : vector<1x128xf32> to vector<2x128xf32>
    %574 = arith.addf %571, %573 : vector<2x128xf32>
    %575 = vector.shape_cast %574 : vector<2x128xf32> to vector<2x1x128xf32>
    %c0_188 = arith.constant 0 : index
    %c0_189 = arith.constant 0 : index
    %c0_190 = arith.constant 0 : index
    %576 = vector.load %arg7[%c0_188, %c0_189, %c0_190] : memref<2x1x128xf32, #tpu.memory_space<vmem>>, vector<2x1x128xf32>
    tpu.vector_store %arg7[%c0_188, %c0_189, %c0_190], %575 {strides = array<i32>} : memref<2x1x128xf32, #tpu.memory_space<vmem>>, vector<2x1x128xf32>,
    return
  }
  func.func @transform_0(%arg0: i32) -> (i32, i32, i32) {
    %c0_i32 = arith.constant 0 : i32
    %c0_i32_0 = arith.constant 0 : i32
    %c0_i32_1 = arith.constant 0 : i32
    return %arg0, %c0_i32, %c0_i32_0 : i32, i32, i32
  }
  func.func @transform_1(%arg0: i32) -> (i32, i32) {
    %c0_i32 = arith.constant 0 : i32
    %c0_i32_0 = arith.constant 0 : i32
    %c0_i32_1 = arith.constant 0 : i32
    return %c0_i32, %c0_i32_0 : i32, i32
  }
  func.func @transform_2(%arg0: i32) -> (i32, i32, i32, i32) {
    %c0_i32 = arith.constant 0 : i32
    %c0_i32_0 = arith.constant 0 : i32
    %c0_i32_1 = arith.constant 0 : i32
    %c0_i32_2 = arith.constant 0 : i32
    %c0_i32_3 = arith.constant 0 : i32
    return %c0_i32, %c0_i32_0, %c0_i32_1, %c0_i32_2 : i32, i32, i32, i32
  }
  func.func @transform_3(%arg0: i32) -> (i32, i32, i32) {
    %c0_i32 = arith.constant 0 : i32
    %c0_i32_0 = arith.constant 0 : i32
    %c0_i32_1 = arith.constant 0 : i32
    %c0_i32_2 = arith.constant 0 : i32
    return %c0_i32, %c0_i32_0, %c0_i32_1 : i32, i32, i32
  }
  func.func @transform_4(%arg0: i32) -> (i32, i32) {
    %c0_i32 = arith.constant 0 : i32
    %c0_i32_0 = arith.constant 0 : i32
    %c0_i32_1 = arith.constant 0 : i32
    return %c0_i32, %c0_i32_0 : i32, i32
  }
  func.func @transform_5(%arg0: i32) -> (i32, i32) {
    %c0_i32 = arith.constant 0 : i32
    %c0_i32_0 = arith.constant 0 : i32
    %c0_i32_1 = arith.constant 0 : i32
    return %c0_i32, %c0_i32_0 : i32, i32
  }
  func.func @transform_6(%arg0: i32) -> (i32, i32, i32) {
    %c0_i32 = arith.constant 0 : i32
    %c0_i32_0 = arith.constant 0 : i32
    %c0_i32_1 = arith.constant 0 : i32
    return %arg0, %c0_i32, %c0_i32_0 : i32, i32, i32
  }
}

</mosaic_0001>

<bundles_post_ra>
// kernel: tpu_custom_call.1
= control target key start
LH: loop header
LB: loop body
LE: loop exit
PB: predicated region body
PF: predicated region fallthrough
CT: control target
= control target key end

     0   :  { %11 = vsyncpa [#allocation3], 0  ;;  %s6499_s0 = inlined_call_operand.hbm [shape: bf16[2,8,128], index: 0, kind: input, shape index: {}]   ;;  %s6500_s1 = inlined_call_operand.hbm [shape: f32[8,128], index: 1, kind: input, shape index: {}]   ;;  %s6501_s2 = inlined_call_operand.hbm [shape: bf16[2,6,128,128], index: 2, kind: input, shape index: {}]   ;;  %s6502_s3 = inlined_call_operand.vmem [shape: f32[2,10,128], index: 3, kind: input, shape index: {}]   ;;  %s6503_s4 = inlined_call_operand.vmem [shape: bf16[128,128], index: 4, kind: input, shape index: {}]   ;;  %s6504_s5 = inlined_call_operand.vmem [shape: f32[1,128], index: 5, kind: input, shape index: {}]   ;;  %s6505_s6 = inlined_call_operand.hbm [shape: f32[2,1,128], index: 6, kind: output, shape index: {}]  }
   0x1   :  { %12 = vsyncpa [#allocation6], 0 }
   0x2   :  { %13 = vsyncpa [#allocation4], 0  ;;  %s5613_s21 = smov [#allocation5]   ;;  %s5614_s23 = smov [#allocation2]  }
   0x3   :  { %s32_s22 = sshll.u32 %s5613_s21, 4  ;;  %s19_s24 = sshll.u32 %s5614_s23, 4  ;;  %s33_s22 = int_to_ptr.vmem [resolvable:$true] %s32_s22  ;;  %s5659_s24 = int_to_ptr.vmem [resolvable:$true] %s19_s24 }
   0x4   :  { %s5519_s27 = scalar_lea.hbm %s6500_s1, 128 }
   0x5   :  { %p5520_p0 = scmp.ne.s32.totalorder %s6500_s1, %s5519_s27  ;;  %p5523_p1 = scmp.lt.u32.totalorder %s5519_s27, %s6500_s1 }
   0x7   :  { %p5525_p2 = pnand %p5523_p1, %p5520_p0 }
   0x9   :  { %5528 = shalt.err (!%p5525_p2)
}
   0xa   :  { %s5529_s8 = scalar_lea.vmem %s33_s22, 128  ;;  %p5534_p4 = scmp.lt.s32.totalorder %s33_s22, %s33_s22 }
   0xb   :  { %p5530_p3 = scmp.ne.s32.totalorder %s33_s22, %s5529_s8  ;;  %p5535_p5 = scmp.lt.s32.totalorder %s5529_s8, %s5529_s8 }
   0xd   :  { %p5536_p6 = por %p5535_p5, %p5534_p4 }
   0xf   :  { %p5537_p7 = pnand %p5536_p6, %p5530_p3 }
  0x11   :  { %5540 = shalt.err (!%p5537_p7)
}
  0x12   :  { %35 = dma.hbm_to_vmem [thread:$0]  %s6500_s1, 128, %s33_s22, [#allocation6]  }
  0x13   :  { %s5541_s13 = scalar_lea.hbm %s6499_s0, 128 }
  0x14   :  { %p5542_p8 = scmp.ne.s32.totalorder %s6499_s0, %s5541_s13  ;;  %p5545_p9 = scmp.lt.u32.totalorder %s5541_s13, %s6499_s0 }
  0x16   :  { %p5547_p10 = pnand %p5545_p9, %p5542_p8 }
  0x18   :  { %5550 = shalt.err (!%p5547_p10)
}
  0x19   :  { %s5551_s18 = scalar_lea.vmem %s5659_s24, 128  ;;  %p5556_p12 = scmp.lt.s32.totalorder %s5659_s24, %s5659_s24 }
  0x1a   :  { %p5552_p11 = scmp.ne.s32.totalorder %s5659_s24, %s5551_s18  ;;  %p5557_p13 = scmp.lt.s32.totalorder %s5551_s18, %s5551_s18 }
  0x1c   :  { %p5558_p0 = por %p5557_p13, %p5556_p12 }
  0x1e   :  { %p5559_p1 = pnand %p5558_p0, %p5552_p11 }
  0x20   :  { %5562 = shalt.err (!%p5559_p1)
}
  0x21   :  { %s5615_s1 = smov 64   ;;  %s5616_s19 = smov 4  }
  0x22   :  { %25 = dma.hbm_to_vmem [thread:$0]  %s6499_s0, 128, %s5659_s24, [#allocation3], %s5615_s1, %s5615_s1, %s5616_s19  }
  0x23   :  { %s5617_s22 = smov [#allocation7]   ;;  %s5563_s27 = scalar_lea.hbm %s6501_s2, 12288 }
  0x24   :  { %s41_s23 = sshll.u32 %s5617_s22, 4  ;;  %p5564_p2 = scmp.ne.s32.totalorder %s6501_s2, %s5563_s27  ;;  %s42_s23 = int_to_ptr.vmem [resolvable:$true] %s41_s23 }
  0x25   :  { %p5567_p3 = scmp.lt.u32.totalorder %s5563_s27, %s6501_s2 }
  0x27   :  { %p5569_p4 = pnand %p5567_p3, %p5564_p2 }
  0x29   :  { %5572 = shalt.err (!%p5569_p4)
}
  0x2a   :  { %s5573_s8 = scalar_lea.vmem %s42_s23, 12288  ;;  %p5578_p6 = scmp.lt.s32.totalorder %s42_s23, %s42_s23 }
  0x2b   :  { %p5574_p5 = scmp.ne.s32.totalorder %s42_s23, %s5573_s8  ;;  %p5579_p7 = scmp.lt.s32.totalorder %s5573_s8, %s5573_s8 }
  0x2d   :  { %p5580_p8 = por %p5579_p7, %p5578_p6 }
  0x2f   :  { %p5581_p9 = pnand %p5580_p8, %p5574_p5 }
  0x31   :  { %5584 = shalt.err (!%p5581_p9)
}
  0x32   :  { %47 = dma.hbm_to_vmem [thread:$0]  %s6501_s2, 12288, %s42_s23, [#allocation6], %s5615_s1, %s5615_s1, %s5616_s19  }
  0x33   :  { %5607 = dma.done.wait [#allocation3], 128  }
  0x34   :  { %5608 = vsyncadd [#allocation3], 4294967168 }
  0x35   :  { %5609 = dma.done.wait [#allocation6], 12416  }
  0x36   :  { %5610 = vsyncadd [#allocation6], 4294954880  ;;  %v5618_v0 = vmov 0.0   ;;  %vm5619_vm0 = vmmov 0   ;;  %v5302_v1 = vld [vmem:[#allocation7 + $0x40] sm:$0xff]   ;;  %v5304_v3 = vld [vmem:[#allocation7 + $0x48] sm:$0xff]   ;;  %v64_v24 = vlaneseq }
  0x37   :  { %4683 = vmatprep.subr.bf16.mxu1 %v5618_v0  ;;  %4663 = vmatprep.subr.bf16.mxu0 %v5618_v0  ;;  %v5303_v2 = vld [vmem:[#allocation7] sm:$0xff]   ;;  %v5305_v4 = vld [vmem:[#allocation7 + $0x8] sm:$0xff]   ;;  %v5306_v5 = vld [vmem:[#allocation7 + $0x50] sm:$0xff]   ;;  %vm552_vm7 = vcmask 64512   ;;  %vm697_vm8 = vcmask 1043456   ;;  %s5621_s24 = smov [#allocation8]  }
  0x38   :  { %4699 = vmatprep.mubr.msk.bf16.mxu1 %vm5619_vm0, %v5618_v0  ;;  %4679 = vmatprep.mubr.msk.bf16.mxu0 %vm5619_vm0, %v5618_v0  ;;  %v5307_v6 = vld [vmem:[#allocation7 + $0x10] sm:$0xff]   ;;  %v5308_v7 = vld [vmem:[#allocation7 + $0x58] sm:$0xff]   ;;  %v5310_v9 = vld [vmem:[#allocation7 + $0x60] sm:$0xff]   ;;  %v5738_v25 = vshrl.u32 %v64_v24, 7  ;;  %v5748_v28 = vand.u32 127, %v64_v24  ;;  %s4228_s2 = sshll.u32 %s5621_s24, 4  ;;  %s4229_s2 = int_to_ptr.vmem [resolvable:$true] %s4228_s2 }
  0x39   :  { %4684 = vmatpush3.bf16.msra.mxu1 %v5302_v1  ;;  %4664 = vmatpush3.bf16.msra.mxu0 %v5303_v2  ;;  %v5309_v8 = vld [vmem:[#allocation7 + $0x18] sm:$0xff]   ;;  %v5311_v10 = vld [vmem:[#allocation7 + $0x20] sm:$0xff]   ;;  %v5312_v11 = vld [vmem:[#allocation7 + $0x68] sm:$0xff]   ;;  %s5585_s9 = scalar_lea.vmem %s4229_s2, 32  ;;  %p5590_p11 = scmp.lt.s32.totalorder %s4229_s2, %s4229_s2 }
  0x3a   :  { %4685 = vmatprep.subr.bf16.mxu1 %v5618_v0  ;;  %4665 = vmatprep.subr.bf16.mxu0 %v5618_v0  ;;  %v4447_v12 = vld [vmem:[#allocation2] sm:$0xff]   ;;  %v5313_v13 = vld [vmem:[#allocation7 + $0x28] sm:$0xff]   ;;  %v71_v15 = vld [vmem:[#allocation5] sm:$0xff]  ;;  %v5741_v26 = vsub.s32 1, %v5738_v25  ;;  %v5751_v29 = vsub.s32 0, %v5738_v25  ;;  %vm6506_vm1 = vcmp.lt.s32.totalorder %v5748_v28, 8  ;;  %p5586_p10 = scmp.ne.s32.totalorder %s4229_s2, %s5585_s9  ;;  %p5591_p12 = scmp.lt.s32.totalorder %s5585_s9, %s5585_s9 }
  0x3b   :  { %v5314_v14 = vld [vmem:[#allocation7 + $0x70] sm:$0xff]   ;;  %v4448_v17 = vunpack.c.l.bf16 %v4447_v12  ;;  %v4449_v18 = vunpack.c.h.bf16 %v4447_v12  ;;  %v5316_v19 = vld [vmem:[#allocation7 + $0x78] sm:$0xff]   ;;  %vm5761_vm2 = vmpackc.low %vm6506_vm1, %vm6506_vm1  ;;  %vm577_vm3 = vcmp.ge.s32.totalorder %v5748_v28, 8  ;;  %vm578_vm4 = vcmp.lt.s32.totalorder %v5748_v28, 16 }
  0x3c   :  { %v5315_v16 = vld [vmem:[#allocation7 + $0x30] sm:$0xff]   ;;  %v5317_v22 = vld [vmem:[#allocation7 + $0x38] sm:$0xff]   ;;  %vm5784_vm5 = vmand %vm577_vm3, %vm578_vm4  ;;  %vm879_vm9 = vcmp.ge.s32.totalorder %v5748_v28, 16  ;;  %vm880_vm10 = vcmp.lt.s32.totalorder %v5748_v28, 24  ;;  %vm1090_vm13 = vcmp.ge.s32.totalorder %v5748_v28, 24  ;;  %vm1091_vm14 = vcmp.lt.s32.totalorder %v5748_v28, 32  ;;  %p5592_p13 = por %p5591_p12, %p5590_p11 }
  0x3d   :  { %4686 = vmatpush3.bf16.msra.mxu1 %v5304_v3  ;;  %4666 = vmatpush3.bf16.msra.mxu0 %v5305_v4  ;;  %v5720_v20 = vadd.f32 %v4448_v17, %v71_v15  ;;  %v5722_v21 = vadd.f32 %v4449_v18, %v71_v15  ;;  %v5746_v27 = vld [vmem:[%s6502_s3] sm:$0xff]  ;;  %vm5793_vm6 = vmpackc.low %vm5784_vm5, %vm5784_vm5  ;;  %v5318_v51 = vld [vmem:[#allocation7 + $0x80] sm:$0xff]   ;;  %vm1301_vm4 = vcmp.ge.s32.totalorder %v5748_v28, 32 }
  0x3e   :  { %4687 = vmatprep.subr.bf16.mxu1 %v5618_v0  ;;  %4667 = vmatprep.subr.bf16.mxu0 %v5618_v0  ;;  %v274_v30 = vrot.slane %v5746_v27, %v5741_v26  ;;  %v181_v32 = vrot.slane %v5746_v27, %v5751_v29  ;;  %v5319_v52 = vld [vmem:[#allocation7 + $0x88] sm:$0xff]   ;;  %v5320_v53 = vld [vmem:[#allocation7 + $0x90] sm:$0xff]   ;;  %v5321_v54 = vld [vmem:[#allocation7 + $0x98] sm:$0xff]   ;;  %p5593_p0 = pnand %p5592_p13, %p5586_p10 }
  0x3f   :  { %v5728_v23 = vpack.c.bf16 %v5722_v21, %v5720_v20  ;;  %v5322_v55 = vld [vmem:[#allocation7 + $0xa0] sm:$0xff]   ;;  %v5323_v56 = vld [vmem:[#allocation7 + $0xa8] sm:$0xff]   ;;  %v5324_v57 = vld [vmem:[#allocation7 + $0xb0] sm:$0xff]  }
  0x40   :  { %v5325_v58 = vld [vmem:[#allocation7 + $0xb8] sm:$0xff]   ;;  %vm5869_vm11 = vmand %vm879_vm9, %vm880_vm10  ;;  %vm1302_vm9 = vcmp.lt.s32.totalorder %v5748_v28, 40 }
  0x41   :  { %4688 = vmatpush3.bf16.msra.mxu1 %v5306_v5  ;;  %4668 = vmatpush3.bf16.msra.mxu0 %v5307_v6  ;;  %vm5878_vm12 = vmpackc.low %vm5869_vm11, %vm5869_vm11 }
  0x42   :  { %4689 = vmatprep.subr.bf16.mxu1 %v5618_v0  ;;  %4669 = vmatprep.subr.bf16.mxu0 %v5618_v0  ;;  %vm5920_vm15 = vmand %vm1090_vm13, %vm1091_vm14  ;;  %vm66_vm14 = vcmp.lt.s32.totalorder %v5748_v28, 48 }
  0x43   :  { %vm5927_vm3 = vmpackc.low %vm5920_vm15, %vm5920_vm15 }
  0x44   :  { %vm5967_vm10 = vmand %vm1301_vm4, %vm1302_vm9  ;;  %vm1512_vm4 = vcmp.ge.s32.totalorder %v5748_v28, 40 }
  0x45   :  { %4690 = vmatpush3.bf16.msra.mxu1 %v5308_v7  ;;  %4670 = vmatpush3.bf16.msra.mxu0 %v5309_v8  ;;  %vm5974_vm13 = vmpackc.low %vm5967_vm10, %vm5967_vm10 }
  0x46   :  { %4691 = vmatprep.subr.bf16.mxu1 %v5618_v0  ;;  %4671 = vmatprep.subr.bf16.mxu0 %v5618_v0  ;;  %vm6016_vm9 = vmand %vm1512_vm4, %vm66_vm14 }
  0x49   :  { %4692 = vmatpush3.bf16.msra.mxu1 %v5310_v9  ;;  %4672 = vmatpush3.bf16.msra.mxu0 %v5311_v10 }
  0x4a   :  { %4693 = vmatprep.subr.bf16.mxu1 %v5618_v0  ;;  %4673 = vmatprep.subr.bf16.mxu0 %v5618_v0 }
  0x4d   :  { %4694 = vmatpush3.bf16.msra.mxu1 %v5312_v11  ;;  %4674 = vmatpush3.bf16.msra.mxu0 %v5313_v13 }
  0x4e   :  { %4695 = vmatprep.subr.bf16.mxu1 %v5618_v0  ;;  %4675 = vmatprep.subr.bf16.mxu0 %v5618_v0 }
  0x51   :  { %4696 = vmatpush3.bf16.msra.mxu1 %v5314_v14  ;;  %4676 = vmatpush3.bf16.msra.mxu0 %v5315_v16 }
  0x52   :  { %4697 = vmatprep.subr.bf16.mxu1 %v5618_v0  ;;  %4677 = vmatprep.subr.bf16.mxu0 %v5618_v0 }
  0x55   :  { %4698 = vmatpush3.bf16.msra.mxu1 %v5316_v19  ;;  %4678 = vmatpush3.bf16.msra.mxu0 %v5317_v22 }
  0x56   :  { %4723 = vmatprep.subr.bf16.mxu1 %v5618_v0  ;;  %4703 = vmatprep.subr.bf16.mxu0 %v5618_v0 }
  0x58   :  { %4700 = vmatmul.mubr.bf16.vlgmr.msra.gmra.mrb[0].mxu1 %v5728_v23  ;;  %4680 = vmatmul.mubr.bf16.vlgmr.msra.gmra.mrb[0].mxu0 %v5728_v23 }
  0x59   :  { %4725 = vmatprep.mubr.msk.bf16.mxu1 %vm5619_vm0, %v5618_v0  ;;  %4719 = vmatprep.mubr.msk.bf16.mxu0 %vm5619_vm0, %v5618_v0 }
  0x5a   :  { %4704 = vmatpush3.bf16.msra.mxu0 %v5318_v51 }
  0x5b   :  { %4705 = vmatprep.subr.bf16.mxu0 %v5618_v0 }
  0x5e   :  { %4706 = vmatpush3.bf16.msra.mxu0 %v5319_v52 }
  0x5f   :  { %4707 = vmatprep.subr.bf16.mxu0 %v5618_v0 }
  0x62   :  { %4708 = vmatpush3.bf16.msra.mxu0 %v5320_v53 }
  0x63   :  { %4709 = vmatprep.subr.bf16.mxu0 %v5618_v0 }
  0x66   :  { %4710 = vmatpush3.bf16.msra.mxu0 %v5321_v54 }
  0x67   :  { %4711 = vmatprep.subr.bf16.mxu0 %v5618_v0 }
  0x6a   :  { %4712 = vmatpush3.bf16.msra.mxu0 %v5322_v55 }
  0x6b   :  { %4713 = vmatprep.subr.bf16.mxu0 %v5618_v0 }
  0x6e   :  { %4714 = vmatpush3.bf16.msra.mxu0 %v5323_v56 }
  0x6f   :  { %4715 = vmatprep.subr.bf16.mxu0 %v5618_v0 }
  0x72   :  { %4716 = vmatpush3.bf16.msra.mxu0 %v5324_v57 }
  0x73   :  { %4717 = vmatprep.subr.bf16.mxu0 %v5618_v0 }
  0x76   :  { %4718 = vmatpush3.bf16.msra.mxu0 %v5325_v58 }
  0x77   :  { %4747 = vmatprep.subr.bf16.mxu0 %v5618_v0 }
  0x79   :  { %4720 = vmatmul.mubr.bf16.vlgmr.msra.gmra.mrb[4].mxu0 %v5728_v23 }
  0x7a   :  { %4749 = vmatprep.mubr.msk.bf16.mxu0 %vm5619_vm0, %v5618_v0 }
 0x12b   :  { %v357_v31 = vpop.f32.mrb[0].mxu1  ;;  %v264_v35 = vpop.f32.mrb[0].mxu0 }
 0x12c   :  { %v358_v33 = vadd.f32 %v357_v31, %v274_v30  ;;  %v4701_v34 = vpop.f32.mrb[1].mxu1  ;;  %v4681_v37 = vpop.f32.mrb[1].mxu0  ;;  %v265_v42 = vadd.f32 %v264_v35, %v181_v32 }
 0x12d   :  { %v360_v36 = vpop.f32.mrb[2].mxu1  ;;  %v267_v41 = vpop.f32.mrb[2].mxu0 }
 0x12e   :  { %v5765_v39 = vpack.c.bf16 %v358_v33, %v358_v33  ;;  %v4702_v40 = vpop.f32.mrb[3].mxu1  ;;  %v4682_v43 = vpop.f32.mrb[3].mxu0  ;;  %v361_v44 = vadd.f32 %v360_v36, %v274_v30  ;;  %v5771_v45 = vpack.c.bf16 %v265_v42, %v265_v42  ;;  %v268_v47 = vadd.f32 %v267_v41, %v181_v32 }
 0x130   :  { %4724 = vmatpush3.bf16.xpose.msk.msra.mxu1 %vm5761_vm2, %v5765_v39  ;;  %v5773_v46 = vpack.c.bf16 %v361_v44, %v361_v44  ;;  %v5788_v49 = vpack.c.bf16 %v268_v47, %v268_v47  ;;  %v366_v47 = vsub.s32 2, %v5738_v25 }
 0x131   :  { %4729 = vmatprep.subr.bf16.mxu1 %v5618_v0 }
 0x132   :  { %v367_v51 = vrot.slane %v5746_v27, %v366_v47 }
 0x137   :  { %4726 = vmatmul.mubr.bf16.vlgmr.msra.gmra.mrb[4].mxu1 %v5771_v45 }
 0x138   :  { %4730 = vmatpush3.bf16.xpose.msk.msra.mxu1 %vm5761_vm2, %v5773_v46  ;;  %4731 = vmatprep.mubr.msk.bf16.mxu1 %vm5619_vm0, %v5618_v0 }
 0x139   :  { %4735 = vmatprep.subr.bf16.mxu1 %v5618_v0 }
 0x13f   :  { %4732 = vmatmul.mubr.bf16.vlgmr.msra.gmra.mrb[8].mxu1 %v5788_v49 }
 0x140   :  { %4736 = vmatpush3.bf16.xpose.msk.msra.mxu1 %vm5793_vm6, %v5765_v39  ;;  %4737 = vmatprep.mubr.msk.bf16.mxu1 %vm5619_vm0, %v5618_v0 }
 0x141   :  { %4741 = vmatprep.subr.bf16.mxu1 %v5618_v0 }
 0x147   :  { %4738 = vmatmul.mubr.bf16.vlgmr.msra.gmra.mrb[12].mxu1 %v5771_v45 }
 0x148   :  { %4742 = vmatpush3.bf16.xpose.msk.msra.mxu1 %vm5793_vm6, %v5773_v46  ;;  %4743 = vmatprep.mubr.msk.bf16.mxu1 %vm5619_vm0, %v5618_v0 }
 0x149   :  { %4753 = vmatprep.subr.bf16.mxu1 %v5618_v0 }
 0x14c   :  { %v450_v52 = vpop.f32.mrb[4].mxu0 }
 0x14d   :  { %v5840_v53 = vadd.f32 %v450_v52, %v367_v51  ;;  %v4721_v54 = vpop.f32.mrb[5].mxu0 }
 0x14e   :  { %v453_v57 = vpop.f32.mrb[6].mxu0 }
 0x14f   :  { %4744 = vmatmul.mubr.bf16.vlgmr.msra.gmra.mrb[16].mxu1 %v5788_v49  ;;  %v586_v55 = vsel %vm5784_vm5, %v5840_v53, 0.0  ;;  %v4722_v58 = vpop.f32.mrb[7].mxu0 }
 0x150   :  { %4755 = vmatprep.mubr.msk.bf16.mxu1 %vm5619_vm0, %v5618_v0  ;;  %v588_v56 = vpack.c.bf16 %v586_v55, %v586_v55 }
 0x20a   :  { %v506_v59 = vpop.f32.mrb[4].mxu1 }
 0x20b   :  { %v4727_v60 = vpop.f32.mrb[5].mxu1  ;;  %v553_v61 = vsel %vm552_vm7, %v506_v59, -inf }
 0x20c   :  { %554 = vmax.xlane.f32.xlu1 %v553_v61  ;;  %v509_v62 = vpop.f32.mrb[6].mxu1  ;;  %v5846_v60 = vadd.f32 %v453_v57, %v367_v51 }
 0x20d   :  { %v4728_v63 = vpop.f32.mrb[7].mxu1 }
 0x20e   :  { %v587_v61 = vsel %vm5784_vm5, %v5846_v60, 0.0 }
 0x20f   :  { %v589_v62 = vpack.c.bf16 %v587_v61, %v587_v61 }
 0x211   :  { %v745_v63 = vsel %vm697_vm8, %v589_v62, 0 }
 0x212   :  { %v546_v1 = vpop.f32.mrb[8].mxu1  ;;  %4754 = vmatpush3.bf16.msra.mxu1 %v745_v63 }
 0x213   :  { %v4733_v2 = vpop.f32.mrb[9].mxu1  ;;  %v556_v3 = vsel %vm552_vm7, %v546_v1, -inf  ;;  %4765 = vmatprep.subr.bf16.mxu1 %v5618_v0 }
 0x214   :  { %557 = vmax.xlane.f32.xlu1 %v556_v3  ;;  %v549_v4 = vpop.f32.mrb[10].mxu1  ;;  %v468_v3 = vsel %vm6506_vm1, %v5840_v53, 0.0 }
 0x215   :  { %v4734_v5 = vpop.f32.mrb[11].mxu1 }
 0x216   :  { %v470_v5 = vpack.c.bf16 %v468_v3, %v468_v3 }
 0x21a   :  { %v624_v6 = vpop.f32.mrb[12].mxu1 }
 0x21b   :  { %v4739_v7 = vpop.f32.mrb[13].mxu1  ;;  %v670_v8 = vsel %vm552_vm7, %v624_v6, -inf }
 0x21c   :  { %671 = vmax.xlane.f32.xlu0 %v670_v8  ;;  %v627_v9 = vpop.f32.mrb[14].mxu1 }
 0x21d   :  { %v4740_v10 = vpop.f32.mrb[15].mxu1 }
 0x21e   :  { %v791_v10 = vsel %vm697_vm8, %v470_v5, 0 }
 0x222   :  { %v664_v11 = vpop.f32.mrb[16].mxu1 }
 0x223   :  { %v4745_v12 = vpop.f32.mrb[17].mxu1  ;;  %v673_v13 = vsel %vm552_vm7, %v664_v11, -inf }
 0x224   :  { %674 = vmax.xlane.f32.xlu0 %v673_v13  ;;  %v667_v14 = vpop.f32.mrb[18].mxu1 }
 0x225   :  { %v4746_v15 = vpop.f32.mrb[19].mxu1 }
 0x299   :  { %v555_v16 = vpop.xlane.xlu1 %554 }
 0x29a   :  { %v559_v17 = vsub.f32 %v506_v59, %v555_v16  ;;  %v699_v59 = vsel %vm697_vm8, %v588_v56, 0 }
 0x29b   :  { %4748 = vmatpush3.bf16.msra.mxu0 %v699_v59 }
 0x29c   :  { %v561_v22 = vmul.f32 1.442695, %v559_v17  ;;  %4759 = vmatprep.subr.bf16.mxu0 %v5618_v0 }
 0x2a1   :  { %v558_v24 = vpop.xlane.xlu1 %557 }
 0x2a2   :  { %v560_v30 = vsub.f32 %v546_v1, %v558_v24 }
 0x2a4   :  { %v563_v33 = vmul.f32 1.442695, %v560_v30  ;;  %v888_v30 = vsel %vm5869_vm11, %v5840_v53, 0.0 }
 0x2a9   :  { %v672_v18 = vpop.xlane.xlu0 %671 }
 0x2aa   :  { %v676_v19 = vsub.f32 %v624_v6, %v672_v18 }
 0x2ac   :  { %v678_v23 = vmul.f32 1.442695, %v676_v19 }
 0x2ae   :  { %5406 = vpow2.f32 %v678_v23 }
 0x2af   :  { %5408 = vpow2.f32 %v561_v22 }
 0x2b1   :  { %v675_v31 = vpop.xlane.xlu0 %674 }
 0x2b2   :  { %v677_v32 = vsub.f32 %v664_v11, %v675_v31  ;;  %v469_v11 = vsel %vm6506_vm1, %v5846_v60, 0.0  ;;  %vm6023_vm1 = vmpackc.low %vm6016_vm9, %vm6016_vm9 }
 0x2b3   :  { %v471_v15 = vpack.c.bf16 %v469_v11, %v469_v11 }
 0x2b4   :  { %v680_v34 = vmul.f32 1.442695, %v677_v32  ;;  %v890_v32 = vpack.c.bf16 %v888_v30, %v888_v30 }
 0x2b5   :  { %v837_v18 = vsel %vm697_vm8, %v471_v15, 0 }
 0x2b6   :  { %5410 = vpow2.f32 %v680_v34  ;;  %v1000_v34 = vsel %vm697_vm8, %v890_v32, 0 }
 0x2b7   :  { %5412 = vpow2.f32 %v563_v33 }
 0x2b8   :  { %v5407_v35 = vpop.eup %5406 }
 0x2b9   :  { %v682_v36 = vsel %vm552_vm7, %v5407_v35, 0.0  ;;  %v5409_v37 = vpop.eup %5408 }
 0x2ba   :  { %683 = vadd.xlane.f32.xlu0 %v682_v36  ;;  %v565_v40 = vsel %vm552_vm7, %v5409_v37, 0.0 }
 0x2be   :  { %566 = vadd.xlane.f32.xlu0 %v565_v40 }
 0x2c0   :  { %v5411_v41 = vpop.eup %5410 }
 0x2c1   :  { %v685_v42 = vsel %vm552_vm7, %v5411_v41, 0.0  ;;  %v5832_v43 = vpop.eup %5412 }
 0x2c2   :  { %686 = vadd.xlane.f32.xlu1 %v685_v42  ;;  %v568_v44 = vsel %vm552_vm7, %v5832_v43, 0.0 }
 0x2c6   :  { %569 = vadd.xlane.f32.xlu1 %v568_v44 }
 0x347   :  { %v684_v1 = vpop.xlane.xlu0 %683 }
 0x348   :  { %5414 = vrcp.f32 %v684_v1 }
 0x34b   :  { %v567_v2 = vpop.xlane.xlu0 %566 }
 0x34c   :  { %5416 = vrcp.f32 %v567_v2 }
 0x34f   :  { %v687_v4 = vpop.xlane.xlu1 %686 }
 0x350   :  { %5418 = vrcp.f32 %v687_v4 }
 0x352   :  { %v5415_v6 = vpop.eup %5414 }
 0x353   :  { %v690_v7 = vmul.f32 %v5415_v6, %v5407_v35  ;;  %v570_v8 = vpop.xlane.xlu1 %569  ;;  %v889_v35 = vsel %vm5869_vm11, %v5846_v60, 0.0 }
 0x354   :  { %5420 = vrcp.f32 %v570_v8  ;;  %v891_v36 = vpack.c.bf16 %v889_v35, %v889_v35 }
 0x355   :  { %v692_v9 = vpack.c.bf16 %v690_v7, %v690_v7 }
 0x356   :  { %v5417_v12 = vpop.eup %5416 }
 0x357   :  { %4750 = vmatmul.mubr.msk.bf16.vlgmr.msra.gmra.mrb[8].mxu0 %vm552_vm7, %v692_v9  ;;  %v573_v16 = vmul.f32 %v5417_v12, %v5409_v37  ;;  %v1046_v37 = vsel %vm697_vm8, %v891_v36, 0  ;;  %v1099_v12 = vsel %vm5920_vm15, %v5840_v53, 0.0 }
 0x358   :  { %4760 = vmatpush3.bf16.msra.mxu0 %v791_v10  ;;  %4761 = vmatprep.mubr.msk.bf16.mxu0 %vm5619_vm0, %v5618_v0  ;;  %v1101_v15 = vpack.c.bf16 %v1099_v12, %v1099_v12  ;;  %v1311_v12 = vsel %vm5967_vm10, %v5846_v60, 0.0 }
 0x359   :  { %4771 = vmatprep.subr.bf16.mxu0 %v5618_v0  ;;  %v575_v22 = vpack.c.bf16 %v573_v16, %v573_v16 }
 0x35a   :  { %v5419_v13 = vpop.eup %5418 }
 0x35b   :  { %v691_v14 = vmul.f32 %v5419_v13, %v5411_v41 }
 0x35d   :  { %v693_v17 = vpack.c.bf16 %v691_v14, %v691_v14 }
 0x35e   :  { %v5421_v24 = vpop.eup %5420 }
 0x35f   :  { %4756 = vmatmul.mubr.msk.bf16.vlgmr.msra.gmra.mrb[20].mxu1 %vm552_vm7, %v693_v17  ;;  %v574_v31 = vmul.f32 %v5421_v24, %v5832_v43  ;;  %v1211_v17 = vsel %vm697_vm8, %v1101_v15, 0 }
 0x360   :  { %4766 = vmatpush3.bf16.msra.mxu1 %v837_v18  ;;  %4767 = vmatprep.mubr.msk.bf16.mxu1 %vm5619_vm0, %v5618_v0  ;;  %v1100_v18 = vsel %vm5920_vm15, %v5846_v60, 0.0 }
 0x361   :  { %4777 = vmatprep.subr.bf16.mxu1 %v5618_v0  ;;  %v576_v33 = vpack.c.bf16 %v574_v31, %v574_v31 }
 0x363   :  { %4762 = vmatmul.mubr.msk.bf16.vlgmr.msra.gmra.mrb[8].mxu0 %vm552_vm7, %v575_v22  ;;  %v1102_v22 = vpack.c.bf16 %v1100_v18, %v1100_v18 }
 0x364   :  { %4772 = vmatpush3.bf16.xpose.msk.msra.mxu0 %vm5878_vm12, %v5765_v39  ;;  %4773 = vmatprep.mubr.msk.bf16.mxu0 %vm5619_vm0, %v5618_v0 }
 0x365   :  { %4783 = vmatprep.subr.bf16.mxu0 %v5618_v0  ;;  %v1257_v24 = vsel %vm697_vm8, %v1102_v22, 0 }
 0x36b   :  { %4768 = vmatmul.mubr.msk.bf16.vlgmr.msra.gmra.mrb[20].mxu1 %vm552_vm7, %v576_v33  ;;  %4774 = vmatmul.mubr.bf16.vlgmr.msra.gmra.mrb[12].mxu0 %v5771_v45 }
 0x36c   :  { %4778 = vmatpush3.bf16.xpose.msk.msra.mxu1 %vm5878_vm12, %v5773_v46  ;;  %4784 = vmatpush3.bf16.msra.mxu0 %v1000_v34 }
 0x36d   :  { %4779 = vmatprep.mubr.msk.bf16.mxu1 %vm5619_vm0, %v5618_v0  ;;  %4789 = vmatprep.subr.bf16.mxu1 %v5618_v0 }
 0x36e   :  { %4785 = vmatprep.mubr.msk.bf16.mxu0 %vm5619_vm0, %v5618_v0  ;;  %4795 = vmatprep.subr.bf16.mxu0 %v5618_v0 }
 0x373   :  { %4780 = vmatmul.mubr.bf16.vlgmr.msra.gmra.mrb[24].mxu1 %v5788_v49 }
 0x374   :  { %4790 = vmatpush3.bf16.msra.mxu1 %v1046_v37  ;;  %4791 = vmatprep.mubr.msk.bf16.mxu1 %vm5619_vm0, %v5618_v0 }
 0x375   :  { %4801 = vmatprep.subr.bf16.mxu1 %v5618_v0 }
 0x43e   :  { %v926_v40 = vpop.f32.mrb[12].mxu0 }
 0x43f   :  { %v4775_v41 = vpop.f32.mrb[13].mxu0  ;;  %v972_v42 = vsel %vm552_vm7, %v926_v40, -inf }
 0x440   :  { %973 = vmax.xlane.f32.xlu0 %v972_v42  ;;  %v929_v43 = vpop.f32.mrb[14].mxu0 }
 0x441   :  { %v4776_v44 = vpop.f32.mrb[15].mxu0 }
 0x446   :  { %v966_v51 = vpop.f32.mrb[24].mxu1 }
 0x447   :  { %v4781_v52 = vpop.f32.mrb[25].mxu1  ;;  %v975_v54 = vsel %vm552_vm7, %v966_v51, -inf }
 0x448   :  { %976 = vmax.xlane.f32.xlu1 %v975_v54  ;;  %v969_v55 = vpop.f32.mrb[26].mxu1 }
 0x449   :  { %v4782_v56 = vpop.f32.mrb[27].mxu1 }
 0x4cd   :  { %v974_v57 = vpop.xlane.xlu0 %973 }
 0x4ce   :  { %v978_v58 = vsub.f32 %v926_v40, %v974_v57 }
 0x4d0   :  { %v980_v59 = vmul.f32 1.442695, %v978_v58 }
 0x4d2   :  { %5422 = vpow2.f32 %v980_v59 }
 0x4d5   :  { %v977_v61 = vpop.xlane.xlu1 %976 }
 0x4d6   :  { %v979_v62 = vsub.f32 %v966_v51, %v977_v61 }
 0x4d8   :  { %v982_v63 = vmul.f32 1.442695, %v979_v62 }
 0x4da   :  { %5424 = vpow2.f32 %v982_v63 }
 0x4dc   :  { %v5423_v1 = vpop.eup %5422 }
 0x4dd   :  { %v984_v2 = vsel %vm552_vm7, %v5423_v1, 0.0 }
 0x4de   :  { %985 = vadd.xlane.f32.xlu0 %v984_v2 }
 0x4e4   :  { %v5425_v3 = vpop.eup %5424 }
 0x4e5   :  { %v987_v4 = vsel %vm552_vm7, %v5425_v3, 0.0 }
 0x4e6   :  { %988 = vadd.xlane.f32.xlu1 %v987_v4  ;;  %v1310_v4 = vsel %vm5967_vm10, %v5840_v53, 0.0 }
 0x56b   :  { %v986_v5 = vpop.xlane.xlu0 %985 }
 0x56c   :  { %5426 = vrcp.f32 %v986_v5 }
 0x573   :  { %v989_v6 = vpop.xlane.xlu1 %988 }
 0x574   :  { %5428 = vrcp.f32 %v989_v6 }
 0x576   :  { %v5427_v7 = vpop.eup %5426 }
 0x577   :  { %v992_v8 = vmul.f32 %v5427_v7, %v5423_v1  ;;  %v1312_v7 = vpack.c.bf16 %v1310_v4, %v1310_v4 }
 0x579   :  { %v994_v10 = vpack.c.bf16 %v992_v8, %v992_v8 }
 0x57b   :  { %4786 = vmatmul.mubr.msk.bf16.vlgmr.msra.gmra.mrb[8].mxu0 %vm552_vm7, %v994_v10  ;;  %v1422_v10 = vsel %vm697_vm8, %v1312_v7, 0 }
 0x57c   :  { %4796 = vmatpush3.bf16.xpose.msk.msra.mxu0 %vm5927_vm3, %v5765_v39  ;;  %4797 = vmatprep.mubr.msk.bf16.mxu0 %vm5619_vm0, %v5618_v0 }
 0x57d   :  { %4807 = vmatprep.subr.bf16.mxu0 %v5618_v0 }
 0x57e   :  { %v5429_v13 = vpop.eup %5428 }
 0x57f   :  { %v993_v14 = vmul.f32 %v5429_v13, %v5425_v3  ;;  %v1313_v13 = vpack.c.bf16 %v1311_v12, %v1311_v12 }
 0x581   :  { %v995_v16 = vpack.c.bf16 %v993_v14, %v993_v14  ;;  %v1468_v14 = vsel %vm697_vm8, %v1313_v13, 0 }
 0x583   :  { %4792 = vmatmul.mubr.msk.bf16.vlgmr.msra.gmra.mrb[20].mxu1 %vm552_vm7, %v995_v16  ;;  %4798 = vmatmul.mubr.bf16.vlgmr.msra.gmra.mrb[16].mxu0 %v5771_v45 }
 0x584   :  { %4802 = vmatpush3.bf16.xpose.msk.msra.mxu1 %vm5927_vm3, %v5773_v46  ;;  %4808 = vmatpush3.bf16.msra.mxu0 %v1211_v17 }
 0x585   :  { %4803 = vmatprep.mubr.msk.bf16.mxu1 %vm5619_vm0, %v5618_v0  ;;  %4813 = vmatprep.subr.bf16.mxu1 %v5618_v0 }
 0x586   :  { %4809 = vmatprep.mubr.msk.bf16.mxu0 %vm5619_vm0, %v5618_v0  ;;  %4819 = vmatprep.subr.bf16.mxu0 %v5618_v0 }
 0x58b   :  { %4804 = vmatmul.mubr.bf16.vlgmr.msra.gmra.mrb[28].mxu1 %v5788_v49 }
 0x58c   :  { %4814 = vmatpush3.bf16.msra.mxu1 %v1257_v24  ;;  %4815 = vmatprep.mubr.msk.bf16.mxu1 %vm5619_vm0, %v5618_v0 }
 0x58d   :  { %4825 = vmatprep.subr.bf16.mxu1 %v5618_v0 }
 0x656   :  { %v1137_v30 = vpop.f32.mrb[16].mxu0 }
 0x657   :  { %v4799_v31 = vpop.f32.mrb[17].mxu0  ;;  %v1183_v32 = vsel %vm552_vm7, %v1137_v30, -inf }
 0x658   :  { %1184 = vmax.xlane.f32.xlu0 %v1183_v32  ;;  %v1140_v33 = vpop.f32.mrb[18].mxu0 }
 0x659   :  { %v4800_v34 = vpop.f32.mrb[19].mxu0 }
 0x65e   :  { %v1177_v35 = vpop.f32.mrb[28].mxu1 }
 0x65f   :  { %v4805_v36 = vpop.f32.mrb[29].mxu1  ;;  %v1186_v37 = vsel %vm552_vm7, %v1177_v35, -inf }
 0x660   :  { %1187 = vmax.xlane.f32.xlu1 %v1186_v37  ;;  %v1180_v40 = vpop.f32.mrb[30].mxu1 }
 0x661   :  { %v4806_v41 = vpop.f32.mrb[31].mxu1 }
 0x6e5   :  { %v1185_v42 = vpop.xlane.xlu0 %1184 }
 0x6e6   :  { %v1189_v43 = vsub.f32 %v1137_v30, %v1185_v42 }
 0x6e8   :  { %v1191_v44 = vmul.f32 1.442695, %v1189_v43 }
 0x6ea   :  { %5430 = vpow2.f32 %v1191_v44 }
 0x6ed   :  { %v1188_v51 = vpop.xlane.xlu1 %1187 }
 0x6ee   :  { %v1190_v52 = vsub.f32 %v1177_v35, %v1188_v51 }
 0x6f0   :  { %v1193_v54 = vmul.f32 1.442695, %v1190_v52 }
 0x6f2   :  { %5432 = vpow2.f32 %v1193_v54 }
 0x6f4   :  { %v5431_v55 = vpop.eup %5430 }
 0x6f5   :  { %v1195_v56 = vsel %vm552_vm7, %v5431_v55, 0.0 }
 0x6f6   :  { %1196 = vadd.xlane.f32.xlu0 %v1195_v56 }
 0x6fc   :  { %v5433_v57 = vpop.eup %5432 }
 0x6fd   :  { %v1198_v58 = vsel %vm552_vm7, %v5433_v57, 0.0 }
 0x6fe   :  { %1199 = vadd.xlane.f32.xlu1 %v1198_v58 }
 0x783   :  { %v1197_v59 = vpop.xlane.xlu0 %1196 }
 0x784   :  { %5434 = vrcp.f32 %v1197_v59 }
 0x78b   :  { %v1200_v61 = vpop.xlane.xlu1 %1199 }
 0x78c   :  { %5436 = vrcp.f32 %v1200_v61  ;;  %v1520_v61 = vsel %vm6016_vm9, %v5840_v53, 0.0 }
 0x78e   :  { %v5435_v62 = vpop.eup %5434 }
 0x78f   :  { %v1203_v63 = vmul.f32 %v5435_v62, %v5431_v55 }
 0x791   :  { %v1205_v2 = vpack.c.bf16 %v1203_v63, %v1203_v63 }
 0x793   :  { %4810 = vmatmul.mubr.msk.bf16.vlgmr.msra.gmra.mrb[8].mxu0 %vm552_vm7, %v1205_v2  ;;  %v1522_v2 = vpack.c.bf16 %v1520_v61, %v1520_v61  ;;  %v5333_v61 = vld [vmem:[#allocation7 + $0xf8] sm:$0xff]  }
 0x794   :  { %4820 = vmatpush3.bf16.xpose.msk.msra.mxu0 %vm5974_vm13, %v5765_v39  ;;  %4821 = vmatprep.mubr.msk.bf16.mxu0 %vm5619_vm0, %v5618_v0 }
 0x795   :  { %4831 = vmatprep.subr.bf16.mxu0 %v5618_v0 }
 0x796   :  { %v5437_v5 = vpop.eup %5436 }
 0x797   :  { %v1204_v6 = vmul.f32 %v5437_v5, %v5433_v57  ;;  %v1632_v5 = vsel %vm697_vm8, %v1522_v2, 0 }
 0x799   :  { %v1206_v8 = vpack.c.bf16 %v1204_v6, %v1204_v6 }
 0x79b   :  { %4816 = vmatmul.mubr.msk.bf16.vlgmr.msra.gmra.mrb[20].mxu1 %vm552_vm7, %v1206_v8  ;;  %4822 = vmatmul.mubr.bf16.vlgmr.msra.gmra.mrb[20].mxu0 %v5771_v45 }
 0x79c   :  { %4826 = vmatpush3.bf16.xpose.msk.msra.mxu1 %vm5974_vm13, %v5773_v46  ;;  %4832 = vmatpush3.bf16.msra.mxu0 %v1422_v10 }
 0x79d   :  { %4827 = vmatprep.mubr.msk.bf16.mxu1 %vm5619_vm0, %v5618_v0  ;;  %4837 = vmatprep.subr.bf16.mxu1 %v5618_v0 }
 0x79e   :  { %4833 = vmatprep.mubr.msk.bf16.mxu0 %vm5619_vm0, %v5618_v0  ;;  %4843 = vmatprep.subr.bf16.mxu0 %v5618_v0 }
 0x7a3   :  { %4828 = vmatmul.mubr.bf16.vlgmr.msra.gmra.mrb[32].mxu1 %v5788_v49 }
 0x7a4   :  { %4838 = vmatpush3.bf16.msra.mxu1 %v1468_v14  ;;  %4839 = vmatprep.mubr.msk.bf16.mxu1 %vm5619_vm0, %v5618_v0 }
 0x7a5   :  { %4849 = vmatprep.subr.bf16.mxu1 %v5618_v0 }
 0x86e   :  { %v1348_v15 = vpop.f32.mrb[20].mxu0 }
 0x86f   :  { %v4823_v16 = vpop.f32.mrb[21].mxu0  ;;  %v1394_v17 = vsel %vm552_vm7, %v1348_v15, -inf }
 0x870   :  { %1395 = vmax.xlane.f32.xlu0 %v1394_v17  ;;  %v1351_v18 = vpop.f32.mrb[22].mxu0 }
 0x871   :  { %v4824_v22 = vpop.f32.mrb[23].mxu0 }
 0x876   :  { %v1388_v24 = vpop.f32.mrb[32].mxu1 }
 0x877   :  { %v4829_v30 = vpop.f32.mrb[33].mxu1  ;;  %v1397_v31 = vsel %vm552_vm7, %v1388_v24, -inf }
 0x878   :  { %1398 = vmax.xlane.f32.xlu1 %v1397_v31  ;;  %v1391_v32 = vpop.f32.mrb[34].mxu1 }
 0x879   :  { %v4830_v33 = vpop.f32.mrb[35].mxu1 }
 0x8fd   :  { %v1396_v34 = vpop.xlane.xlu0 %1395 }
 0x8fe   :  { %v1400_v35 = vsub.f32 %v1348_v15, %v1396_v34 }
 0x900   :  { %v1402_v36 = vmul.f32 1.442695, %v1400_v35 }
 0x902   :  { %5438 = vpow2.f32 %v1402_v36 }
 0x905   :  { %v1399_v37 = vpop.xlane.xlu1 %1398 }
 0x906   :  { %v1401_v40 = vsub.f32 %v1388_v24, %v1399_v37 }
 0x908   :  { %v1404_v41 = vmul.f32 1.442695, %v1401_v40  ;;  %v5326_v40 = vld [vmem:[#allocation7 + $0xc0] sm:$0xff]  }
 0x90a   :  { %5440 = vpow2.f32 %v1404_v41 }
 0x90c   :  { %v5439_v42 = vpop.eup %5438 }
 0x90d   :  { %v1406_v43 = vsel %vm552_vm7, %v5439_v42, 0.0 }
 0x90e   :  { %1407 = vadd.xlane.f32.xlu0 %v1406_v43 }
 0x914   :  { %v5441_v44 = vpop.eup %5440 }
 0x915   :  { %v1409_v51 = vsel %vm552_vm7, %v5441_v44, 0.0 }
 0x916   :  { %1410 = vadd.xlane.f32.xlu1 %v1409_v51  ;;  %v5328_v51 = vld [vmem:[#allocation7 + $0xd0] sm:$0xff]  }
 0x99b   :  { %v1408_v52 = vpop.xlane.xlu0 %1407 }
 0x99c   :  { %5442 = vrcp.f32 %v1408_v52 }
 0x9a3   :  { %v1411_v54 = vpop.xlane.xlu1 %1410 }
 0x9a4   :  { %5444 = vrcp.f32 %v1411_v54  ;;  %v5329_v54 = vld [vmem:[#allocation7 + $0xd8] sm:$0xff]  }
 0x9a6   :  { %v5443_v55 = vpop.eup %5442 }
 0x9a7   :  { %v1414_v56 = vmul.f32 %v5443_v55, %v5439_v42  ;;  %v5327_v42 = vld [vmem:[#allocation7 + $0xc8] sm:$0xff]   ;;  %v5330_v55 = vld [vmem:[#allocation7 + $0xe0] sm:$0xff]  }
 0x9a9   :  { %v1416_v58 = vpack.c.bf16 %v1414_v56, %v1414_v56  ;;  %v5331_v56 = vld [vmem:[#allocation7 + $0xe8] sm:$0xff]  }
 0x9ab   :  { %4834 = vmatmul.mubr.msk.bf16.vlgmr.msra.gmra.mrb[8].mxu0 %vm552_vm7, %v1416_v58  ;;  %v5332_v58 = vld [vmem:[#allocation7 + $0xf0] sm:$0xff]  }
 0x9ac   :  { %4844 = vmatpush3.bf16.xpose.msk.msra.mxu0 %vm6023_vm1, %v5765_v39  ;;  %4845 = vmatprep.mubr.msk.bf16.mxu0 %vm5619_vm0, %v5618_v0  ;;  %v1521_v39 = vsel %vm6016_vm9, %v5846_v60, 0.0 }
 0x9ad   :  { %4855 = vmatprep.subr.bf16.mxu0 %v5618_v0 }
 0x9ae   :  { %v5445_v62 = vpop.eup %5444 }
 0x9af   :  { %v1415_v63 = vmul.f32 %v5445_v62, %v5441_v44 }
 0x9b1   :  { %v1417_v4 = vpack.c.bf16 %v1415_v63, %v1415_v63 }
 0x9b3   :  { %4840 = vmatmul.mubr.msk.bf16.vlgmr.msra.gmra.mrb[20].mxu1 %vm552_vm7, %v1417_v4  ;;  %4846 = vmatmul.mubr.bf16.vlgmr.msra.gmra.mrb[24].mxu0 %v5771_v45  ;;  %v1523_v45 = vpack.c.bf16 %v1521_v39, %v1521_v39 }
 0x9b4   :  { %4850 = vmatpush3.bf16.xpose.msk.msra.mxu1 %vm6023_vm1, %v5773_v46  ;;  %4856 = vmatpush3.bf16.msra.mxu0 %v1632_v5 }
 0x9b5   :  { %4851 = vmatprep.mubr.msk.bf16.mxu1 %vm5619_vm0, %v5618_v0  ;;  %4861 = vmatprep.subr.bf16.mxu1 %v5618_v0  ;;  %v1678_v46 = vsel %vm697_vm8, %v1523_v45, 0 }
 0x9b6   :  { %4857 = vmatprep.mubr.msk.bf16.mxu0 %vm5619_vm0, %v5618_v0  ;;  %4867 = vmatprep.subr.bf16.mxu0 %v5618_v0 }
 0x9bb   :  { %4852 = vmatmul.mubr.bf16.vlgmr.msra.gmra.mrb[36].mxu1 %v5788_v49 }
 0x9bc   :  { %4862 = vmatpush3.bf16.msra.mxu1 %v1678_v46  ;;  %4863 = vmatprep.mubr.msk.bf16.mxu1 %vm5619_vm0, %v5618_v0 }
 0x9bd   :  { %4887 = vmatprep.subr.bf16.mxu1 %v5618_v0 }
 0xa86   :  { %v1558_v53 = vpop.f32.mrb[24].mxu0 }
 0xa87   :  { %v4847_v60 = vpop.f32.mrb[25].mxu0  ;;  %v1604_v6 = vsel %vm552_vm7, %v1558_v53, -inf }
 0xa88   :  { %1605 = vmax.xlane.f32.xlu0 %v1604_v6  ;;  %v1561_v7 = vpop.f32.mrb[26].mxu0  ;;  %v1725_v60 = vsub.s32 3, %v5738_v25 }
 0xa89   :  { %v4848_v8 = vpop.f32.mrb[27].mxu0 }
 0xa8a   :  { %v1726_v6 = vrot.slane %v5746_v27, %v1725_v60 }
 0xa8e   :  { %v1598_v10 = vpop.f32.mrb[36].mxu1 }
 0xa8f   :  { %v4853_v12 = vpop.f32.mrb[37].mxu1  ;;  %v1607_v13 = vsel %vm552_vm7, %v1598_v10, -inf }
 0xa90   :  { %1608 = vmax.xlane.f32.xlu1 %v1607_v13  ;;  %v1601_v49 = vpop.f32.mrb[38].mxu1 }
 0xa91   :  { %v4854_v14 = vpop.f32.mrb[39].mxu1 }
 0xb15   :  { %v1606_v15 = vpop.xlane.xlu0 %1605 }
 0xb16   :  { %v1610_v16 = vsub.f32 %v1558_v53, %v1606_v15 }
 0xb18   :  { %v1612_v17 = vmul.f32 1.442695, %v1610_v16  ;;  %v5334_v16 = vld [vmem:[#allocation7 + $0x100] sm:$0xff]  }
 0xb1a   :  { %5446 = vpow2.f32 %v1612_v17  ;;  %v5335_v17 = vld [vmem:[#allocation7 + $0x108] sm:$0xff]  }
 0xb1d   :  { %v1609_v18 = vpop.xlane.xlu1 %1608 }
 0xb1e   :  { %v1611_v22 = vsub.f32 %v1598_v10, %v1609_v18 }
 0xb20   :  { %v1614_v24 = vmul.f32 1.442695, %v1611_v22 }
 0xb22   :  { %5448 = vpow2.f32 %v1614_v24 }
 0xb24   :  { %v5447_v30 = vpop.eup %5446 }
 0xb25   :  { %v1616_v31 = vsel %vm552_vm7, %v5447_v30, 0.0 }
 0xb26   :  { %1617 = vadd.xlane.f32.xlu0 %v1616_v31 }
 0xb2c   :  { %v5449_v32 = vpop.eup %5448 }
 0xb2d   :  { %v1619_v33 = vsel %vm552_vm7, %v5449_v32, 0.0 }
 0xb2e   :  { %1620 = vadd.xlane.f32.xlu1 %v1619_v33 }
 0xbb3   :  { %v1618_v34 = vpop.xlane.xlu0 %1617 }
 0xbb4   :  { %5450 = vrcp.f32 %v1618_v34  ;;  %v5336_v34 = vld [vmem:[#allocation7 + $0x110] sm:$0xff]  }
 0xbbb   :  { %v1621_v35 = vpop.xlane.xlu1 %1620 }
 0xbbc   :  { %5452 = vrcp.f32 %v1621_v35  ;;  %v5337_v35 = vld [vmem:[#allocation7 + $0x118] sm:$0xff]  }
 0xbbe   :  { %v5451_v36 = vpop.eup %5450 }
 0xbbf   :  { %v1624_v37 = vmul.f32 %v5451_v36, %v5447_v30  ;;  %v5338_v36 = vld [vmem:[#allocation7 + $0x120] sm:$0xff]  }
 0xbc1   :  { %v1626_v41 = vpack.c.bf16 %v1624_v37, %v1624_v37  ;;  %v5339_v37 = vld [vmem:[#allocation7 + $0x128] sm:$0xff]  }
 0xbc3   :  { %4858 = vmatmul.mubr.msk.bf16.vlgmr.msra.gmra.mrb[8].mxu0 %vm552_vm7, %v1626_v41  ;;  %v5341_v41 = vld [vmem:[#allocation7 + $0x138] sm:$0xff]  }
 0xbc4   :  { %4868 = vmatpush3.bf16.msra.mxu0 %v5326_v40  ;;  %4883 = vmatprep.mubr.msk.bf16.mxu0 %vm5619_vm0, %v5618_v0  ;;  %v5340_v40 = vld [vmem:[#allocation7 + $0x130] sm:$0xff]  }
 0xbc5   :  { %4869 = vmatprep.subr.bf16.mxu0 %v5618_v0 }
 0xbc6   :  { %v5453_v43 = vpop.eup %5452 }
 0xbc7   :  { %v1625_v44 = vmul.f32 %v5453_v43, %v5449_v32  ;;  %v5343_v43 = vld [vmem:[#allocation7 + $0x148] sm:$0xff]  }
 0xbc8   :  { %4870 = vmatpush3.bf16.msra.mxu0 %v5327_v42  ;;  %v5342_v42 = vld [vmem:[#allocation7 + $0x140] sm:$0xff]  }
 0xbc9   :  { %v1627_v52 = vpack.c.bf16 %v1625_v44, %v1625_v44  ;;  %4871 = vmatprep.subr.bf16.mxu0 %v5618_v0  ;;  %v5344_v44 = vld [vmem:[#allocation7 + $0x150] sm:$0xff]  }
 0xbcb   :  { %4864 = vmatmul.mubr.msk.bf16.vlgmr.msra.gmra.mrb[20].mxu1 %vm552_vm7, %v1627_v52  ;;  %v5346_v52 = vld [vmem:[#allocation7 + $0x160] sm:$0xff]  }
 0xbcc   :  { %4872 = vmatpush3.bf16.msra.mxu0 %v5328_v51  ;;  %4903 = vmatprep.mubr.msk.bf16.mxu1 %vm5619_vm0, %v5618_v0  ;;  %v5345_v51 = vld [vmem:[#allocation7 + $0x158] sm:$0xff]  }
 0xbcd   :  { %4873 = vmatprep.subr.bf16.mxu0 %v5618_v0  ;;  %4888 = vmatpush3.bf16.msra.mxu1 %v5334_v16  ;;  %v1859_v16 = vsub.s32 6, %v5738_v25 }
 0xbce   :  { %4889 = vmatprep.subr.bf16.mxu1 %v5618_v0 }
 0xbd0   :  { %4874 = vmatpush3.bf16.msra.mxu0 %v5329_v54  ;;  %v5347_v54 = vld [vmem:[#allocation7 + $0x168] sm:$0xff]  }
 0xbd1   :  { %4875 = vmatprep.subr.bf16.mxu0 %v5618_v0  ;;  %4890 = vmatpush3.bf16.msra.mxu1 %v5335_v17 }
 0xbd2   :  { %4891 = vmatprep.subr.bf16.mxu1 %v5618_v0 }
 0xbd4   :  { %4876 = vmatpush3.bf16.msra.mxu0 %v5330_v55 }
 0xbd5   :  { %4877 = vmatprep.subr.bf16.mxu0 %v5618_v0  ;;  %4892 = vmatpush3.bf16.msra.mxu1 %v5336_v34 }
 0xbd6   :  { %4893 = vmatprep.subr.bf16.mxu1 %v5618_v0 }
 0xbd8   :  { %4878 = vmatpush3.bf16.msra.mxu0 %v5331_v56 }
 0xbd9   :  { %4879 = vmatprep.subr.bf16.mxu0 %v5618_v0  ;;  %4894 = vmatpush3.bf16.msra.mxu1 %v5337_v35 }
 0xbda   :  { %4895 = vmatprep.subr.bf16.mxu1 %v5618_v0 }
 0xbdc   :  { %4880 = vmatpush3.bf16.msra.mxu0 %v5332_v58 }
 0xbdd   :  { %4881 = vmatprep.subr.bf16.mxu0 %v5618_v0  ;;  %4896 = vmatpush3.bf16.msra.mxu1 %v5338_v36 }
 0xbde   :  { %4897 = vmatprep.subr.bf16.mxu1 %v5618_v0 }
 0xbe0   :  { %4882 = vmatpush3.bf16.msra.mxu0 %v5333_v61 }
 0xbe1   :  { %4907 = vmatprep.subr.bf16.mxu0 %v5618_v0  ;;  %4898 = vmatpush3.bf16.msra.mxu1 %v5339_v37 }
 0xbe2   :  { %4899 = vmatprep.subr.bf16.mxu1 %v5618_v0 }
 0xbe5   :  { %4900 = vmatpush3.bf16.msra.mxu1 %v5340_v40 }
 0xbe6   :  { %4901 = vmatprep.subr.bf16.mxu1 %v5618_v0 }
 0xbe9   :  { %4902 = vmatpush3.bf16.msra.mxu1 %v5341_v41 }
 0xbea   :  { %4927 = vmatprep.subr.bf16.mxu1 %v5618_v0 }
 0xc96   :  { %v1668_v62 = vpop.f32.mrb[8].mxu0 }
 0xc97   :  { %v4859_v63 = vpop.f32.mrb[9].mxu0 }
 0xc98   :  { %v1671_v2 = vpop.f32.mrb[10].mxu0 }
 0xc99   :  { %v4860_v4 = vpop.f32.mrb[11].mxu0  ;;  %v1846_v2 = vsub.s32 4, %v5738_v25 }
 0xc9a   :  { %v5518_v4 = vld [vmem:[%s6502_s3] sm:$0xff] }
 0xc9b   :  { %v1860_v17 = vrot.slane %v5518_v4, %v1859_v16 }
 0xc9e   :  { %v1714_v5 = vpop.f32.mrb[20].mxu1 }
 0xc9f   :  { %v1722_v39 = vpack.c.bf16 %v1714_v5, %v1668_v62  ;;  %v4865_v45 = vpop.f32.mrb[21].mxu1  ;;  %v1847_v5 = vrot.slane %v5518_v4, %v1846_v2 }
 0xca0   :  { %v1717_v46 = vpop.f32.mrb[22].mxu1 }
 0xca1   :  { %v4866_v53 = vpop.f32.mrb[23].mxu1  ;;  %4884 = vmatmul.mubr.bf16.vlgmr.msra.gmra.mrb[28].mxu0 %v1722_v39  ;;  %v1852_v39 = vsub.s32 5, %v5738_v25 }
 0xca2   :  { %4923 = vmatprep.mubr.msk.bf16.mxu0 %vm5619_vm0, %v5618_v0  ;;  %4908 = vmatpush3.bf16.msra.mxu0 %v5342_v42 }
 0xca3   :  { %4909 = vmatprep.subr.bf16.mxu0 %v5618_v0 }
 0xca6   :  { %4910 = vmatpush3.bf16.msra.mxu0 %v5343_v43 }
 0xca7   :  { %4911 = vmatprep.subr.bf16.mxu0 %v5618_v0 }
 0xcaa   :  { %4912 = vmatpush3.bf16.msra.mxu0 %v5344_v44 }
 0xcab   :  { %4913 = vmatprep.subr.bf16.mxu0 %v5618_v0 }
 0xcae   :  { %4914 = vmatpush3.bf16.msra.mxu0 %v5345_v51  ;;  %v5350_v51 = vld [vmem:[#allocation7 + $0x180] sm:$0xff]  }
 0xcaf   :  { %4915 = vmatprep.subr.bf16.mxu0 %v5618_v0 }
 0xcb2   :  { %4916 = vmatpush3.bf16.msra.mxu0 %v5346_v52  ;;  %v5351_v52 = vld [vmem:[#allocation7 + $0x1c0] sm:$0xff]  }
 0xcb3   :  { %4917 = vmatprep.subr.bf16.mxu0 %v5618_v0 }
 0xcb6   :  { %4918 = vmatpush3.bf16.msra.mxu0 %v5347_v54  ;;  %v5352_v54 = vld [vmem:[#allocation7 + $0x188] sm:$0xff]  }
 0xcb7   :  { %4919 = vmatprep.subr.bf16.mxu0 %v5618_v0 }
 0xd74   :  { %v1809_v7 = vpop.f32.mrb[28].mxu0 }
 0xd75   :  { %v1810_v8 = vadd.f32 %v1809_v7, %v1726_v6  ;;  %v4885_v10 = vpop.f32.mrb[29].mxu0 }
 0xd76   :  { %v1812_v12 = vpop.f32.mrb[30].mxu0 }
 0xd77   :  { %v1813_v13 = vadd.f32 %v1812_v12, %v1726_v6  ;;  %v4886_v49 = vpop.f32.mrb[31].mxu0  ;;  %v1816_v14 = vadd.f32 %v1810_v8, %v5720_v20  ;;  %v1853_v8 = vrot.slane %v5518_v4, %v1852_v39 }
 0xd79   :  { %1818 = vadd.xlane.f32.xlu0 %v1816_v14  ;;  %v1817_v15 = vadd.f32 %v1813_v13, %v5722_v21 }
 0xd7b   :  { %1820 = vadd.xlane.f32.xlu1 %v1817_v15 }
 0xe06   :  { %v1819_v27 = vpop.xlane.xlu0 %1818 }
 0xe07   :  { %v1822_v18 = vmul.f32 0.020833334, %v1819_v27 }
 0xe08   :  { %v1821_v22 = vpop.xlane.xlu1 %1820 }
 0xe09   :  { %v1824_v24 = vsub.f32 %v1816_v14, %v1822_v18  ;;  %v1823_v30 = vmul.f32 0.020833334, %v1821_v22  ;;  %v5348_v14 = vld [vmem:[#allocation7 + $0x170] sm:$0xff]  }
 0xe0a   :  { %4920 = vmatpush3.bf16.msra.mxu0 %v5348_v14  ;;  %v5361_v14 = vld [vmem:[#allocation7 + $0x1e8] sm:$0xff]  }
 0xe0b   :  { %v1825_v31 = vsub.f32 %v1817_v15, %v1823_v30  ;;  %v1828_v20 = vsel %vm66_vm14, %v1824_v24, 0.0  ;;  %4921 = vmatprep.subr.bf16.mxu0 %v5618_v0  ;;  %v5349_v15 = vld [vmem:[#allocation7 + $0x178] sm:$0xff]  }
 0xe0c   :  { %v1830_v32 = vmul.f32 %v1828_v20, %v1828_v20 }
 0xe0d   :  { %v1829_v21 = vsel %vm66_vm14, %v1825_v31, 0.0 }
 0xe0e   :  { %1832 = vadd.xlane.f32.xlu0 %v1830_v32  ;;  %v1831_v33 = vmul.f32 %v1829_v21, %v1829_v21  ;;  %4922 = vmatpush3.bf16.msra.mxu0 %v5349_v15  ;;  %v5362_v15 = vld [vmem:[#allocation7 + $0x1b0] sm:$0xff]  }
 0xe0f   :  { %4947 = vmatprep.subr.bf16.mxu0 %v5618_v0 }
 0xe10   :  { %1834 = vadd.xlane.f32.xlu1 %v1831_v33  ;;  %v1955_v33 = vsub.s32 7, %v5738_v25 }
 0xe12   :  { %v1956_v34 = vrot.slane %v5518_v4, %v1955_v33 }
 0xe9b   :  { %v1833_v55 = vpop.xlane.xlu0 %1832 }
 0xe9c   :  { %v1836_v56 = vmul.f32 0.020833334, %v1833_v55  ;;  %v5353_v55 = vld [vmem:[#allocation7 + $0x1c8] sm:$0xff]  }
 0xe9d   :  { %v1835_v58 = vpop.xlane.xlu1 %1834 }
 0xe9e   :  { %v1838_v61 = vadd.f32 1e-05, %v1836_v56  ;;  %v1837_v62 = vmul.f32 0.020833334, %v1835_v58 }
 0xea0   :  { %5454 = vrsqrt.f32 %v1838_v61  ;;  %v1839_v63 = vadd.f32 1e-05, %v1837_v62 }
 0xea2   :  { %5456 = vrsqrt.f32 %v1839_v63 }
 0xeaa   :  { %v5455_v45 = vpop.eup %5454 }
 0xeab   :  { %v1842_v46 = vmul.f32 %v5455_v45, %v1828_v20 }
 0xeac   :  { %v5457_v53 = vpop.eup %5456 }
 0xead   :  { %v1843_v6 = vmul.f32 %v5457_v53, %v1829_v21  ;;  %v1848_v7 = vmul.f32 %v1847_v5, %v1842_v46 }
 0xeaf   :  { %v1849_v10 = vmul.f32 %v1847_v5, %v1843_v6  ;;  %v1854_v12 = vadd.f32 %v1853_v8, %v1848_v7  ;;  %v5354_v6 = vld [vmem:[#allocation7 + $0x190] sm:$0xff]  }
 0xeb0   :  { %v5355_v7 = vld [vmem:[#allocation7 + $0x1d0] sm:$0xff]  }
 0xeb1   :  { %v1855_v13 = vadd.f32 %v1853_v8, %v1849_v10  ;;  %v5356_v8 = vld [vmem:[#allocation7 + $0x198] sm:$0xff]  }
 0xeb2   :  { %v5357_v10 = vld [vmem:[#allocation7 + $0x1d8] sm:$0xff]  }
 0xeb3   :  { %v1856_v49 = vpack.c.bf16 %v1855_v13, %v1854_v12 }
 0xeb5   :  { %4904 = vmatmul.mubr.bf16.vlgmr.msra.gmra.mrb[40].mxu1 %v1856_v49  ;;  %v5360_v49 = vld [vmem:[#allocation7 + $0x1a8] sm:$0xff]  }
 0xeb6   :  { %4943 = vmatprep.mubr.msk.bf16.mxu1 %vm5619_vm0, %v5618_v0  ;;  %4928 = vmatpush3.bf16.msra.mxu1 %v5350_v51 }
 0xeb7   :  { %4929 = vmatprep.subr.bf16.mxu1 %v5618_v0 }
 0xeba   :  { %4930 = vmatpush3.bf16.msra.mxu1 %v5352_v54 }
 0xebb   :  { %4931 = vmatprep.subr.bf16.mxu1 %v5618_v0 }
 0xebe   :  { %4932 = vmatpush3.bf16.msra.mxu1 %v5354_v6 }
 0xebf   :  { %4933 = vmatprep.subr.bf16.mxu1 %v5618_v0 }
 0xec2   :  { %4934 = vmatpush3.bf16.msra.mxu1 %v5356_v8 }
 0xec3   :  { %4935 = vmatprep.subr.bf16.mxu1 %v5618_v0 }
 0xf88   :  { %v1943_v27 = vpop.f32.mrb[40].mxu1 }
 0xf89   :  { %v1944_v18 = vadd.f32 %v1943_v27, %v1860_v17  ;;  %v4905_v22 = vpop.f32.mrb[41].mxu1  ;;  %v5364_v27 = vld [vmem:[#allocation7 + $0x1b8] sm:$0xff]  }
 0xf8a   :  { %v1946_v24 = vpop.f32.mrb[42].mxu1 }
 0xf8b   :  { %v1947_v30 = vadd.f32 %v1946_v24, %v1860_v17  ;;  %v4906_v31 = vpop.f32.mrb[43].mxu1  ;;  %v1950_v20 = vmax.f32 %v1944_v18, 0.0  ;;  %v5363_v17 = vld [vmem:[#allocation7 + $0x1f0] sm:$0xff]   ;;  %v5365_v18 = vld [vmem:[#allocation7 + $0x1f8] sm:$0xff]  }
 0xf8d   :  { %v1951_v32 = vmax.f32 %v1947_v30, 0.0 }
 0xf8f   :  { %v1952_v21 = vpack.c.bf16 %v1951_v32, %v1950_v20 }
 0xf91   :  { %4924 = vmatmul.mubr.bf16.vlgmr.msra.gmra.mrb[32].mxu0 %v1952_v21  ;;  %v75_v21 = vld [vmem:[%s6502_s3 + $0x8] sm:$0x3] }
 0xf92   :  { %4963 = vmatprep.mubr.msk.bf16.mxu0 %vm5619_vm0, %v5618_v0  ;;  %4948 = vmatpush3.bf16.msra.mxu0 %v5351_v52  ;;  %v5366_v52 = vld [vmem:[#allocation7 + $0x200] sm:$0xff]  }
 0xf93   :  { %4949 = vmatprep.subr.bf16.mxu0 %v5618_v0 }
 0xf96   :  { %4950 = vmatpush3.bf16.msra.mxu0 %v5353_v55  ;;  %v5367_v55 = vld [vmem:[#allocation7 + $0x208] sm:$0xff]  }
 0xf97   :  { %4951 = vmatprep.subr.bf16.mxu0 %v5618_v0 }
 0xf9a   :  { %4952 = vmatpush3.bf16.msra.mxu0 %v5355_v7 }
 0xf9b   :  { %4953 = vmatprep.subr.bf16.mxu0 %v5618_v0 }
 0xf9e   :  { %4954 = vmatpush3.bf16.msra.mxu0 %v5357_v10 }
 0xf9f   :  { %4955 = vmatprep.subr.bf16.mxu0 %v5618_v0 }
0x1064   :  { %v2039_v35 = vpop.f32.mrb[32].mxu0 }
0x1065   :  { %v2040_v36 = vadd.f32 %v2039_v35, %v1956_v34  ;;  %v4925_v37 = vpop.f32.mrb[33].mxu0 }
0x1066   :  { %v2042_v40 = vpop.f32.mrb[34].mxu0 }
0x1067   :  { %v2043_v41 = vadd.f32 %v2042_v40, %v1956_v34  ;;  %v4926_v42 = vpop.f32.mrb[35].mxu0  ;;  %v2046_v43 = vadd.f32 %v2040_v36, %v1854_v12  ;;  %v5358_v12 = vld [vmem:[#allocation7 + $0x1a0] sm:$0xff]   ;;  %v2075_v34 = vrot.slane %v75_v21, %v5751_v29 }
0x1068   :  { %4936 = vmatpush3.bf16.msra.mxu1 %v5358_v12  ;;  %v2081_v42 = vrot.slane %v75_v21, %v5741_v26 }
0x1069   :  { %2048 = vadd.xlane.f32.xlu0 %v2046_v43  ;;  %v2047_v44 = vadd.f32 %v2043_v41, %v1855_v13  ;;  %v5359_v13 = vld [vmem:[#allocation7 + $0x1e0] sm:$0xff]   ;;  %4937 = vmatprep.subr.bf16.mxu1 %v5618_v0 }
0x106a   :  { %4956 = vmatpush3.bf16.msra.mxu0 %v5359_v13 }
0x106b   :  { %2050 = vadd.xlane.f32.xlu1 %v2047_v44  ;;  %4957 = vmatprep.subr.bf16.mxu0 %v5618_v0 }
0x106c   :  { %4938 = vmatpush3.bf16.msra.mxu1 %v5360_v49 }
0x106d   :  { %4939 = vmatprep.subr.bf16.mxu1 %v5618_v0 }
0x106e   :  { %4958 = vmatpush3.bf16.msra.mxu0 %v5361_v14 }
0x106f   :  { %4959 = vmatprep.subr.bf16.mxu0 %v5618_v0 }
0x1070   :  { %4940 = vmatpush3.bf16.msra.mxu1 %v5362_v15 }
0x1071   :  { %4941 = vmatprep.subr.bf16.mxu1 %v5618_v0 }
0x1072   :  { %4960 = vmatpush3.bf16.msra.mxu0 %v5363_v17 }
0x1073   :  { %4961 = vmatprep.subr.bf16.mxu0 %v5618_v0 }
0x1074   :  { %4942 = vmatpush3.bf16.msra.mxu1 %v5364_v27 }
0x1075   :  { %4967 = vmatprep.subr.bf16.mxu1 %v5618_v0 }
0x1076   :  { %4962 = vmatpush3.bf16.msra.mxu0 %v5365_v18 }
0x1077   :  { %4987 = vmatprep.subr.bf16.mxu0 %v5618_v0 }
0x10f6   :  { %v2049_v56 = vpop.xlane.xlu0 %2048 }
0x10f7   :  { %v2052_v58 = vmul.f32 0.020833334, %v2049_v56  ;;  %v5368_v56 = vld [vmem:[#allocation7 + $0x210] sm:$0xff]  }
0x10f8   :  { %v2051_v61 = vpop.xlane.xlu1 %2050 }
0x10f9   :  { %v2054_v62 = vsub.f32 %v2046_v43, %v2052_v58  ;;  %v2053_v63 = vmul.f32 0.020833334, %v2051_v61  ;;  %v5369_v58 = vld [vmem:[#allocation7 + $0x218] sm:$0xff]   ;;  %v5370_v61 = vld [vmem:[#allocation7 + $0x220] sm:$0xff]  }
0x10fb   :  { %v2055_v4 = vsub.f32 %v2047_v44, %v2053_v63  ;;  %v2056_v5 = vsel %vm66_vm14, %v2054_v62, 0.0  ;;  %v5371_v62 = vld [vmem:[#allocation7 + $0x228] sm:$0xff]   ;;  %v5372_v63 = vld [vmem:[#allocation7 + $0x230] sm:$0xff]  }
0x10fc   :  { %v2058_v45 = vmul.f32 %v2056_v5, %v2056_v5 }
0x10fd   :  { %v2057_v46 = vsel %vm66_vm14, %v2055_v4, 0.0  ;;  %v5373_v4 = vld [vmem:[#allocation7 + $0x238] sm:$0xff]  }
0x10fe   :  { %2060 = vadd.xlane.f32.xlu0 %v2058_v45  ;;  %v2059_v53 = vmul.f32 %v2057_v46, %v2057_v46 }
0x1100   :  { %2062 = vadd.xlane.f32.xlu1 %v2059_v53 }
0x118b   :  { %v2061_v22 = vpop.xlane.xlu0 %2060 }
0x118c   :  { %v2064_v24 = vmul.f32 0.020833334, %v2061_v22 }
0x118d   :  { %v2063_v30 = vpop.xlane.xlu1 %2062 }
0x118e   :  { %v2066_v31 = vadd.f32 1e-05, %v2064_v24  ;;  %v2065_v20 = vmul.f32 0.020833334, %v2063_v30 }
0x1190   :  { %5458 = vrsqrt.f32 %v2066_v31  ;;  %v2067_v32 = vadd.f32 1e-05, %v2065_v20 }
0x1192   :  { %5460 = vrsqrt.f32 %v2067_v32 }
0x119a   :  { %v5459_v35 = vpop.eup %5458 }
0x119b   :  { %v2070_v36 = vmul.f32 %v5459_v35, %v2056_v5  ;;  %v6170_v5 = vld [vmem:[%s6502_s3 + $0x10] sm:$0xff] }
0x119c   :  { %v5461_v37 = vpop.eup %5460  ;;  %v2286_v45 = vrot.slane %v6170_v5, %v5741_v26  ;;  %v2193_v10 = vrot.slane %v6170_v5, %v5751_v29  ;;  %v2379_v38 = vrot.slane %v6170_v5, %v366_v47 }
0x119d   :  { %v2071_v40 = vmul.f32 %v5461_v37, %v2057_v46  ;;  %v2076_v41 = vmul.f32 %v2075_v34, %v2070_v36 }
0x119f   :  { %v2077_v43 = vmul.f32 %v2075_v34, %v2071_v40  ;;  %v6147_v44 = vadd.f32 %v2081_v42, %v2076_v41 }
0x11a1   :  { %v6149_v51 = vadd.f32 %v2081_v42, %v2077_v43 }
0x11a3   :  { %v2189_v54 = vpack.c.bf16 %v6149_v51, %v6147_v44 }
0x11a5   :  { %4944 = vmatmul.mubr.bf16.vlgmr.msra.gmra.mrb[44].mxu1 %v2189_v54  ;;  %4964 = vmatmul.mubr.bf16.vlgmr.msra.gmra.mrb[36].mxu0 %v2189_v54 }
0x11a6   :  { %4968 = vmatpush3.bf16.msra.mxu1 %v5366_v52  ;;  %4983 = vmatprep.mubr.msk.bf16.mxu1 %vm5619_vm0, %v5618_v0 }
0x11a7   :  { %4969 = vmatprep.subr.bf16.mxu1 %v5618_v0  ;;  %4989 = vmatprep.mubr.msk.bf16.mxu0 %vm5619_vm0, %v5618_v0 }
0x11aa   :  { %4970 = vmatpush3.bf16.msra.mxu1 %v5367_v55 }
0x11ab   :  { %4971 = vmatprep.subr.bf16.mxu1 %v5618_v0 }
0x11ae   :  { %4972 = vmatpush3.bf16.msra.mxu1 %v5368_v56 }
0x11af   :  { %4973 = vmatprep.subr.bf16.mxu1 %v5618_v0 }
0x11b2   :  { %4974 = vmatpush3.bf16.msra.mxu1 %v5369_v58 }
0x11b3   :  { %4975 = vmatprep.subr.bf16.mxu1 %v5618_v0 }
0x11b6   :  { %4976 = vmatpush3.bf16.msra.mxu1 %v5370_v61 }
0x11b7   :  { %4977 = vmatprep.subr.bf16.mxu1 %v5618_v0 }
0x11ba   :  { %4978 = vmatpush3.bf16.msra.mxu1 %v5371_v62 }
0x11bb   :  { %4979 = vmatprep.subr.bf16.mxu1 %v5618_v0 }
0x11be   :  { %4980 = vmatpush3.bf16.msra.mxu1 %v5372_v63 }
0x11bf   :  { %4981 = vmatprep.subr.bf16.mxu1 %v5618_v0 }
0x11c2   :  { %4982 = vmatpush3.bf16.msra.mxu1 %v5373_v4 }
0x11c3   :  { %4993 = vmatprep.subr.bf16.mxu1 %v5618_v0 }
0x11c5   :  { %4984 = vmatmul.mubr.bf16.vlgmr.msra.gmra.mrb[48].mxu1 %v2189_v54 }
0x11c6   :  { %4995 = vmatprep.mubr.msk.bf16.mxu1 %vm5619_vm0, %v5618_v0 }
0x1278   :  { %v2276_v46 = vpop.f32.mrb[44].mxu1  ;;  %v2369_v53 = vpop.f32.mrb[36].mxu0 }
0x1279   :  { %v2370_v6 = vadd.f32 %v2369_v53, %v2286_v45  ;;  %v4945_v7 = vpop.f32.mrb[45].mxu1  ;;  %v4965_v8 = vpop.f32.mrb[37].mxu0  ;;  %v2277_v18 = vadd.f32 %v2276_v46, %v2193_v10 }
0x127a   :  { %v2279_v12 = vpop.f32.mrb[46].mxu1  ;;  %v2372_v13 = vpop.f32.mrb[38].mxu0 }
0x127b   :  { %v6176_v49 = vpack.c.bf16 %v2370_v6, %v2370_v6  ;;  %v2373_v14 = vadd.f32 %v2372_v13, %v2286_v45  ;;  %v4946_v15 = vpop.f32.mrb[47].mxu1  ;;  %v4966_v17 = vpop.f32.mrb[39].mxu0  ;;  %v2280_v22 = vadd.f32 %v2279_v12, %v2193_v10  ;;  %v6188_v24 = vpack.c.bf16 %v2277_v18, %v2277_v18 }
0x127d   :  { %v6178_v27 = vpack.c.bf16 %v2373_v14, %v2373_v14  ;;  %4988 = vmatpush3.bf16.xpose.msk.msra.mxu0 %vm5761_vm2, %v6176_v49  ;;  %v6190_v30 = vpack.c.bf16 %v2280_v22, %v2280_v22 }
0x127e   :  { %4999 = vmatprep.subr.bf16.mxu0 %v5618_v0 }
0x127f   :  { %4994 = vmatpush3.bf16.xpose.msk.msra.mxu1 %vm5761_vm2, %v6178_v27  ;;  %vm6529_vm2 = vcmp.lt.s32.totalorder %v5748_v28, 8  ;;  %v5400_v28 = vld [vmem:[%s6503_s4 + $0x10] sm:$0xff]  }
0x1280   :  { %5005 = vmatprep.subr.bf16.mxu1 %v5618_v0 }
0x1284   :  { %4990 = vmatmul.mubr.bf16.vlgmr.msra.gmra.mrb[40].mxu0 %v6188_v24 }
0x1285   :  { %5000 = vmatpush3.bf16.xpose.msk.msra.mxu0 %vm5793_vm6, %v6176_v49  ;;  %5001 = vmatprep.mubr.msk.bf16.mxu0 %vm5619_vm0, %v5618_v0 }
0x1286   :  { %4996 = vmatmul.mubr.bf16.vlgmr.msra.gmra.mrb[52].mxu1 %v6190_v30  ;;  %5011 = vmatprep.subr.bf16.mxu0 %v5618_v0 }
0x1287   :  { %5006 = vmatpush3.bf16.xpose.msk.msra.mxu1 %vm5793_vm6, %v6178_v27  ;;  %5007 = vmatprep.mubr.msk.bf16.mxu1 %vm5619_vm0, %v5618_v0 }
0x1288   :  { %5017 = vmatprep.subr.bf16.mxu1 %v5618_v0 }
0x128c   :  { %5002 = vmatmul.mubr.bf16.vlgmr.msra.gmra.mrb[44].mxu0 %v6188_v24 }
0x128d   :  { %5013 = vmatprep.mubr.msk.bf16.mxu0 %vm5619_vm0, %v5618_v0 }
0x128e   :  { %5008 = vmatmul.mubr.bf16.vlgmr.msra.gmra.mrb[56].mxu1 %v6190_v30 }
0x128f   :  { %5019 = vmatprep.mubr.msk.bf16.mxu1 %vm5619_vm0, %v5618_v0 }
0x1298   :  { %v2462_v50 = vpop.f32.mrb[48].mxu1 }
0x1299   :  { %v6215_v31 = vadd.f32 %v2462_v50, %v2379_v38  ;;  %v4985_v20 = vpop.f32.mrb[49].mxu1 }
0x129a   :  { %v2465_v32 = vpop.f32.mrb[50].mxu1 }
0x129b   :  { %v6217_v21 = vadd.f32 %v2465_v32, %v2379_v38  ;;  %v4986_v34 = vpop.f32.mrb[51].mxu1  ;;  %v2587_v35 = vsel %vm5784_vm5, %v6215_v31, 0.0 }
0x129c   :  { %v2589_v36 = vpack.c.bf16 %v2587_v35, %v2587_v35 }
0x129d   :  { %v2588_v37 = vsel %vm5784_vm5, %v6217_v21, 0.0  ;;  %vm6530_vm5 = vmmov %vm6529_vm2 }
0x129e   :  { %v2699_v40 = vsel %vm697_vm8, %v2589_v36, 0  ;;  %v2590_v47 = vpack.c.bf16 %v2588_v37, %v2588_v37 }
0x129f   :  { %5012 = vmatpush3.bf16.msra.mxu0 %v2699_v40 }
0x12a0   :  { %v2745_v41 = vsel %vm697_vm8, %v2590_v47, 0  ;;  %5023 = vmatprep.subr.bf16.mxu0 %v5618_v0 }
0x12a1   :  { %5018 = vmatpush3.bf16.msra.mxu1 %v2745_v41 }
0x12a2   :  { %5029 = vmatprep.subr.bf16.mxu1 %v5618_v0 }
0x1357   :  { %v2513_v42 = vpop.f32.mrb[40].mxu0 }
0x1358   :  { %v4991_v43 = vpop.f32.mrb[41].mxu0  ;;  %v2559_v10 = vsel %vm552_vm7, %v2513_v42, -inf }
0x1359   :  { %v2516_v52 = vpop.f32.mrb[42].mxu0  ;;  %v2553_v54 = vpop.f32.mrb[52].mxu1 }
0x135a   :  { %v4992_v55 = vpop.f32.mrb[43].mxu0  ;;  %v4997_v56 = vpop.f32.mrb[53].mxu1  ;;  %v2562_v12 = vsel %vm552_vm7, %v2553_v54, -inf }
0x135b   :  { %v2556_v58 = vpop.f32.mrb[54].mxu1 }
0x135c   :  { %v4998_v48 = vpop.f32.mrb[55].mxu1 }
0x135d   :  { %v2475_v48 = vsel %vm6529_vm2, %v6215_v31, 0.0 }
0x135f   :  { %v2625_v61 = vpop.f32.mrb[44].mxu0 }
0x1360   :  { %v5003_v62 = vpop.f32.mrb[45].mxu0  ;;  %v2671_v63 = vsel %vm552_vm7, %v2625_v61, -inf }
0x1361   :  { %v2665_v4 = vpop.f32.mrb[56].mxu1  ;;  %2672 = vmax.xlane.f32.xlu0 %v2671_v63  ;;  %v2628_v45 = vpop.f32.mrb[46].mxu0  ;;  %v2476_v62 = vsel %vm6530_vm5, %v6217_v21, 0.0 }
0x1362   :  { %v5004_v46 = vpop.f32.mrb[47].mxu0  ;;  %v5009_v53 = vpop.f32.mrb[57].mxu1  ;;  %v2674_v6 = vsel %vm552_vm7, %v2665_v4, -inf }
0x1363   :  { %2675 = vmax.xlane.f32.xlu1 %v2674_v6  ;;  %v2668_v7 = vpop.f32.mrb[58].mxu1  ;;  %v2478_v6 = vpack.c.bf16 %v2476_v62, %v2476_v62 }
0x1364   :  { %v5010_v8 = vpop.f32.mrb[59].mxu1 }
0x1365   :  { %2560 = vmax.xlane.f32.xlu0 %v2559_v10  ;;  %v2837_v10 = vsel %vm697_vm8, %v2478_v6, 0 }
0x1367   :  { %2563 = vmax.xlane.f32.xlu1 %v2562_v12 }
0x13ee   :  { %v2673_v13 = vpop.xlane.xlu0 %2672 }
0x13ef   :  { %v2677_v14 = vsub.f32 %v2625_v61, %v2673_v13 }
0x13f0   :  { %v2676_v15 = vpop.xlane.xlu1 %2675 }
0x13f1   :  { %v2679_v17 = vmul.f32 1.442695, %v2677_v14  ;;  %v2678_v18 = vsub.f32 %v2665_v4, %v2676_v15  ;;  %v2477_v4 = vpack.c.bf16 %v2475_v48, %v2475_v48 }
0x13f2   :  { %v2561_v22 = vpop.xlane.xlu0 %2560 }
0x13f3   :  { %5462 = vpow2.f32 %v2679_v17  ;;  %v2681_v38 = vmul.f32 1.442695, %v2678_v18  ;;  %v2565_v50 = vsub.f32 %v2513_v42, %v2561_v22  ;;  %v2791_v7 = vsel %vm697_vm8, %v2477_v4, 0 }
0x13f4   :  { %v2564_v20 = vpop.xlane.xlu1 %2563  ;;  %v2883_v22 = vsel %vm5869_vm11, %v6215_v31, 0.0 }
0x13f5   :  { %5464 = vpow2.f32 %v2681_v38  ;;  %v2567_v32 = vmul.f32 1.442695, %v2565_v50  ;;  %v2566_v34 = vsub.f32 %v2553_v54, %v2564_v20  ;;  %v2884_v38 = vsel %vm5869_vm11, %v6217_v21, 0.0 }
0x13f6   :  { %v2885_v50 = vpack.c.bf16 %v2883_v22, %v2883_v22  ;;  %v2886_v20 = vpack.c.bf16 %v2884_v38, %v2884_v38 }
0x13f7   :  { %5466 = vpow2.f32 %v2567_v32  ;;  %v2569_v35 = vmul.f32 1.442695, %v2566_v34 }
0x13f8   :  { %v2995_v32 = vsel %vm697_vm8, %v2885_v50, 0  ;;  %v3041_v23 = vsel %vm697_vm8, %v2886_v20, 0 }
0x13f9   :  { %5468 = vpow2.f32 %v2569_v35 }
0x13fd   :  { %v5463_v36 = vpop.eup %5462 }
0x13fe   :  { %v2683_v37 = vsel %vm552_vm7, %v5463_v36, 0.0 }
0x13ff   :  { %v5465_v40 = vpop.eup %5464  ;;  %2684 = vadd.xlane.f32.xlu0 %v2683_v37 }
0x1400   :  { %v2686_v47 = vsel %vm552_vm7, %v5465_v40, 0.0 }
0x1401   :  { %v5467_v41 = vpop.eup %5466  ;;  %2687 = vadd.xlane.f32.xlu1 %v2686_v47 }
0x1402   :  { %v2571_v43 = vsel %vm552_vm7, %v5467_v41, 0.0 }
0x1403   :  { %v5469_v52 = vpop.eup %5468  ;;  %2572 = vadd.xlane.f32.xlu0 %v2571_v43 }
0x1404   :  { %v2574_v42 = vsel %vm552_vm7, %v5469_v52, 0.0 }
0x1405   :  { %2575 = vadd.xlane.f32.xlu1 %v2574_v42 }
0x148c   :  { %v2685_v54 = vpop.xlane.xlu0 %2684 }
0x148d   :  { %5470 = vrcp.f32 %v2685_v54 }
0x148e   :  { %v2688_v55 = vpop.xlane.xlu1 %2687 }
0x148f   :  { %5472 = vrcp.f32 %v2688_v55 }
0x1490   :  { %v2573_v56 = vpop.xlane.xlu0 %2572 }
0x1491   :  { %5474 = vrcp.f32 %v2573_v56 }
0x1492   :  { %v2576_v58 = vpop.xlane.xlu1 %2575 }
0x1493   :  { %5476 = vrcp.f32 %v2576_v58 }
0x1497   :  { %v5471_v61 = vpop.eup %5470 }
0x1498   :  { %v2691_v63 = vmul.f32 %v5471_v61, %v5463_v36 }
0x1499   :  { %v5473_v45 = vpop.eup %5472 }
0x149a   :  { %v2692_v46 = vmul.f32 %v5473_v45, %v5465_v40  ;;  %v2693_v53 = vpack.c.bf16 %v2691_v63, %v2691_v63 }
0x149b   :  { %v5475_v12 = vpop.eup %5474 }
0x149c   :  { %5014 = vmatmul.mubr.msk.bf16.vlgmr.msra.gmra.mrb[48].mxu0 %vm552_vm7, %v2693_v53  ;;  %v2694_v8 = vpack.c.bf16 %v2692_v46, %v2692_v46  ;;  %v2579_v14 = vmul.f32 %v5475_v12, %v5467_v41 }
0x149d   :  { %5024 = vmatpush3.bf16.msra.mxu0 %v2791_v7  ;;  %5025 = vmatprep.mubr.msk.bf16.mxu0 %vm5619_vm0, %v5618_v0  ;;  %v5477_v13 = vpop.eup %5476 }
0x149e   :  { %5020 = vmatmul.mubr.msk.bf16.vlgmr.msra.gmra.mrb[60].mxu1 %vm552_vm7, %v2694_v8  ;;  %5035 = vmatprep.subr.bf16.mxu0 %v5618_v0  ;;  %v2580_v15 = vmul.f32 %v5477_v13, %v5469_v52  ;;  %v2581_v17 = vpack.c.bf16 %v2579_v14, %v2579_v14  ;;  %v3089_v13 = vsel %vm5920_vm15, %v6215_v31, 0.0  ;;  %v3090_v14 = vsel %vm5920_vm15, %v6217_v21, 0.0 }
0x149f   :  { %5030 = vmatpush3.bf16.msra.mxu1 %v2837_v10  ;;  %5031 = vmatprep.mubr.msk.bf16.mxu1 %vm5619_vm0, %v5618_v0 }
0x14a0   :  { %5041 = vmatprep.subr.bf16.mxu1 %v5618_v0  ;;  %v2582_v18 = vpack.c.bf16 %v2580_v15, %v2580_v15  ;;  %v3091_v15 = vpack.c.bf16 %v3089_v13, %v3089_v13 }
0x14a8   :  { %5026 = vmatmul.mubr.msk.bf16.vlgmr.msra.gmra.mrb[48].mxu0 %vm552_vm7, %v2581_v17  ;;  %v3092_v17 = vpack.c.bf16 %v3090_v14, %v3090_v14 }
0x14a9   :  { %5036 = vmatpush3.bf16.xpose.msk.msra.mxu0 %vm5878_vm12, %v6176_v49  ;;  %5037 = vmatprep.mubr.msk.bf16.mxu0 %vm5619_vm0, %v5618_v0 }
0x14aa   :  { %5032 = vmatmul.mubr.msk.bf16.vlgmr.msra.gmra.mrb[60].mxu1 %vm552_vm7, %v2582_v18  ;;  %5047 = vmatprep.subr.bf16.mxu0 %v5618_v0  ;;  %v3201_v18 = vsel %vm697_vm8, %v3091_v15, 0  ;;  %v3247_v11 = vsel %vm697_vm8, %v3092_v17, 0 }
0x14ab   :  { %5042 = vmatpush3.bf16.xpose.msk.msra.mxu1 %vm5878_vm12, %v6178_v27  ;;  %5043 = vmatprep.mubr.msk.bf16.mxu1 %vm5619_vm0, %v5618_v0 }
0x14ac   :  { %5053 = vmatprep.subr.bf16.mxu1 %v5618_v0 }
0x14b0   :  { %5038 = vmatmul.mubr.bf16.vlgmr.msra.gmra.mrb[52].mxu0 %v6188_v24 }
0x14b1   :  { %5048 = vmatpush3.bf16.msra.mxu0 %v2995_v32  ;;  %5049 = vmatprep.mubr.msk.bf16.mxu0 %vm5619_vm0, %v5618_v0 }
0x14b2   :  { %5044 = vmatmul.mubr.bf16.vlgmr.msra.gmra.mrb[64].mxu1 %v6190_v30  ;;  %5059 = vmatprep.subr.bf16.mxu0 %v5618_v0 }
0x14b3   :  { %5054 = vmatpush3.bf16.msra.mxu1 %v3041_v23  ;;  %5055 = vmatprep.mubr.msk.bf16.mxu1 %vm5619_vm0, %v5618_v0 }
0x14b4   :  { %5065 = vmatprep.subr.bf16.mxu1 %v5618_v0 }
0x1583   :  { %v2921_v19 = vpop.f32.mrb[52].mxu0 }
0x1584   :  { %v5039_v34 = vpop.f32.mrb[53].mxu0  ;;  %v2967_v35 = vsel %vm552_vm7, %v2921_v19, -inf }
0x1585   :  { %v2961_v36 = vpop.f32.mrb[64].mxu1  ;;  %2968 = vmax.xlane.f32.xlu0 %v2967_v35  ;;  %v2924_v37 = vpop.f32.mrb[54].mxu0 }
0x1586   :  { %v5040_v40 = vpop.f32.mrb[55].mxu0  ;;  %v5045_v47 = vpop.f32.mrb[65].mxu1  ;;  %v2970_v41 = vsel %vm552_vm7, %v2961_v36, -inf }
0x1587   :  { %2971 = vmax.xlane.f32.xlu1 %v2970_v41  ;;  %v2964_v43 = vpop.f32.mrb[66].mxu1 }
0x1588   :  { %v5046_v52 = vpop.f32.mrb[67].mxu1 }
0x1612   :  { %v2969_v42 = vpop.xlane.xlu0 %2968 }
0x1613   :  { %v2973_v54 = vsub.f32 %v2921_v19, %v2969_v42 }
0x1614   :  { %v2972_v55 = vpop.xlane.xlu1 %2971 }
0x1615   :  { %v2975_v56 = vmul.f32 1.442695, %v2973_v54  ;;  %v2974_v58 = vsub.f32 %v2961_v36, %v2972_v55 }
0x1617   :  { %5478 = vpow2.f32 %v2975_v56  ;;  %v2977_v48 = vmul.f32 1.442695, %v2974_v58 }
0x1619   :  { %5480 = vpow2.f32 %v2977_v48 }
0x1621   :  { %v5479_v61 = vpop.eup %5478 }
0x1622   :  { %v2979_v62 = vsel %vm552_vm7, %v5479_v61, 0.0 }
0x1623   :  { %v5481_v63 = vpop.eup %5480  ;;  %2980 = vadd.xlane.f32.xlu0 %v2979_v62 }
0x1624   :  { %v2982_v4 = vsel %vm552_vm7, %v5481_v63, 0.0 }
0x1625   :  { %2983 = vadd.xlane.f32.xlu1 %v2982_v4 }
0x16b0   :  { %v2981_v45 = vpop.xlane.xlu0 %2980 }
0x16b1   :  { %5482 = vrcp.f32 %v2981_v45 }
0x16b2   :  { %v2984_v46 = vpop.xlane.xlu1 %2983 }
0x16b3   :  { %5484 = vrcp.f32 %v2984_v46  ;;  %v3295_v46 = vsel %vm5967_vm10, %v6215_v31, 0.0 }
0x16bb   :  { %v5483_v53 = vpop.eup %5482 }
0x16bc   :  { %v2987_v6 = vmul.f32 %v5483_v53, %v5479_v61  ;;  %v3296_v53 = vsel %vm5967_vm10, %v6217_v21, 0.0 }
0x16bd   :  { %v5485_v7 = vpop.eup %5484 }
0x16be   :  { %v2988_v8 = vmul.f32 %v5485_v7, %v5481_v63  ;;  %v2989_v10 = vpack.c.bf16 %v2987_v6, %v2987_v6  ;;  %v3297_v6 = vpack.c.bf16 %v3295_v46, %v3295_v46  ;;  %v3298_v7 = vpack.c.bf16 %v3296_v53, %v3296_v53 }
0x16c0   :  { %5050 = vmatmul.mubr.msk.bf16.vlgmr.msra.gmra.mrb[48].mxu0 %vm552_vm7, %v2989_v10  ;;  %v2990_v12 = vpack.c.bf16 %v2988_v8, %v2988_v8  ;;  %v3407_v8 = vsel %vm697_vm8, %v3297_v6, 0  ;;  %v3453_v3 = vsel %vm697_vm8, %v3298_v7, 0 }
0x16c1   :  { %5060 = vmatpush3.bf16.xpose.msk.msra.mxu0 %vm5927_vm3, %v6176_v49  ;;  %5061 = vmatprep.mubr.msk.bf16.mxu0 %vm5619_vm0, %v5618_v0 }
0x16c2   :  { %5056 = vmatmul.mubr.msk.bf16.vlgmr.msra.gmra.mrb[60].mxu1 %vm552_vm7, %v2990_v12  ;;  %5071 = vmatprep.subr.bf16.mxu0 %v5618_v0 }
0x16c3   :  { %5066 = vmatpush3.bf16.xpose.msk.msra.mxu1 %vm5927_vm3, %v6178_v27  ;;  %5067 = vmatprep.mubr.msk.bf16.mxu1 %vm5619_vm0, %v5618_v0 }
0x16c4   :  { %5077 = vmatprep.subr.bf16.mxu1 %v5618_v0 }
0x16c8   :  { %5062 = vmatmul.mubr.bf16.vlgmr.msra.gmra.mrb[56].mxu0 %v6188_v24 }
0x16c9   :  { %5072 = vmatpush3.bf16.msra.mxu0 %v3201_v18  ;;  %5073 = vmatprep.mubr.msk.bf16.mxu0 %vm5619_vm0, %v5618_v0 }
0x16ca   :  { %5068 = vmatmul.mubr.bf16.vlgmr.msra.gmra.mrb[68].mxu1 %v6190_v30  ;;  %5083 = vmatprep.subr.bf16.mxu0 %v5618_v0 }
0x16cb   :  { %5078 = vmatpush3.bf16.msra.mxu1 %v3247_v11  ;;  %5079 = vmatprep.mubr.msk.bf16.mxu1 %vm5619_vm0, %v5618_v0 }
0x16cc   :  { %5089 = vmatprep.subr.bf16.mxu1 %v5618_v0 }
0x179b   :  { %v3127_v9 = vpop.f32.mrb[56].mxu0 }
0x179c   :  { %v5063_v22 = vpop.f32.mrb[57].mxu0  ;;  %v3173_v38 = vsel %vm552_vm7, %v3127_v9, -inf }
0x179d   :  { %v3167_v50 = vpop.f32.mrb[68].mxu1  ;;  %3174 = vmax.xlane.f32.xlu0 %v3173_v38  ;;  %v3130_v20 = vpop.f32.mrb[58].mxu0 }
0x179e   :  { %v5064_v32 = vpop.f32.mrb[59].mxu0  ;;  %v5069_v23 = vpop.f32.mrb[69].mxu1  ;;  %v3176_v19 = vsel %vm552_vm7, %v3167_v50, -inf }
0x179f   :  { %3177 = vmax.xlane.f32.xlu1 %v3176_v19  ;;  %v3170_v34 = vpop.f32.mrb[70].mxu1 }
0x17a0   :  { %v5070_v35 = vpop.f32.mrb[71].mxu1 }
0x182a   :  { %v3175_v36 = vpop.xlane.xlu0 %3174 }
0x182b   :  { %v3179_v37 = vsub.f32 %v3127_v9, %v3175_v36 }
0x182c   :  { %v3178_v40 = vpop.xlane.xlu1 %3177 }
0x182d   :  { %v3181_v47 = vmul.f32 1.442695, %v3179_v37  ;;  %v3180_v41 = vsub.f32 %v3167_v50, %v3178_v40 }
0x182f   :  { %5486 = vpow2.f32 %v3181_v47  ;;  %v3183_v43 = vmul.f32 1.442695, %v3180_v41 }
0x1831   :  { %5488 = vpow2.f32 %v3183_v43 }
0x1839   :  { %v5487_v52 = vpop.eup %5486 }
0x183a   :  { %v3185_v42 = vsel %vm552_vm7, %v5487_v52, 0.0 }
0x183b   :  { %v5489_v54 = vpop.eup %5488  ;;  %3186 = vadd.xlane.f32.xlu0 %v3185_v42 }
0x183c   :  { %v3188_v55 = vsel %vm552_vm7, %v5489_v54, 0.0 }
0x183d   :  { %3189 = vadd.xlane.f32.xlu1 %v3188_v55  ;;  %v3501_v55 = vsel %vm6016_vm9, %v6215_v31, 0.0 }
0x18c8   :  { %v3187_v56 = vpop.xlane.xlu0 %3186 }
0x18c9   :  { %5490 = vrcp.f32 %v3187_v56  ;;  %v3503_v56 = vpack.c.bf16 %v3501_v55, %v3501_v55  ;;  %v3707_v55 = vrot.slane %v6170_v5, %v1725_v60 }
0x18ca   :  { %v3190_v58 = vpop.xlane.xlu1 %3189 }
0x18cb   :  { %5492 = vrcp.f32 %v3190_v58  ;;  %v3613_v31 = vsel %vm697_vm8, %v3503_v56, 0 }
0x18d3   :  { %v5491_v48 = vpop.eup %5490 }
0x18d4   :  { %v3193_v61 = vmul.f32 %v5491_v48, %v5487_v52 }
0x18d5   :  { %v5493_v62 = vpop.eup %5492 }
0x18d6   :  { %v3194_v63 = vmul.f32 %v5493_v62, %v5489_v54  ;;  %v3195_v4 = vpack.c.bf16 %v3193_v61, %v3193_v61 }
0x18d8   :  { %5074 = vmatmul.mubr.msk.bf16.vlgmr.msra.gmra.mrb[48].mxu0 %vm552_vm7, %v3195_v4  ;;  %v3196_v45 = vpack.c.bf16 %v3194_v63, %v3194_v63 }
0x18d9   :  { %5084 = vmatpush3.bf16.xpose.msk.msra.mxu0 %vm5974_vm13, %v6176_v49  ;;  %5085 = vmatprep.mubr.msk.bf16.mxu0 %vm5619_vm0, %v5618_v0 }
0x18da   :  { %5080 = vmatmul.mubr.msk.bf16.vlgmr.msra.gmra.mrb[60].mxu1 %vm552_vm7, %v3196_v45  ;;  %5095 = vmatprep.subr.bf16.mxu0 %v5618_v0 }
0x18db   :  { %5090 = vmatpush3.bf16.xpose.msk.msra.mxu1 %vm5974_vm13, %v6178_v27  ;;  %5091 = vmatprep.mubr.msk.bf16.mxu1 %vm5619_vm0, %v5618_v0 }
0x18dc   :  { %5101 = vmatprep.subr.bf16.mxu1 %v5618_v0 }
0x18e0   :  { %5086 = vmatmul.mubr.bf16.vlgmr.msra.gmra.mrb[60].mxu0 %v6188_v24 }
0x18e1   :  { %5096 = vmatpush3.bf16.msra.mxu0 %v3407_v8  ;;  %5097 = vmatprep.mubr.msk.bf16.mxu0 %vm5619_vm0, %v5618_v0 }
0x18e2   :  { %5092 = vmatmul.mubr.bf16.vlgmr.msra.gmra.mrb[72].mxu1 %v6190_v30  ;;  %5107 = vmatprep.subr.bf16.mxu0 %v5618_v0 }
0x18e3   :  { %5102 = vmatpush3.bf16.msra.mxu1 %v3453_v3  ;;  %5103 = vmatprep.mubr.msk.bf16.mxu1 %vm5619_vm0, %v5618_v0 }
0x18e4   :  { %5113 = vmatprep.subr.bf16.mxu1 %v5618_v0 }
0x19b3   :  { %v3333_v1 = vpop.f32.mrb[60].mxu0 }
0x19b4   :  { %v5087_v10 = vpop.f32.mrb[61].mxu0  ;;  %v3379_v12 = vsel %vm552_vm7, %v3333_v1, -inf }
0x19b5   :  { %v3373_v13 = vpop.f32.mrb[72].mxu1  ;;  %3380 = vmax.xlane.f32.xlu0 %v3379_v12  ;;  %v3336_v14 = vpop.f32.mrb[62].mxu0 }
0x19b6   :  { %v5088_v15 = vpop.f32.mrb[63].mxu0  ;;  %v5093_v17 = vpop.f32.mrb[73].mxu1  ;;  %v3382_v18 = vsel %vm552_vm7, %v3373_v13, -inf }
0x19b7   :  { %3383 = vmax.xlane.f32.xlu1 %v3382_v18  ;;  %v3376_v11 = vpop.f32.mrb[74].mxu1 }
0x19b8   :  { %v5094_v9 = vpop.f32.mrb[75].mxu1  ;;  %v5374_v11 = vld [vmem:[#allocation7 + $0x240] sm:$0xff]  }
0x1a42   :  { %v3381_v22 = vpop.xlane.xlu0 %3380 }
0x1a43   :  { %v3385_v38 = vsub.f32 %v3333_v1, %v3381_v22 }
0x1a44   :  { %v3384_v50 = vpop.xlane.xlu1 %3383 }
0x1a45   :  { %v3387_v20 = vmul.f32 1.442695, %v3385_v38  ;;  %v3386_v32 = vsub.f32 %v3373_v13, %v3384_v50  ;;  %v5375_v50 = vld [vmem:[#allocation7 + $0x248] sm:$0xff]  }
0x1a47   :  { %5494 = vpow2.f32 %v3387_v20  ;;  %v3389_v23 = vmul.f32 1.442695, %v3386_v32  ;;  %v5376_v20 = vld [vmem:[#allocation7 + $0x250] sm:$0xff]   ;;  %v5377_v32 = vld [vmem:[#allocation7 + $0x258] sm:$0xff]  }
0x1a49   :  { %5496 = vpow2.f32 %v3389_v23  ;;  %v5378_v23 = vld [vmem:[#allocation7 + $0x260] sm:$0xff]  }
0x1a51   :  { %v5495_v19 = vpop.eup %5494 }
0x1a52   :  { %v3391_v34 = vsel %vm552_vm7, %v5495_v19, 0.0 }
0x1a53   :  { %v5497_v35 = vpop.eup %5496  ;;  %3392 = vadd.xlane.f32.xlu0 %v3391_v34  ;;  %v5380_v34 = vld [vmem:[#allocation7 + $0x270] sm:$0xff]  }
0x1a54   :  { %v3394_v36 = vsel %vm552_vm7, %v5497_v35, 0.0 }
0x1a55   :  { %3395 = vadd.xlane.f32.xlu1 %v3394_v36 }
0x1ae0   :  { %v3393_v37 = vpop.xlane.xlu0 %3392 }
0x1ae1   :  { %5498 = vrcp.f32 %v3393_v37 }
0x1ae2   :  { %v3396_v40 = vpop.xlane.xlu1 %3395 }
0x1ae3   :  { %5500 = vrcp.f32 %v3396_v40 }
0x1aeb   :  { %v5499_v47 = vpop.eup %5498 }
0x1aec   :  { %v3399_v41 = vmul.f32 %v5499_v47, %v5495_v19  ;;  %v5379_v19 = vld [vmem:[#allocation7 + $0x268] sm:$0xff]  }
0x1aed   :  { %v5501_v43 = vpop.eup %5500 }
0x1aee   :  { %v3400_v52 = vmul.f32 %v5501_v43, %v5497_v35  ;;  %v3401_v42 = vpack.c.bf16 %v3399_v41, %v3399_v41  ;;  %v5381_v35 = vld [vmem:[#allocation7 + $0x278] sm:$0xff]  }
0x1af0   :  { %5098 = vmatmul.mubr.msk.bf16.vlgmr.msra.gmra.mrb[48].mxu0 %vm552_vm7, %v3401_v42  ;;  %v3402_v54 = vpack.c.bf16 %v3400_v52, %v3400_v52 }
0x1af1   :  { %5108 = vmatpush3.bf16.xpose.msk.msra.mxu0 %vm6023_vm1, %v6176_v49  ;;  %5109 = vmatprep.mubr.msk.bf16.mxu0 %vm5619_vm0, %v5618_v0  ;;  %v3502_v49 = vsel %vm6016_vm9, %v6217_v21, 0.0 }
0x1af2   :  { %5104 = vmatmul.mubr.msk.bf16.vlgmr.msra.gmra.mrb[60].mxu1 %vm552_vm7, %v3402_v54  ;;  %5119 = vmatprep.subr.bf16.mxu0 %v5618_v0  ;;  %v3504_v58 = vpack.c.bf16 %v3502_v49, %v3502_v49 }
0x1af3   :  { %5114 = vmatpush3.bf16.xpose.msk.msra.mxu1 %vm6023_vm1, %v6178_v27  ;;  %5115 = vmatprep.mubr.msk.bf16.mxu1 %vm5619_vm0, %v5618_v0 }
0x1af4   :  { %5125 = vmatprep.subr.bf16.mxu1 %v5618_v0  ;;  %v3659_v59 = vsel %vm697_vm8, %v3504_v58, 0 }
0x1af8   :  { %5110 = vmatmul.mubr.bf16.vlgmr.msra.gmra.mrb[64].mxu0 %v6188_v24 }
0x1af9   :  { %5120 = vmatpush3.bf16.msra.mxu0 %v3613_v31  ;;  %5121 = vmatprep.mubr.msk.bf16.mxu0 %vm5619_vm0, %v5618_v0 }
0x1afa   :  { %5116 = vmatmul.mubr.bf16.vlgmr.msra.gmra.mrb[76].mxu1 %v6190_v30  ;;  %5131 = vmatprep.subr.bf16.mxu0 %v5618_v0 }
0x1afb   :  { %5126 = vmatpush3.bf16.msra.mxu1 %v3659_v59  ;;  %5127 = vmatprep.mubr.msk.bf16.mxu1 %vm5619_vm0, %v5618_v0 }
0x1afc   :  { %5151 = vmatprep.subr.bf16.mxu1 %v5618_v0 }
0x1bcb   :  { %v3539_v57 = vpop.f32.mrb[64].mxu0 }
0x1bcc   :  { %v5111_v27 = vpop.f32.mrb[65].mxu0  ;;  %v3585_v24 = vsel %vm552_vm7, %v3539_v57, -inf }
0x1bcd   :  { %v3579_v21 = vpop.f32.mrb[76].mxu1  ;;  %3586 = vmax.xlane.f32.xlu0 %v3585_v24  ;;  %v3542_v48 = vpop.f32.mrb[66].mxu0 }
0x1bce   :  { %v5112_v61 = vpop.f32.mrb[67].mxu0  ;;  %v5117_v62 = vpop.f32.mrb[77].mxu1  ;;  %v3588_v30 = vsel %vm552_vm7, %v3579_v21, -inf  ;;  %v5383_v48 = vld [vmem:[#allocation7 + $0x288] sm:$0xff]  }
0x1bcf   :  { %3589 = vmax.xlane.f32.xlu1 %v3588_v30  ;;  %v3582_v63 = vpop.f32.mrb[78].mxu1 }
0x1bd0   :  { %v5118_v4 = vpop.f32.mrb[79].mxu1 }
0x1c5a   :  { %v3587_v45 = vpop.xlane.xlu0 %3586 }
0x1c5b   :  { %v3591_v46 = vsub.f32 %v3539_v57, %v3587_v45 }
0x1c5c   :  { %v3590_v53 = vpop.xlane.xlu1 %3589 }
0x1c5d   :  { %v3593_v6 = vmul.f32 1.442695, %v3591_v46  ;;  %v3592_v7 = vsub.f32 %v3579_v21, %v3590_v53  ;;  %v5382_v21 = vld [vmem:[#allocation7 + $0x280] sm:$0xff]   ;;  %v5384_v53 = vld [vmem:[#allocation7 + $0x290] sm:$0xff]  }
0x1c5f   :  { %5502 = vpow2.f32 %v3593_v6  ;;  %v3595_v8 = vmul.f32 1.442695, %v3592_v7  ;;  %v5385_v6 = vld [vmem:[#allocation7 + $0x298] sm:$0xff]   ;;  %v5386_v7 = vld [vmem:[#allocation7 + $0x2a0] sm:$0xff]  }
0x1c61   :  { %5504 = vpow2.f32 %v3595_v8  ;;  %v5387_v8 = vld [vmem:[#allocation7 + $0x2a8] sm:$0xff]  }
0x1c69   :  { %v5503_v3 = vpop.eup %5502 }
0x1c6a   :  { %v3597_v1 = vsel %vm552_vm7, %v5503_v3, 0.0 }
0x1c6b   :  { %v5505_v10 = vpop.eup %5504  ;;  %3598 = vadd.xlane.f32.xlu0 %v3597_v1  ;;  %v5389_v1 = vld [vmem:[#allocation7 + $0x2b8] sm:$0xff]  }
0x1c6c   :  { %v3600_v12 = vsel %vm552_vm7, %v5505_v10, 0.0 }
0x1c6d   :  { %3601 = vadd.xlane.f32.xlu1 %v3600_v12  ;;  %v5391_v12 = vld [vmem:[#allocation7 + $0x2c8] sm:$0xff]  }
0x1cf8   :  { %v3599_v13 = vpop.xlane.xlu0 %3598 }
0x1cf9   :  { %5506 = vrcp.f32 %v3599_v13  ;;  %v5392_v13 = vld [vmem:[#allocation7 + $0x2d0] sm:$0xff]  }
0x1cfa   :  { %v3602_v14 = vpop.xlane.xlu1 %3601 }
0x1cfb   :  { %5508 = vrcp.f32 %v3602_v14  ;;  %v5393_v14 = vld [vmem:[#allocation7 + $0x2d8] sm:$0xff]  }
0x1d03   :  { %v5507_v15 = vpop.eup %5506 }
0x1d04   :  { %v3605_v17 = vmul.f32 %v5507_v15, %v5503_v3  ;;  %v5388_v3 = vld [vmem:[#allocation7 + $0x2b0] sm:$0xff]   ;;  %v5394_v15 = vld [vmem:[#allocation7 + $0x2e0] sm:$0xff]  }
0x1d05   :  { %v5509_v18 = vpop.eup %5508 }
0x1d06   :  { %v3606_v9 = vmul.f32 %v5509_v18, %v5505_v10  ;;  %v3607_v22 = vpack.c.bf16 %v3605_v17, %v3605_v17  ;;  %v5390_v10 = vld [vmem:[#allocation7 + $0x2c0] sm:$0xff]   ;;  %v5395_v17 = vld [vmem:[#allocation7 + $0x2e8] sm:$0xff]  }
0x1d08   :  { %5122 = vmatmul.mubr.msk.bf16.vlgmr.msra.gmra.mrb[48].mxu0 %vm552_vm7, %v3607_v22  ;;  %v3608_v38 = vpack.c.bf16 %v3606_v9, %v3606_v9 }
0x1d09   :  { %5132 = vmatpush3.bf16.msra.mxu0 %v5374_v11  ;;  %5147 = vmatprep.mubr.msk.bf16.mxu0 %vm5619_vm0, %v5618_v0 }
0x1d0a   :  { %5128 = vmatmul.mubr.msk.bf16.vlgmr.msra.gmra.mrb[60].mxu1 %vm552_vm7, %v3608_v38  ;;  %5133 = vmatprep.subr.bf16.mxu0 %v5618_v0 }
0x1d0b   :  { %5167 = vmatprep.mubr.msk.bf16.mxu1 %vm5619_vm0, %v5618_v0  ;;  %5152 = vmatpush3.bf16.msra.mxu1 %v5382_v21 }
0x1d0c   :  { %5153 = vmatprep.subr.bf16.mxu1 %v5618_v0 }
0x1d0d   :  { %5134 = vmatpush3.bf16.msra.mxu0 %v5375_v50 }
0x1d0e   :  { %5135 = vmatprep.subr.bf16.mxu0 %v5618_v0 }
0x1d0f   :  { %5154 = vmatpush3.bf16.msra.mxu1 %v5383_v48 }
0x1d10   :  { %5155 = vmatprep.subr.bf16.mxu1 %v5618_v0 }
0x1d11   :  { %5136 = vmatpush3.bf16.msra.mxu0 %v5376_v20  ;;  %v3826_v20 = vrot.slane %v6170_v5, %v1846_v2  ;;  %v5397_v2 = vld [vmem:[#allocation7 + $0x2f8] sm:$0xff]  }
0x1d12   :  { %5137 = vmatprep.subr.bf16.mxu0 %v5618_v0 }
0x1d13   :  { %5156 = vmatpush3.bf16.msra.mxu1 %v5384_v53 }
0x1d14   :  { %5157 = vmatprep.subr.bf16.mxu1 %v5618_v0 }
0x1d15   :  { %5138 = vmatpush3.bf16.msra.mxu0 %v5377_v32 }
0x1d16   :  { %5139 = vmatprep.subr.bf16.mxu0 %v5618_v0 }
0x1d17   :  { %5158 = vmatpush3.bf16.msra.mxu1 %v5385_v6  ;;  %v5398_v6 = vld [vmem:[%s6503_s4] sm:$0xff]  }
0x1d18   :  { %5159 = vmatprep.subr.bf16.mxu1 %v5618_v0 }
0x1d19   :  { %5140 = vmatpush3.bf16.msra.mxu0 %v5378_v23 }
0x1d1a   :  { %5141 = vmatprep.subr.bf16.mxu0 %v5618_v0 }
0x1d1b   :  { %5160 = vmatpush3.bf16.msra.mxu1 %v5386_v7  ;;  %v5399_v7 = vld [vmem:[%s6503_s4 + $0x8] sm:$0xff]  }
0x1d1c   :  { %5161 = vmatprep.subr.bf16.mxu1 %v5618_v0 }
0x1d1d   :  { %5142 = vmatpush3.bf16.msra.mxu0 %v5379_v19 }
0x1d1e   :  { %5143 = vmatprep.subr.bf16.mxu0 %v5618_v0 }
0x1d1f   :  { %5162 = vmatpush3.bf16.msra.mxu1 %v5387_v8  ;;  %v5401_v8 = vld [vmem:[%s6503_s4 + $0x18] sm:$0xff]  }
0x1d20   :  { %5163 = vmatprep.subr.bf16.mxu1 %v5618_v0 }
0x1d21   :  { %5144 = vmatpush3.bf16.msra.mxu0 %v5380_v34 }
0x1d22   :  { %5145 = vmatprep.subr.bf16.mxu0 %v5618_v0 }
0x1d23   :  { %5164 = vmatpush3.bf16.msra.mxu1 %v5388_v3  ;;  %v5402_v3 = vld [vmem:[%s6503_s4 + $0x20] sm:$0xff]  }
0x1d24   :  { %5165 = vmatprep.subr.bf16.mxu1 %v5618_v0 }
0x1d25   :  { %5146 = vmatpush3.bf16.msra.mxu0 %v5381_v35 }
0x1d26   :  { %5171 = vmatprep.subr.bf16.mxu0 %v5618_v0 }
0x1d27   :  { %5166 = vmatpush3.bf16.msra.mxu1 %v5389_v1  ;;  %v5403_v1 = vld [vmem:[%s6503_s4 + $0x28] sm:$0xff]  }
0x1d28   :  { %5191 = vmatprep.subr.bf16.mxu1 %v5618_v0 }
0x1ddb   :  { %v3649_v36 = vpop.f32.mrb[48].mxu0 }
0x1ddc   :  { %v5123_v37 = vpop.f32.mrb[49].mxu0 }
0x1ddd   :  { %v3652_v40 = vpop.f32.mrb[50].mxu0  ;;  %v3695_v47 = vpop.f32.mrb[60].mxu1 }
0x1dde   :  { %v3703_v41 = vpack.c.bf16 %v3695_v47, %v3649_v36  ;;  %v5124_v43 = vpop.f32.mrb[51].mxu0  ;;  %v5129_v52 = vpop.f32.mrb[61].mxu1  ;;  %v3832_v36 = vrot.slane %v6170_v5, %v1852_v39 }
0x1ddf   :  { %v3698_v42 = vpop.f32.mrb[62].mxu1  ;;  %v5396_v43 = vld [vmem:[#allocation7 + $0x2f0] sm:$0xff]   ;;  %v3839_v52 = vrot.slane %v6170_v5, %v1859_v16 }
0x1de0   :  { %v5130_v54 = vpop.f32.mrb[63].mxu1  ;;  %5148 = vmatmul.mubr.bf16.vlgmr.msra.gmra.mrb[68].mxu0 %v3703_v41 }
0x1de1   :  { %5187 = vmatprep.mubr.msk.bf16.mxu0 %vm5619_vm0, %v5618_v0  ;;  %5172 = vmatpush3.bf16.msra.mxu0 %v5390_v10  ;;  %v5404_v10 = vld [vmem:[%s6503_s4 + $0x30] sm:$0xff]  }
0x1de2   :  { %5173 = vmatprep.subr.bf16.mxu0 %v5618_v0 }
0x1de5   :  { %5174 = vmatpush3.bf16.msra.mxu0 %v5391_v12  ;;  %v5405_v12 = vld [vmem:[%s6503_s4 + $0x38] sm:$0xff]  }
0x1de6   :  { %5175 = vmatprep.subr.bf16.mxu0 %v5618_v0 }
0x1de9   :  { %5176 = vmatpush3.bf16.msra.mxu0 %v5392_v13 }
0x1dea   :  { %5177 = vmatprep.subr.bf16.mxu0 %v5618_v0 }
0x1ded   :  { %5178 = vmatpush3.bf16.msra.mxu0 %v5393_v14 }
0x1dee   :  { %5179 = vmatprep.subr.bf16.mxu0 %v5618_v0 }
0x1df1   :  { %5180 = vmatpush3.bf16.msra.mxu0 %v5394_v15 }
0x1df2   :  { %5181 = vmatprep.subr.bf16.mxu0 %v5618_v0 }
0x1df5   :  { %5182 = vmatpush3.bf16.msra.mxu0 %v5395_v17 }
0x1df6   :  { %5183 = vmatprep.subr.bf16.mxu0 %v5618_v0 }
0x1df9   :  { %5184 = vmatpush3.bf16.msra.mxu0 %v5396_v43 }
0x1dfa   :  { %5185 = vmatprep.subr.bf16.mxu0 %v5618_v0 }
0x1dfd   :  { %5186 = vmatpush3.bf16.msra.mxu0 %v5397_v2 }
0x1eb3   :  { %v3790_v49 = vpop.f32.mrb[68].mxu0 }
0x1eb4   :  { %v3791_v56 = vadd.f32 %v3790_v49, %v3707_v55  ;;  %v5149_v58 = vpop.f32.mrb[69].mxu0 }
0x1eb5   :  { %v3793_v31 = vpop.f32.mrb[70].mxu0 }
0x1eb6   :  { %v3794_v59 = vadd.f32 %v3793_v31, %v3707_v55  ;;  %v5150_v57 = vpop.f32.mrb[71].mxu0  ;;  %v3797_v27 = vadd.f32 %v3791_v56, %v6147_v44 }
0x1eb7   :  { %v3935_v57 = vrot.slane %v6170_v5, %v1955_v33 }
0x1eb8   :  { %3799 = vadd.xlane.f32.xlu0 %v3797_v27  ;;  %v3798_v24 = vadd.f32 %v3794_v59, %v6149_v51 }
0x1eba   :  { %3801 = vadd.xlane.f32.xlu1 %v3798_v24 }
0x1f45   :  { %v3800_v60 = vpop.xlane.xlu0 %3799 }
0x1f46   :  { %v3803_v61 = vmul.f32 0.020833334, %v3800_v60 }
0x1f47   :  { %v3802_v62 = vpop.xlane.xlu1 %3801 }
0x1f48   :  { %v3805_v30 = vsub.f32 %v3797_v27, %v3803_v61  ;;  %v3804_v63 = vmul.f32 0.020833334, %v3802_v62 }
0x1f4a   :  { %v3806_v4 = vsub.f32 %v3798_v24, %v3804_v63  ;;  %v3807_v44 = vsel %vm66_vm14, %v3805_v30, 0.0 }
0x1f4b   :  { %v3809_v45 = vmul.f32 %v3807_v44, %v3807_v44 }
0x1f4c   :  { %v3808_v51 = vsel %vm66_vm14, %v3806_v4, 0.0 }
0x1f4d   :  { %3811 = vadd.xlane.f32.xlu0 %v3809_v45  ;;  %v3810_v46 = vmul.f32 %v3808_v51, %v3808_v51 }
0x1f4f   :  { %3813 = vadd.xlane.f32.xlu1 %v3810_v46 }
0x1fda   :  { %v3812_v18 = vpop.xlane.xlu0 %3811 }
0x1fdb   :  { %v3815_v11 = vmul.f32 0.020833334, %v3812_v18 }
0x1fdc   :  { %v3814_v9 = vpop.xlane.xlu1 %3813 }
0x1fdd   :  { %v3817_v22 = vadd.f32 1e-05, %v3815_v11  ;;  %v3816_v38 = vmul.f32 0.020833334, %v3814_v9  ;;  %v4338_v9 = vld [vmem:[%s6502_s3 + $0x18] sm:$0x3] }
0x1fdf   :  { %5510 = vrsqrt.f32 %v3817_v22  ;;  %v3818_v50 = vadd.f32 1e-05, %v3816_v38  ;;  %v4054_v22 = vrot.slane %v4338_v9, %v5751_v29 }
0x1fe1   :  { %5512 = vrsqrt.f32 %v3818_v50  ;;  %v4060_v50 = vrot.slane %v4338_v9, %v5741_v26 }
0x1fe9   :  { %v5511_v32 = vpop.eup %5510 }
0x1fea   :  { %v3821_v23 = vmul.f32 %v5511_v32, %v3807_v44 }
0x1feb   :  { %v5513_v19 = vpop.eup %5512 }
0x1fec   :  { %v3822_v34 = vmul.f32 %v5513_v19, %v3808_v51  ;;  %v3827_v35 = vmul.f32 %v3826_v20, %v3821_v23 }
0x1fee   :  { %v3828_v37 = vmul.f32 %v3826_v20, %v3822_v34  ;;  %v3833_v40 = vadd.f32 %v3832_v36, %v3827_v35 }
0x1ff0   :  { %v3834_v47 = vadd.f32 %v3832_v36, %v3828_v37 }
0x1ff2   :  { %v3835_v41 = vpack.c.bf16 %v3834_v47, %v3833_v40 }
0x1ff4   :  { %5168 = vmatmul.mubr.bf16.vlgmr.msra.gmra.mrb[80].mxu1 %v3835_v41 }
0x1ff5   :  { %5207 = vmatprep.mubr.msk.bf16.mxu1 %vm5619_vm0, %v5618_v0  ;;  %5192 = vmatpush3.bf16.msra.mxu1 %v5398_v6  ;;  %vm4104_vm0 = vcmask 1041409  }
0x1ff6   :  { %5193 = vmatprep.subr.bf16.mxu1 %v5618_v0 }
0x1ff9   :  { %5194 = vmatpush3.bf16.msra.mxu1 %v5399_v7 }
0x1ffa   :  { %5195 = vmatprep.subr.bf16.mxu1 %v5618_v0 }
0x1ffd   :  { %5196 = vmatpush3.bf16.msra.mxu1 %v5400_v28 }
0x1ffe   :  { %5197 = vmatprep.subr.bf16.mxu1 %v5618_v0 }
0x2001   :  { %5198 = vmatpush3.bf16.msra.mxu1 %v5401_v8 }
0x2002   :  { %5199 = vmatprep.subr.bf16.mxu1 %v5618_v0 }
0x2005   :  { %5200 = vmatpush3.bf16.msra.mxu1 %v5402_v3 }
0x2006   :  { %5201 = vmatprep.subr.bf16.mxu1 %v5618_v0 }
0x2009   :  { %5202 = vmatpush3.bf16.msra.mxu1 %v5403_v1 }
0x200a   :  { %5203 = vmatprep.subr.bf16.mxu1 %v5618_v0 }
0x200d   :  { %5204 = vmatpush3.bf16.msra.mxu1 %v5404_v10 }
0x200e   :  { %5205 = vmatprep.subr.bf16.mxu1 %v5618_v0 }
0x2011   :  { %5206 = vmatpush3.bf16.msra.mxu1 %v5405_v12 }
0x20c7   :  { %v3922_v42 = vpop.f32.mrb[80].mxu1 }
0x20c8   :  { %v3923_v39 = vadd.f32 %v3922_v42, %v3839_v52  ;;  %v5169_v54 = vpop.f32.mrb[81].mxu1 }
0x20c9   :  { %v3925_v55 = vpop.f32.mrb[82].mxu1 }
0x20ca   :  { %v3926_v49 = vadd.f32 %v3925_v55, %v3839_v52  ;;  %v5170_v56 = vpop.f32.mrb[83].mxu1  ;;  %v3929_v58 = vmax.f32 %v3923_v39, 0.0 }
0x20cc   :  { %v3930_v31 = vmax.f32 %v3926_v49, 0.0 }
0x20ce   :  { %v3931_v59 = vpack.c.bf16 %v3930_v31, %v3929_v58 }
0x20d0   :  { %5188 = vmatmul.mubr.bf16.vlgmr.msra.gmra.mrb[72].mxu0 %v3931_v59  ;;  %v5620_v59 = vmov 1966171168  }
0x21a3   :  { %v4018_v27 = vpop.f32.mrb[72].mxu0 }
0x21a4   :  { %v4019_v24 = vadd.f32 %v4018_v27, %v3935_v57  ;;  %v5189_v21 = vpop.f32.mrb[73].mxu0 }
0x21a5   :  { %v4021_v48 = vpop.f32.mrb[74].mxu0 }
0x21a6   :  { %v4022_v60 = vadd.f32 %v4021_v48, %v3935_v57  ;;  %v5190_v16 = vpop.f32.mrb[75].mxu0  ;;  %v4025_v61 = vadd.f32 %v4019_v24, %v3833_v40  ;;  %v4198_v57 = vunpack.c.l.s4 %v5620_v59  ;;  %v4435_v24 = vld [vmem:[%s6504_s5] ss:$0 sm:$0xff] }
0x21a8   :  { %4027 = vadd.xlane.f32.xlu0 %v4025_v61  ;;  %v4026_v62 = vadd.f32 %v4022_v60, %v3834_v47  ;;  %v4199_v27 = vunpack.c.0.s8 %v4198_v57 }
0x21aa   :  { %4029 = vadd.xlane.f32.xlu1 %v4026_v62  ;;  %v4202_v21 = vsub.s32 %v4199_v27, %v5738_v25 }
0x2235   :  { %v4028_v30 = vpop.xlane.xlu0 %4027 }
0x2236   :  { %v4031_v63 = vmul.f32 0.020833334, %v4028_v30 }
0x2237   :  { %v4030_v4 = vpop.xlane.xlu1 %4029 }
0x2238   :  { %v4033_v44 = vsub.f32 %v4025_v61, %v4031_v63  ;;  %v4032_v45 = vmul.f32 0.020833334, %v4030_v4 }
0x223a   :  { %v4034_v51 = vsub.f32 %v4026_v62, %v4032_v45  ;;  %v4035_v46 = vsel %vm66_vm14, %v4033_v44, 0.0 }
0x223b   :  { %v4037_v33 = vmul.f32 %v4035_v46, %v4035_v46 }
0x223c   :  { %v4036_v5 = vsel %vm66_vm14, %v4034_v51, 0.0 }
0x223d   :  { %4039 = vadd.xlane.f32.xlu0 %v4037_v33  ;;  %v4038_v53 = vmul.f32 %v4036_v5, %v4036_v5 }
0x223f   :  { %4041 = vadd.xlane.f32.xlu1 %v4038_v53 }
0x22ca   :  { %v4040_v13 = vpop.xlane.xlu0 %4039 }
0x22cb   :  { %v4043_v14 = vmul.f32 0.020833334, %v4040_v13 }
0x22cc   :  { %v4042_v15 = vpop.xlane.xlu1 %4041 }
0x22cd   :  { %v4045_v17 = vadd.f32 1e-05, %v4043_v14  ;;  %v4044_v18 = vmul.f32 0.020833334, %v4042_v15 }
0x22cf   :  { %5514 = vrsqrt.f32 %v4045_v17  ;;  %v4046_v11 = vadd.f32 1e-05, %v4044_v18 }
0x22d1   :  { %5516 = vrsqrt.f32 %v4046_v11 }
0x22d9   :  { %v5515_v38 = vpop.eup %5514 }
0x22da   :  { %v4049_v20 = vmul.f32 %v5515_v38, %v4035_v46 }
0x22db   :  { %v5517_v0 = vpop.eup %5516 }
0x22dc   :  { %v4055_v32 = vmul.f32 %v4054_v22, %v4049_v20  ;;  %v4050_v23 = vmul.f32 %v5517_v0, %v4036_v5 }
0x22de   :  { %v4061_v19 = vadd.f32 %v4060_v50, %v4055_v32  ;;  %v4056_v34 = vmul.f32 %v4054_v22, %v4050_v23 }
0x22e0   :  { %v4063_v35 = vrot.slane %v4061_v19, 4  ;;  %v4062_v36 = vadd.f32 %v4060_v50, %v4056_v34 }
0x22e2   :  { %v4069_v37 = vrot.slane %v4062_v36, 4  ;;  %v4064_v40 = vmax.f32 %v4061_v19, %v4063_v35 }
0x22e4   :  { %v4065_v47 = vrot.slane %v4064_v40, 2  ;;  %v4070_v41 = vmax.f32 %v4062_v36, %v4069_v37 }
0x22e6   :  { %v4066_v43 = vmax.f32 %v4064_v40, %v4065_v47  ;;  %v4071_v2 = vrot.slane %v4070_v41, 2 }
0x22e8   :  { %v4067_v52 = vrot.slane %v4066_v43, 1  ;;  %v4072_v42 = vmax.f32 %v4070_v41, %v4071_v2 }
0x22ea   :  { %v4068_v29 = vmax.f32 %v4066_v43, %v4067_v52  ;;  %v4073_v39 = vrot.slane %v4072_v42, 1 }
0x22ec   :  { %v4074_v54 = vmax.f32 %v4072_v42, %v4073_v39  ;;  %v4075_v26 = vpack.c.bf16 %v4068_v29, %v4068_v29 }
0x22ee   :  { %v4076_v55 = vpack.c.bf16 %v4074_v54, %v4074_v54  ;;  %v4102_v49 = vunpack.c.l.b16 %v4075_v26 }
0x22f0   :  { %v4103_v56 = vunpack.c.l.b16 %v4076_v55 }
0x22f2   :  { %v4105_v58 = vsel %vm4104_vm0, %v4103_v56, %v4102_v49 }
0x22f3   :  { %v4106_v31 = vpack.c.b16 %v4105_v58, %v4105_v58 }
0x22f5   :  { %5208 = vmatmul.mubr.bf16.vlgmr.msra.gmra.mrb[84].mxu1 %v4106_v31 }
0x23c8   :  { %v4190_v48 = vpop.f32.mrb[84].mxu1 }
0x23c9   :  { %v4191_v60 = vadd.f32 %v4435_v24, %v4190_v48  ;;  %v5209_v16 = vpop.f32.mrb[85].mxu1 }
0x23ca   :  { %v4193_v61 = vpop.f32.mrb[86].mxu1 }
0x23cb   :  { %v4203_v62 = vrot.slane %v4191_v60, %v4202_v21  ;;  %v5210_v30 = vpop.f32.mrb[87].mxu1 }
0x23cd   :  { %v4204_v63 = vcombine.high %v4203_v62, %v4203_v62  ;;  %4444 = vst.sshfl [vmem:[#allocation8] sm:$0x1 pattern:$0x73625140] %v4203_v62 }
0x23cf   :  { %4445 = vst.sshfl [vmem:[#allocation8 + $0x1] sm:$0x1 pattern:$0x73625140] %v4204_v63 }
0x23d0   :  { %5596 = shalt.err (!%p5593_p0)
}
0x23d1   :  { %s5597_s11 = scalar_lea.hbm %s6505_s6, 32 }
0x23d2   :  { %p5598_p1 = scmp.ne.s32.totalorder %s6505_s6, %s5597_s11  ;;  %p5601_p2 = scmp.lt.u32.totalorder %s5597_s11, %s6505_s6 }
0x23d4   :  { %p5603_p3 = pnand %p5601_p2, %p5598_p1 }
0x23d6   :  { %5606 = shalt.err (!%p5603_p3)
}
0x23d7   :  { %s5622_s16 = smov 16   ;;  %s5623_s17 = smov 1  }
0x23d8   :  { %4234 = dma.vmem_to_hbm [thread:$0]  %s4229_s2, 32, %s6505_s6, [#allocation4], %s5622_s16, %s5622_s16, %s5623_s17  }
0x23d9   :  { %5611 = dma.done.wait [#allocation4], 32  }
0x23da   :  { %5612 = vsyncadd [#allocation4], 4294967264 }
0x23db   :  { %4238 = vsyncpa [#allocation3], 1 }
0x23dc   :  { %4239 = vsyncpa [#allocation6], 1 }
0x23dd   :  { %4240 = vsyncpa [#allocation4], 1 }

</bundles_post_ra>
